<compile_context>
chip_gen: v7x
topology: tpu7x:2x2x1
jax: 0.10.0
libtpu: 0.0.40
codegen_flags: <defaults>
</compile_context>

<pallas_src>
import functools

import jax
import jax.numpy as jnp
from jax.experimental import pallas as pl
from jax.experimental.pallas import tpu as pltpu

NUM_HEADS = 4
ATTN_EMBED_DIM = 512
HEAD_PAD = 128          # lane-dense width of the fused emo/val/idx output slab


def _round_up(x, m):
    return ((x + m - 1) // m) * m


# ----------------------------------------------------------------------------
# The single fused forward kernel
# ----------------------------------------------------------------------------
def _fused_forward_kernel(
    # activations (batch-tiled)
    t_ref, a_ref, v_ref,
    # discriminator (reconstructed): per-modality 2-layer MLP -> score
    dtw1, dtb1, dtw2r, dtb2,
    daw1, dab1, daw2r, dab2,
    dvw1, dvb1, dvw2r, dvb2,
    # composed MHA groups (by kv operand): [dkv, 3*E] bf16 weights
    wt, bt, wa, ba, wv, bv,
    # LF_DNN (reconstructed): subnets + fusion + fused emo/val head
    smw1, smb1, smw2, smb2,
    s1w1a, s1w1b, s1b1, s1w2, s1b2,
    s2w1a, s2w1b, s2b1, s2w2, s2b2,
    f1wa, f1wb, f1wc, f1b,
    f2w, f2b,
    hw, hb,
    # outputs
    feat_ref, head_ref,
    *, embed_dim, n_emotions):

    bf16 = jnp.bfloat16

    # cast activations to bf16 once (MXU operands only; elementwise stays f32)
    t16 = t_ref[...].astype(bf16)
    a16 = a_ref[...].astype(bf16)
    v16 = v_ref[...].astype(bf16)

    def mm(x16, w_r):
        return jnp.dot(x16, w_r[...], preferred_element_type=jnp.float32)

    def lin(x32, w_r, b_r):
        return mm(x32.astype(bf16), w_r) + b_r[...]

    def relu(x):
        return jnp.maximum(x, 0.0)

    # ---- Attention_TOPN_Discriminator (reconstructed scoring MLPs) ----------
    # TODO(synk): discriminator source not in the provided file; reconstructed
    # as per-modality MLP score + argmax, raw features passed through.
    # The N=1 second layer is a VPU/XLU row reduction, not an MXU matmul.
    def disc_score(x16, w1, b1, w2_row, b2):
        h1 = relu(mm(x16, w1) + b1[...])                              # [TB, h]
        return jnp.sum(h1 * w2_row[...], axis=-1, keepdims=True) + b2[...]

    s_t = disc_score(t16, dtw1, dtb1, dtw2r, dtb2)                    # [TB, 1]
    s_a = disc_score(a16, daw1, dab1, daw2r, dab2)
    s_v = disc_score(v16, dvw1, dvb1, dvw2r, dvb2)

    is_t = jnp.logical_and(s_t >= s_a, s_t >= s_v)                    # [TB, 1]
    is_a = jnp.logical_and(jnp.logical_not(is_t), s_a >= s_v)         # [TB, 1]

    # ---- 9 MHAs (seq_len==1 => softmax==1 => out = kv @ (WvWo) + (bvWo+bo)) --
    e = embed_dim
    g_t = mm(t16, wt) + bt[...]   # [TB, 3E] : [ self_t | AT | VT ]
    g_a = mm(a16, wa) + ba[...]   # [TB, 3E] : [ self_a | TA | VA ]
    g_v = mm(v16, wv) + bv[...]   # [TB, 3E] : [ self_v | TV | AV ]

    self_t, at_o, vt_o = g_t[:, :e], g_t[:, e:2 * e], g_t[:, 2 * e:]
    self_a, ta_o, va_o = g_a[:, :e], g_a[:, e:2 * e], g_a[:, 2 * e:]
    self_v, tv_o, av_o = g_v[:, :e], g_v[:, e:2 * e], g_v[:, 2 * e:]

    # ---- per-sample branch on main_index, vectorised ------------------------
    # Hoist the [TB,1]->[TB,E] broadcasts once and reuse them in all 5 sel().
    bt_full = jnp.broadcast_to(is_t, (is_t.shape[0], e))
    ba_full = jnp.broadcast_to(is_a, (is_a.shape[0], e))

    def sel(x_t, x_a, x_v):
        return jnp.where(bt_full, x_t, jnp.where(ba_full, x_a, x_v))

    main_feat = sel(self_t, self_a, self_v)   # [TB, E]
    sec1a = sel(ta_o, at_o, va_o)             # first  half of sec_feat1
    sec1b = sel(at_o, ta_o, av_o)             # second half of sec_feat1
    sec2a = sel(tv_o, av_o, vt_o)             # first  half of sec_feat2
    sec2b = sel(vt_o, va_o, tv_o)             # second half of sec_feat2

    # ---- LF_DNN --------------------------------------------------------------
    # TODO(synk): LF_DNN source not in the provided file; reconstructed as three
    # per-stream subnets -> fusion MLP -> emo/val heads.  The 2E->h and 3h->h
    # weights are pre-split offline so no jnp.concatenate (VMEM copies) appear.
    h_m = relu(lin(relu(lin(main_feat, smw1, smb1)), smw2, smb2))
    h1p = relu(mm(sec1a.astype(bf16), s1w1a) + mm(sec1b.astype(bf16), s1w1b)
               + s1b1[...])
    h_1 = relu(lin(h1p, s1w2, s1b2))
    h2p = relu(mm(sec2a.astype(bf16), s2w1a) + mm(sec2b.astype(bf16), s2w1b)
               + s2b1[...])
    h_2 = relu(lin(h2p, s2w2, s2b2))

    feat = relu(mm(h_m.astype(bf16), f1wa) + mm(h_1.astype(bf16), f1wb)
                + mm(h_2.astype(bf16), f1wc) + f1b[...])
    feat = relu(lin(feat, f2w, f2b))
    feat_ref[...] = feat

    # fused emo/val heads on a zero-padded, lane-dense [TB, 128] slab; the
    # main_index (0/1/2) is folded into column n_emotions+1 of that slab.
    head = lin(feat, hw, hb)                                      # [TB, 128]
    idx_f = jnp.where(is_t, 0.0, jnp.where(is_a, 1.0, 2.0))       # [TB, 1]
    lane = jax.lax.broadcasted_iota(jnp.int32, head.shape, 1)
    head_ref[...] = jnp.where(lane == (n_emotions + 1), idx_f, head)


# ----------------------------------------------------------------------------
# pallas_call wrapper (one kernel for the whole forward)
# ----------------------------------------------------------------------------
_WEIGHT_KEYS = (
    "disc_t_w1", "disc_t_b1", "disc_t_w2r", "disc_t_b2",
    "disc_a_w1", "disc_a_b1", "disc_a_w2r", "disc_a_b2",
    "disc_v_w1", "disc_v_b1", "disc_v_w2r", "disc_v_b2",
    "mha_t_w", "mha_t_b", "mha_a_w", "mha_a_b", "mha_v_w", "mha_v_b",
    "sub_m_w1", "sub_m_b1", "sub_m_w2", "sub_m_b2",
    "sub_1_w1a", "sub_1_w1b", "sub_1_b1", "sub_1_w2", "sub_1_b2",
    "sub_2_w1a", "sub_2_w1b", "sub_2_b1", "sub_2_w2", "sub_2_b2",
    "fuse1_wa", "fuse1_wb", "fuse1_wc", "fuse1_b",
    "fuse2_w", "fuse2_b",
    "head_w", "head_b",
)


def _weight_spec(arr):
    # Grid-invariant weight: full block, constant index_map.  Request a single
    # buffer (no double buffering -> ~1.7 MB VMEM saved); fall back cleanly if
    # this JAX version's BlockSpec has no pipeline_mode.
    try:
        return pl.BlockSpec(arr.shape, lambda i: (0, 0),
                            pipeline_mode=pl.Buffered(1))
    except (TypeError, AttributeError):
        return pl.BlockSpec(arr.shape, lambda i: (0, 0))


def topn_lf_dnn_forward(fp, texts, audios, videos, *, n_emotions):
    B, dt = texts.shape
    da = audios.shape[1]
    dv = videos.shape[1]
    h = fp["fuse2_w"].shape[1]
    head_pad = fp["head_w"].shape[1]

    # --- generation-aware batch tiling ---------------------------------------
    #  tiny batch: one sublane-aligned tile; otherwise ~B/2 rows per tile capped
    #  at 512 so there are >= 2 grid steps for v7x's two TensorCores while tiles
    #  stay big enough to amortize per-step overhead on single-core v5e/v6e.
    if B <= 16:
        TB = max(8, _round_up(B, 8))
    else:
        TB = min(512, _round_up((B + 1) // 2, 8))
    Bp = _round_up(B, TB)
    pad = Bp - B
    if pad:
        texts = jnp.pad(texts, ((0, pad), (0, 0)))
        audios = jnp.pad(audios, ((0, pad), (0, 0)))
        videos = jnp.pad(videos, ((0, pad), (0, 0)))

    w_args = tuple(fp[k] for k in _WEIGHT_KEYS)

    def batch_spec(dim):
        return pl.BlockSpec((TB, dim), lambda i: (i, 0))

    in_specs = ([batch_spec(dt), batch_spec(da), batch_spec(dv)]
                + [_weight_spec(w) for w in w_args])

    out_shape = (jax.ShapeDtypeStruct((Bp, h), jnp.float32),
                 jax.ShapeDtypeStruct((Bp, head_pad), jnp.float32))
    out_specs = (batch_spec(h), batch_spec(head_pad))

    kern = functools.partial(_fused_forward_kernel,
                             embed_dim=ATTN_EMBED_DIM, n_emotions=n_emotions)
    feat_p, head_p = pl.pallas_call(
        kern,
        grid=(Bp // TB,),
        out_shape=out_shape,
        in_specs=in_specs,
        out_specs=out_specs,
        compiler_params=pltpu.CompilerParams(
            dimension_semantics=("parallel",),
            vmem_limit_bytes=48 * 1024 * 1024),
    )(texts, audios, videos, *w_args)

    feat = feat_p[:B]
    emos_out = head_p[:B, :n_emotions]
    vals_out = head_p[:B, n_emotions:n_emotions + 1]
    main_index = head_p[:B, n_emotions + 1].astype(jnp.int32)
    return feat, emos_out, vals_out, main_index


# ----------------------------------------------------------------------------
# Deterministic parameter initialisation (synthetic — no checkpoint load)
# ----------------------------------------------------------------------------
def _init_linear(key, din, dout, scale=0.02):
    kw, kb = jax.random.split(key)
    return {"w": jax.random.normal(kw, (din, dout), jnp.float32) * scale,
            "b": jax.random.normal(kb, (dout,), jnp.float32) * scale}


def _init_mha(key, dq, dkv, e, scale=0.02):
    ks = jax.random.split(key, 8)
    return {"wq": jax.random.normal(ks[0], (dq, e), jnp.float32) * scale,
            "bq": jax.random.normal(ks[1], (e,), jnp.float32) * scale,
            "wk": jax.random.normal(ks[2], (dkv, e), jnp.float32) * scale,
            "bk": jax.random.normal(ks[3], (e,), jnp.float32) * scale,
            "wv": jax.random.normal(ks[4], (dkv, e), jnp.float32) * scale,
            "bv": jax.random.normal(ks[5], (e,), jnp.float32) * scale,
            "wo": jax.random.normal(ks[6], (e, e), jnp.float32) * scale,
            "bo": jax.random.normal(ks[7], (e,), jnp.float32) * scale}


def init_params(key, args):
    e = ATTN_EMBED_DIM
    dt, da, dv = args["text_dim"], args["audio_dim"], args["video_dim"]
    h = args["hidden"]
    keys = iter(jax.random.split(key, 32))
    params = {
        "disc": {
            "t": {"l1": _init_linear(next(keys), dt, h), "l2": _init_linear(next(keys), h, 1)},
            "a": {"l1": _init_linear(next(keys), da, h), "l2": _init_linear(next(keys), h, 1)},
            "v": {"l1": _init_linear(next(keys), dv, h), "l2": _init_linear(next(keys), h, 1)},
        },
        "self_t": _init_mha(next(keys), dt, dt, e),
        "self_a": _init_mha(next(keys), da, da, e),
        "self_v": _init_mha(next(keys), dv, dv, e),
        "TA": _init_mha(next(keys), dt, da, e),
        "TV": _init_mha(next(keys), dt, dv, e),
        "VA": _init_mha(next(keys), dv, da, e),
        "VT": _init_mha(next(keys), dv, dt, e),
        "AT": _init_mha(next(keys), da, dt, e),
        "AV": _init_mha(next(keys), da, dv, e),
        "lf_dnn": {
            "sub_m": {"l1": _init_linear(next(keys), e, h), "l2": _init_linear(next(keys), h, h)},
            "sub_1": {"l1": _init_linear(next(keys), 2 * e, h), "l2": _init_linear(next(keys), h, h)},
            "sub_2": {"l1": _init_linear(next(keys), 2 * e, h), "l2": _init_linear(next(keys), h, h)},
            "fuse1": _init_linear(next(keys), 3 * h, h),
            "fuse2": _init_linear(next(keys), h, h),
            "emo": _init_linear(next(keys), h, args["n_emotions"]),
            "val": _init_linear(next(keys), h, 1),
        },
    }
    return params


def prepare_params(params):
    """Pre-compose the seq_len==1 MHA weights, pre-split the concat weights,
    fuse+zero-pad the emo/val heads to a lane-dense 128-wide block, and store
    all matmul weights in bfloat16 (biases stay float32)."""
    bf16 = jnp.bfloat16
    f32 = jnp.float32
    e = ATTN_EMBED_DIM

    def compose(p):
        w = p["wv"] @ p["wo"]                # [dkv, E]
        b = p["bv"] @ p["wo"] + p["bo"]      # [E]
        return w, b

    def group(names):
        ws, bs = zip(*(compose(params[n]) for n in names))
        return (jnp.concatenate(ws, axis=1).astype(bf16),
                jnp.concatenate(bs, axis=0).reshape(1, -1).astype(f32))

    fp = {}

    d = params["disc"]
    for mod, key in (("t", "disc_t"), ("a", "disc_a"), ("v", "disc_v")):
        fp[key + "_w1"] = d[mod]["l1"]["w"].astype(bf16)
        fp[key + "_b1"] = d[mod]["l1"]["b"].reshape(1, -1).astype(f32)
        fp[key + "_w2r"] = d[mod]["l2"]["w"].reshape(1, -1).astype(f32)  # row for VPU reduce
        fp[key + "_b2"] = d[mod]["l2"]["b"].reshape(1, 1).astype(f32)

    # TODO(synk): on v7x the three composed blocks below could be stored in fp8
    # (MXU-native) for another ~2x weight-read saving; left bf16 pending an
    # accuracy check against the f32 reference.
    fp["mha_t_w"], fp["mha_t_b"] = group(("self_t", "AT", "VT"))
    fp["mha_a_w"], fp["mha_a_b"] = group(("self_a", "TA", "VA"))
    fp["mha_v_w"], fp["mha_v_b"] = group(("self_v", "TV", "AV"))

    lf = params["lf_dnn"]
    fp["sub_m_w1"] = lf["sub_m"]["l1"]["w"].astype(bf16)
    fp["sub_m_b1"] = lf["sub_m"]["l1"]["b"].reshape(1, -1).astype(f32)
    fp["sub_m_w2"] = lf["sub_m"]["l2"]["w"].astype(bf16)
    fp["sub_m_b2"] = lf["sub_m"]["l2"]["b"].reshape(1, -1).astype(f32)

    for sub in ("sub_1", "sub_2"):
        w1 = lf[sub]["l1"]["w"]              # [2E, h] -> two [E, h] halves
        fp[sub + "_w1a"] = w1[:e].astype(bf16)
        fp[sub + "_w1b"] = w1[e:].astype(bf16)
        fp[sub + "_b1"] = lf[sub]["l1"]["b"].reshape(1, -1).astype(f32)
        fp[sub + "_w2"] = lf[sub]["l2"]["w"].astype(bf16)
        fp[sub + "_b2"] = lf[sub]["l2"]["b"].reshape(1, -1).astype(f32)

    h = lf["fuse2"]["w"].shape[0]
    f1w = lf["fuse1"]["w"]                   # [3h, h] -> three [h, h] blocks
    fp["fuse1_wa"] = f1w[:h].astype(bf16)
    fp["fuse1_wb"] = f1w[h:2 * h].astype(bf16)
    fp["fuse1_wc"] = f1w[2 * h:].astype(bf16)
    fp["fuse1_b"] = lf["fuse1"]["b"].reshape(1, -1).astype(f32)
    fp["fuse2_w"] = lf["fuse2"]["w"].astype(bf16)
    fp["fuse2_b"] = lf["fuse2"]["b"].reshape(1, -1).astype(f32)

    n_emotions = lf["emo"]["w"].shape[1]
    assert n_emotions + 2 <= HEAD_PAD
    hw = jnp.concatenate([lf["emo"]["w"], lf["val"]["w"]], axis=1)   # [h, n_emo+1]
    hb = jnp.concatenate([lf["emo"]["b"], lf["val"]["b"]], axis=0)   # [n_emo+1]
    pad_cols = HEAD_PAD - hw.shape[1]
    fp["head_w"] = jnp.pad(hw, ((0, 0), (0, pad_cols))).astype(bf16)
    fp["head_b"] = jnp.pad(hb, (0, pad_cols)).reshape(1, -1).astype(f32)
    return fp


if __name__ == "__main__":
    args = {"text_dim": 128, "audio_dim": 64, "video_dim": 96,
            "dropout": 0.0, "hidden": 128, "n_emotions": 6, "grad_clip": 1.0}

    key = jax.random.PRNGKey(0)
    k_in, k_par = jax.random.split(key)
    kt, ka, kvid = jax.random.split(k_in, 3)

    B = 4
    texts = jax.random.normal(kt, (B, args["text_dim"]), jnp.float32)
    audios = jax.random.normal(ka, (B, args["audio_dim"]), jnp.float32)
    videos = jax.random.normal(kvid, (B, args["video_dim"]), jnp.float32)

    params = init_params(k_par, args)
    fused_params = prepare_params(params)

    fwd = jax.jit(functools.partial(topn_lf_dnn_forward,
                                    n_emotions=args["n_emotions"]))
    feat, emos_out, vals_out, main_index = fwd(fused_params, texts, audios, videos)
    jax.block_until_ready((feat, emos_out, vals_out, main_index))

    assert feat.shape == (B, args["hidden"])
    assert emos_out.shape == (B, args["n_emotions"])
    assert vals_out.shape == (B, 1)
    assert main_index.shape == (B,)
    assert main_index.dtype == jnp.int32
    assert bool(jnp.all((main_index >= 0) & (main_index <= 2)))
    print("KERNEL_OK")
</pallas_src>

<mosaic_0001>
module attributes {stable_mosaic.version = 11 : i64} {
  func.func @_fused_forward_kernel(%arg0: i32, %arg1: memref<8x128xf32, #tpu.memory_space<vmem>>, %arg2: memref<8x64xf32, #tpu.memory_space<vmem>>, %arg3: memref<8x96xf32, #tpu.memory_space<vmem>>, %arg4: memref<128x128xbf16, #tpu.memory_space<vmem>>, %arg5: memref<1x128xf32, #tpu.memory_space<vmem>>, %arg6: memref<1x128xf32, #tpu.memory_space<vmem>>, %arg7: memref<1x1xf32, #tpu.memory_space<vmem>>, %arg8: memref<64x128xbf16, #tpu.memory_space<vmem>>, %arg9: memref<1x128xf32, #tpu.memory_space<vmem>>, %arg10: memref<1x128xf32, #tpu.memory_space<vmem>>, %arg11: memref<1x1xf32, #tpu.memory_space<vmem>>, %arg12: memref<96x128xbf16, #tpu.memory_space<vmem>>, %arg13: memref<1x128xf32, #tpu.memory_space<vmem>>, %arg14: memref<1x128xf32, #tpu.memory_space<vmem>>, %arg15: memref<1x1xf32, #tpu.memory_space<vmem>>, %arg16: memref<128x1536xbf16, #tpu.memory_space<vmem>>, %arg17: memref<1x1536xf32, #tpu.memory_space<vmem>>, %arg18: memref<64x1536xbf16, #tpu.memory_space<vmem>>, %arg19: memref<1x1536xf32, #tpu.memory_space<vmem>>, %arg20: memref<96x1536xbf16, #tpu.memory_space<vmem>>, %arg21: memref<1x1536xf32, #tpu.memory_space<vmem>>, %arg22: memref<512x128xbf16, #tpu.memory_space<vmem>>, %arg23: memref<1x128xf32, #tpu.memory_space<vmem>>, %arg24: memref<128x128xbf16, #tpu.memory_space<vmem>>, %arg25: memref<1x128xf32, #tpu.memory_space<vmem>>, %arg26: memref<512x128xbf16, #tpu.memory_space<vmem>>, %arg27: memref<512x128xbf16, #tpu.memory_space<vmem>>, %arg28: memref<1x128xf32, #tpu.memory_space<vmem>>, %arg29: memref<128x128xbf16, #tpu.memory_space<vmem>>, %arg30: memref<1x128xf32, #tpu.memory_space<vmem>>, %arg31: memref<512x128xbf16, #tpu.memory_space<vmem>>, %arg32: memref<512x128xbf16, #tpu.memory_space<vmem>>, %arg33: memref<1x128xf32, #tpu.memory_space<vmem>>, %arg34: memref<128x128xbf16, #tpu.memory_space<vmem>>, %arg35: memref<1x128xf32, #tpu.memory_space<vmem>>, %arg36: memref<128x128xbf16, #tpu.memory_space<vmem>>, %arg37: memref<128x128xbf16, #tpu.memory_space<vmem>>, %arg38: memref<128x128xbf16, #tpu.memory_space<vmem>>, %arg39: memref<1x128xf32, #tpu.memory_space<vmem>>, %arg40: memref<128x128xbf16, #tpu.memory_space<vmem>>, %arg41: memref<1x128xf32, #tpu.memory_space<vmem>>, %arg42: memref<128x128xbf16, #tpu.memory_space<vmem>>, %arg43: memref<1x128xf32, #tpu.memory_space<vmem>>, %arg44: memref<8x128xf32, #tpu.memory_space<vmem>>, %arg45: memref<8x128xf32, #tpu.memory_space<vmem>>) attributes {dimension_semantics = [#tpu.dimension_semantics<parallel>], iteration_bounds = array<i64: 1>, scalar_prefetch = 0 : i64, scratch_operands = 0 : i64, tpu.core_type = #tpu.core_type<tc>, window_params = [{transform_indices = @transform_0, window_bounds = array<i64: 8, 128>}, {transform_indices = @transform_1, window_bounds = array<i64: 8, 64>}, {transform_indices = @transform_2, window_bounds = array<i64: 8, 96>}, {pipeline_mode = #tpu.pipeline_mode<synchronous>, transform_indices = @transform_3, window_bounds = array<i64: 128, 128>}, {pipeline_mode = #tpu.pipeline_mode<synchronous>, transform_indices = @transform_4, window_bounds = array<i64: 1, 128>}, {pipeline_mode = #tpu.pipeline_mode<synchronous>, transform_indices = @transform_5, window_bounds = array<i64: 1, 128>}, {pipeline_mode = #tpu.pipeline_mode<synchronous>, transform_indices = @transform_6, window_bounds = array<i64: 1, 1>}, {pipeline_mode = #tpu.pipeline_mode<synchronous>, transform_indices = @transform_7, window_bounds = array<i64: 64, 128>}, {pipeline_mode = #tpu.pipeline_mode<synchronous>, transform_indices = @transform_8, window_bounds = array<i64: 1, 128>}, {pipeline_mode = #tpu.pipeline_mode<synchronous>, transform_indices = @transform_9, window_bounds = array<i64: 1, 128>}, {pipeline_mode = #tpu.pipeline_mode<synchronous>, transform_indices = @transform_10, window_bounds = array<i64: 1, 1>}, {pipeline_mode = #tpu.pipeline_mode<synchronous>, transform_indices = @transform_11, window_bounds = array<i64: 96, 128>}, {pipeline_mode = #tpu.pipeline_mode<synchronous>, transform_indices = @transform_12, window_bounds = array<i64: 1, 128>}, {pipeline_mode = #tpu.pipeline_mode<synchronous>, transform_indices = @transform_13, window_bounds = array<i64: 1, 128>}, {pipeline_mode = #tpu.pipeline_mode<synchronous>, transform_indices = @transform_14, window_bounds = array<i64: 1, 1>}, {pipeline_mode = #tpu.pipeline_mode<synchronous>, transform_indices = @transform_15, window_bounds = array<i64: 128, 1536>}, {pipeline_mode = #tpu.pipeline_mode<synchronous>, transform_indices = @transform_16, window_bounds = array<i64: 1, 1536>}, {pipeline_mode = #tpu.pipeline_mode<synchronous>, transform_indices = @transform_17, window_bounds = array<i64: 64, 1536>}, {pipeline_mode = #tpu.pipeline_mode<synchronous>, transform_indices = @transform_18, window_bounds = array<i64: 1, 1536>}, {pipeline_mode = #tpu.pipeline_mode<synchronous>, transform_indices = @transform_19, window_bounds = array<i64: 96, 1536>}, {pipeline_mode = #tpu.pipeline_mode<synchronous>, transform_indices = @transform_20, window_bounds = array<i64: 1, 1536>}, {pipeline_mode = #tpu.pipeline_mode<synchronous>, transform_indices = @transform_21, window_bounds = array<i64: 512, 128>}, {pipeline_mode = #tpu.pipeline_mode<synchronous>, transform_indices = @transform_22, window_bounds = array<i64: 1, 128>}, {pipeline_mode = #tpu.pipeline_mode<synchronous>, transform_indices = @transform_23, window_bounds = array<i64: 128, 128>}, {pipeline_mode = #tpu.pipeline_mode<synchronous>, transform_indices = @transform_24, window_bounds = array<i64: 1, 128>}, {pipeline_mode = #tpu.pipeline_mode<synchronous>, transform_indices = @transform_25, window_bounds = array<i64: 512, 128>}, {pipeline_mode = #tpu.pipeline_mode<synchronous>, transform_indices = @transform_26, window_bounds = array<i64: 512, 128>}, {pipeline_mode = #tpu.pipeline_mode<synchronous>, transform_indices = @transform_27, window_bounds = array<i64: 1, 128>}, {pipeline_mode = #tpu.pipeline_mode<synchronous>, transform_indices = @transform_28, window_bounds = array<i64: 128, 128>}, {pipeline_mode = #tpu.pipeline_mode<synchronous>, transform_indices = @transform_29, window_bounds = array<i64: 1, 128>}, {pipeline_mode = #tpu.pipeline_mode<synchronous>, transform_indices = @transform_30, window_bounds = array<i64: 512, 128>}, {pipeline_mode = #tpu.pipeline_mode<synchronous>, transform_indices = @transform_31, window_bounds = array<i64: 512, 128>}, {pipeline_mode = #tpu.pipeline_mode<synchronous>, transform_indices = @transform_32, window_bounds = array<i64: 1, 128>}, {pipeline_mode = #tpu.pipeline_mode<synchronous>, transform_indices = @transform_33, window_bounds = array<i64: 128, 128>}, {pipeline_mode = #tpu.pipeline_mode<synchronous>, transform_indices = @transform_34, window_bounds = array<i64: 1, 128>}, {pipeline_mode = #tpu.pipeline_mode<synchronous>, transform_indices = @transform_35, window_bounds = array<i64: 128, 128>}, {pipeline_mode = #tpu.pipeline_mode<synchronous>, transform_indices = @transform_36, window_bounds = array<i64: 128, 128>}, {pipeline_mode = #tpu.pipeline_mode<synchronous>, transform_indices = @transform_37, window_bounds = array<i64: 128, 128>}, {pipeline_mode = #tpu.pipeline_mode<synchronous>, transform_indices = @transform_38, window_bounds = array<i64: 1, 128>}, {pipeline_mode = #tpu.pipeline_mode<synchronous>, transform_indices = @transform_39, window_bounds = array<i64: 128, 128>}, {pipeline_mode = #tpu.pipeline_mode<synchronous>, transform_indices = @transform_40, window_bounds = array<i64: 1, 128>}, {pipeline_mode = #tpu.pipeline_mode<synchronous>, transform_indices = @transform_41, window_bounds = array<i64: 128, 128>}, {pipeline_mode = #tpu.pipeline_mode<synchronous>, transform_indices = @transform_42, window_bounds = array<i64: 1, 128>}, {transform_indices = @transform_43, window_bounds = array<i64: 8, 128>}, {transform_indices = @transform_44, window_bounds = array<i64: 8, 128>}]} {
    %c0 = arith.constant 0 : index
    %c0_0 = arith.constant 0 : index
    %0 = vector.load %arg1[%c0, %c0_0] : memref<8x128xf32, #tpu.memory_space<vmem>>, vector<8x128xf32>
    %1 = arith.truncf %0 : vector<8x128xf32> to vector<8x128xbf16>
    %c0_1 = arith.constant 0 : index
    %c0_2 = arith.constant 0 : index
    %2 = vector.load %arg2[%c0_1, %c0_2] : memref<8x64xf32, #tpu.memory_space<vmem>>, vector<8x64xf32>
    %3 = arith.truncf %2 : vector<8x64xf32> to vector<8x64xbf16>
    %c0_3 = arith.constant 0 : index
    %c0_4 = arith.constant 0 : index
    %4 = vector.load %arg3[%c0_3, %c0_4] : memref<8x96xf32, #tpu.memory_space<vmem>>, vector<8x96xf32>
    %5 = arith.truncf %4 : vector<8x96xf32> to vector<8x96xbf16>
    %c0_5 = arith.constant 0 : index
    %c0_6 = arith.constant 0 : index
    %6 = vector.load %arg4[%c0_5, %c0_6] : memref<128x128xbf16, #tpu.memory_space<vmem>>, vector<128x128xbf16>
    %cst = arith.constant dense<0.000000e+00> : vector<8x128xf32>
    %7 = tpu.matmul %1, %6, %cst {dimension_numbers = #tpu.dot_dimension_numbers<[1], [0], [0], [1], [0, 0, 1, 1], [], []>} : vector<8x128xbf16>, vector<128x128xbf16>, vector<8x128xf32> -> vector<8x128xf32>
    %c0_7 = arith.constant 0 : index
    %c0_8 = arith.constant 0 : index
    %8 = vector.load %arg5[%c0_7, %c0_8] : memref<1x128xf32, #tpu.memory_space<vmem>>, vector<1x128xf32>
    %9 = vector.broadcast %8 : vector<1x128xf32> to vector<8x128xf32>
    %10 = arith.addf %7, %9 : vector<8x128xf32>
    %cst_9 = arith.constant 0.000000e+00 : f32
    %11 = vector.broadcast %cst_9 : f32 to vector<8x128xf32>
    %12 = arith.maximumf %10, %11 : vector<8x128xf32>
    %c0_10 = arith.constant 0 : index
    %c0_11 = arith.constant 0 : index
    %13 = vector.load %arg6[%c0_10, %c0_11] : memref<1x128xf32, #tpu.memory_space<vmem>>, vector<1x128xf32>
    %14 = vector.broadcast %13 : vector<1x128xf32> to vector<8x128xf32>
    %15 = arith.mulf %12, %14 : vector<8x128xf32>
    %cst_12 = arith.constant dense<0.000000e+00> : vector<8xf32>
    %16 = vector.multi_reduction <add>, %15, %cst_12 [1] : vector<8x128xf32> to vector<8xf32>
    %17 = vector.shape_cast %16 : vector<8xf32> to vector<8x1xf32>
    %c0_13 = arith.constant 0 : index
    %c0_14 = arith.constant 0 : index
    %18 = vector.load %arg7[%c0_13, %c0_14] : memref<1x1xf32, #tpu.memory_space<vmem>>, vector<1x1xf32>
    %19 = vector.broadcast %18 : vector<1x1xf32> to vector<8x1xf32>
    %20 = arith.addf %17, %19 : vector<8x1xf32>
    %c0_15 = arith.constant 0 : index
    %c0_16 = arith.constant 0 : index
    %21 = vector.load %arg8[%c0_15, %c0_16] : memref<64x128xbf16, #tpu.memory_space<vmem>>, vector<64x128xbf16>
    %cst_17 = arith.constant dense<0.000000e+00> : vector<8x128xf32>
    %22 = tpu.matmul %3, %21, %cst_17 {dimension_numbers = #tpu.dot_dimension_numbers<[1], [0], [0], [1], [0, 0, 1, 1], [], []>} : vector<8x64xbf16>, vector<64x128xbf16>, vector<8x128xf32> -> vector<8x128xf32>
    %c0_18 = arith.constant 0 : index
    %c0_19 = arith.constant 0 : index
    %23 = vector.load %arg9[%c0_18, %c0_19] : memref<1x128xf32, #tpu.memory_space<vmem>>, vector<1x128xf32>
    %24 = vector.broadcast %23 : vector<1x128xf32> to vector<8x128xf32>
    %25 = arith.addf %22, %24 : vector<8x128xf32>
    %cst_20 = arith.constant 0.000000e+00 : f32
    %26 = vector.broadcast %cst_20 : f32 to vector<8x128xf32>
    %27 = arith.maximumf %25, %26 : vector<8x128xf32>
    %c0_21 = arith.constant 0 : index
    %c0_22 = arith.constant 0 : index
    %28 = vector.load %arg10[%c0_21, %c0_22] : memref<1x128xf32, #tpu.memory_space<vmem>>, vector<1x128xf32>
    %29 = vector.broadcast %28 : vector<1x128xf32> to vector<8x128xf32>
    %30 = arith.mulf %27, %29 : vector<8x128xf32>
    %cst_23 = arith.constant dense<0.000000e+00> : vector<8xf32>
    %31 = vector.multi_reduction <add>, %30, %cst_23 [1] : vector<8x128xf32> to vector<8xf32>
    %32 = vector.shape_cast %31 : vector<8xf32> to vector<8x1xf32>
    %c0_24 = arith.constant 0 : index
    %c0_25 = arith.constant 0 : index
    %33 = vector.load %arg11[%c0_24, %c0_25] : memref<1x1xf32, #tpu.memory_space<vmem>>, vector<1x1xf32>
    %34 = vector.broadcast %33 : vector<1x1xf32> to vector<8x1xf32>
    %35 = arith.addf %32, %34 : vector<8x1xf32>
    %c0_26 = arith.constant 0 : index
    %c0_27 = arith.constant 0 : index
    %36 = vector.load %arg12[%c0_26, %c0_27] : memref<96x128xbf16, #tpu.memory_space<vmem>>, vector<96x128xbf16>
    %cst_28 = arith.constant dense<0.000000e+00> : vector<8x128xf32>
    %37 = tpu.matmul %5, %36, %cst_28 {dimension_numbers = #tpu.dot_dimension_numbers<[1], [0], [0], [1], [0, 0, 1, 1], [], []>} : vector<8x96xbf16>, vector<96x128xbf16>, vector<8x128xf32> -> vector<8x128xf32>
    %c0_29 = arith.constant 0 : index
    %c0_30 = arith.constant 0 : index
    %38 = vector.load %arg13[%c0_29, %c0_30] : memref<1x128xf32, #tpu.memory_space<vmem>>, vector<1x128xf32>
    %39 = vector.broadcast %38 : vector<1x128xf32> to vector<8x128xf32>
    %40 = arith.addf %37, %39 : vector<8x128xf32>
    %cst_31 = arith.constant 0.000000e+00 : f32
    %41 = vector.broadcast %cst_31 : f32 to vector<8x128xf32>
    %42 = arith.maximumf %40, %41 : vector<8x128xf32>
    %c0_32 = arith.constant 0 : index
    %c0_33 = arith.constant 0 : index
    %43 = vector.load %arg14[%c0_32, %c0_33] : memref<1x128xf32, #tpu.memory_space<vmem>>, vector<1x128xf32>
    %44 = vector.broadcast %43 : vector<1x128xf32> to vector<8x128xf32>
    %45 = arith.mulf %42, %44 : vector<8x128xf32>
    %cst_34 = arith.constant dense<0.000000e+00> : vector<8xf32>
    %46 = vector.multi_reduction <add>, %45, %cst_34 [1] : vector<8x128xf32> to vector<8xf32>
    %47 = vector.shape_cast %46 : vector<8xf32> to vector<8x1xf32>
    %c0_35 = arith.constant 0 : index
    %c0_36 = arith.constant 0 : index
    %48 = vector.load %arg15[%c0_35, %c0_36] : memref<1x1xf32, #tpu.memory_space<vmem>>, vector<1x1xf32>
    %49 = vector.broadcast %48 : vector<1x1xf32> to vector<8x1xf32>
    %50 = arith.addf %47, %49 : vector<8x1xf32>
    %51 = arith.cmpf oge, %20, %35 : vector<8x1xf32>
    %52 = arith.cmpf oge, %20, %50 : vector<8x1xf32>
    %53 = arith.andi %51, %52 : vector<8x1xi1>
    %cst_37 = arith.constant dense<true> : vector<8x1xi1>
    %54 = arith.xori %53, %cst_37 : vector<8x1xi1>
    %55 = arith.cmpf oge, %35, %50 : vector<8x1xf32>
    %56 = arith.andi %54, %55 : vector<8x1xi1>
    %c0_38 = arith.constant 0 : index
    %c0_39 = arith.constant 0 : index
    %57 = vector.load %arg16[%c0_38, %c0_39] : memref<128x1536xbf16, #tpu.memory_space<vmem>>, vector<128x1536xbf16>
    %cst_40 = arith.constant dense<0.000000e+00> : vector<8x1536xf32>
    %58 = tpu.matmul %1, %57, %cst_40 {dimension_numbers = #tpu.dot_dimension_numbers<[1], [0], [0], [1], [0, 0, 1, 1], [], []>} : vector<8x128xbf16>, vector<128x1536xbf16>, vector<8x1536xf32> -> vector<8x1536xf32>
    %c0_41 = arith.constant 0 : index
    %c0_42 = arith.constant 0 : index
    %59 = vector.load %arg17[%c0_41, %c0_42] : memref<1x1536xf32, #tpu.memory_space<vmem>>, vector<1x1536xf32>
    %60 = vector.broadcast %59 : vector<1x1536xf32> to vector<8x1536xf32>
    %61 = arith.addf %58, %60 : vector<8x1536xf32>
    %c0_43 = arith.constant 0 : index
    %c0_44 = arith.constant 0 : index
    %62 = vector.load %arg18[%c0_43, %c0_44] : memref<64x1536xbf16, #tpu.memory_space<vmem>>, vector<64x1536xbf16>
    %cst_45 = arith.constant dense<0.000000e+00> : vector<8x1536xf32>
    %63 = tpu.matmul %3, %62, %cst_45 {dimension_numbers = #tpu.dot_dimension_numbers<[1], [0], [0], [1], [0, 0, 1, 1], [], []>} : vector<8x64xbf16>, vector<64x1536xbf16>, vector<8x1536xf32> -> vector<8x1536xf32>
    %c0_46 = arith.constant 0 : index
    %c0_47 = arith.constant 0 : index
    %64 = vector.load %arg19[%c0_46, %c0_47] : memref<1x1536xf32, #tpu.memory_space<vmem>>, vector<1x1536xf32>
    %65 = vector.broadcast %64 : vector<1x1536xf32> to vector<8x1536xf32>
    %66 = arith.addf %63, %65 : vector<8x1536xf32>
    %c0_48 = arith.constant 0 : index
    %c0_49 = arith.constant 0 : index
    %67 = vector.load %arg20[%c0_48, %c0_49] : memref<96x1536xbf16, #tpu.memory_space<vmem>>, vector<96x1536xbf16>
    %cst_50 = arith.constant dense<0.000000e+00> : vector<8x1536xf32>
    %68 = tpu.matmul %5, %67, %cst_50 {dimension_numbers = #tpu.dot_dimension_numbers<[1], [0], [0], [1], [0, 0, 1, 1], [], []>} : vector<8x96xbf16>, vector<96x1536xbf16>, vector<8x1536xf32> -> vector<8x1536xf32>
    %c0_51 = arith.constant 0 : index
    %c0_52 = arith.constant 0 : index
    %69 = vector.load %arg21[%c0_51, %c0_52] : memref<1x1536xf32, #tpu.memory_space<vmem>>, vector<1x1536xf32>
    %70 = vector.broadcast %69 : vector<1x1536xf32> to vector<8x1536xf32>
    %71 = arith.addf %68, %70 : vector<8x1536xf32>
    %72 = vector.extract_strided_slice %61 {offsets = [0, 0], sizes = [8, 512], strides = [1, 1]} : vector<8x1536xf32> to vector<8x512xf32>
    %73 = vector.extract_strided_slice %61 {offsets = [0, 512], sizes = [8, 512], strides = [1, 1]} : vector<8x1536xf32> to vector<8x512xf32>
    %74 = vector.extract_strided_slice %61 {offsets = [0, 1024], sizes = [8, 512], strides = [1, 1]} : vector<8x1536xf32> to vector<8x512xf32>
    %75 = vector.extract_strided_slice %66 {offsets = [0, 0], sizes = [8, 512], strides = [1, 1]} : vector<8x1536xf32> to vector<8x512xf32>
    %76 = vector.extract_strided_slice %66 {offsets = [0, 512], sizes = [8, 512], strides = [1, 1]} : vector<8x1536xf32> to vector<8x512xf32>
    %77 = vector.extract_strided_slice %66 {offsets = [0, 1024], sizes = [8, 512], strides = [1, 1]} : vector<8x1536xf32> to vector<8x512xf32>
    %78 = vector.extract_strided_slice %71 {offsets = [0, 0], sizes = [8, 512], strides = [1, 1]} : vector<8x1536xf32> to vector<8x512xf32>
    %79 = vector.extract_strided_slice %71 {offsets = [0, 512], sizes = [8, 512], strides = [1, 1]} : vector<8x1536xf32> to vector<8x512xf32>
    %80 = vector.extract_strided_slice %71 {offsets = [0, 1024], sizes = [8, 512], strides = [1, 1]} : vector<8x1536xf32> to vector<8x512xf32>
    %81 = vector.shape_cast %53 : vector<8x1xi1> to vector<8x1xi1>
    %82 = vector.broadcast %81 : vector<8x1xi1> to vector<8x512xi1>
    %83 = vector.shape_cast %56 : vector<8x1xi1> to vector<8x1xi1>
    %84 = vector.broadcast %83 : vector<8x1xi1> to vector<8x512xi1>
    %85 = arith.select %84, %75, %78 : vector<8x512xi1>, vector<8x512xf32>
    %86 = arith.select %82, %72, %85 : vector<8x512xi1>, vector<8x512xf32>
    %87 = arith.select %84, %73, %77 : vector<8x512xi1>, vector<8x512xf32>
    %88 = arith.select %82, %76, %87 : vector<8x512xi1>, vector<8x512xf32>
    %89 = arith.select %84, %76, %80 : vector<8x512xi1>, vector<8x512xf32>
    %90 = arith.select %82, %73, %89 : vector<8x512xi1>, vector<8x512xf32>
    %91 = arith.select %84, %80, %74 : vector<8x512xi1>, vector<8x512xf32>
    %92 = arith.select %82, %79, %91 : vector<8x512xi1>, vector<8x512xf32>
    %93 = arith.select %84, %77, %79 : vector<8x512xi1>, vector<8x512xf32>
    %94 = arith.select %82, %74, %93 : vector<8x512xi1>, vector<8x512xf32>
    %95 = arith.truncf %86 : vector<8x512xf32> to vector<8x512xbf16>
    %c0_53 = arith.constant 0 : index
    %c0_54 = arith.constant 0 : index
    %96 = vector.load %arg22[%c0_53, %c0_54] : memref<512x128xbf16, #tpu.memory_space<vmem>>, vector<512x128xbf16>
    %cst_55 = arith.constant dense<0.000000e+00> : vector<8x128xf32>
    %97 = tpu.matmul %95, %96, %cst_55 {dimension_numbers = #tpu.dot_dimension_numbers<[1], [0], [0], [1], [0, 0, 1, 1], [], []>} : vector<8x512xbf16>, vector<512x128xbf16>, vector<8x128xf32> -> vector<8x128xf32>
    %c0_56 = arith.constant 0 : index
    %c0_57 = arith.constant 0 : index
    %98 = vector.load %arg23[%c0_56, %c0_57] : memref<1x128xf32, #tpu.memory_space<vmem>>, vector<1x128xf32>
    %99 = vector.broadcast %98 : vector<1x128xf32> to vector<8x128xf32>
    %100 = arith.addf %97, %99 : vector<8x128xf32>
    %cst_58 = arith.constant 0.000000e+00 : f32
    %101 = vector.broadcast %cst_58 : f32 to vector<8x128xf32>
    %102 = arith.maximumf %100, %101 : vector<8x128xf32>
    %103 = arith.truncf %102 : vector<8x128xf32> to vector<8x128xbf16>
    %c0_59 = arith.constant 0 : index
    %c0_60 = arith.constant 0 : index
    %104 = vector.load %arg24[%c0_59, %c0_60] : memref<128x128xbf16, #tpu.memory_space<vmem>>, vector<128x128xbf16>
    %cst_61 = arith.constant dense<0.000000e+00> : vector<8x128xf32>
    %105 = tpu.matmul %103, %104, %cst_61 {dimension_numbers = #tpu.dot_dimension_numbers<[1], [0], [0], [1], [0, 0, 1, 1], [], []>} : vector<8x128xbf16>, vector<128x128xbf16>, vector<8x128xf32> -> vector<8x128xf32>
    %c0_62 = arith.constant 0 : index
    %c0_63 = arith.constant 0 : index
    %106 = vector.load %arg25[%c0_62, %c0_63] : memref<1x128xf32, #tpu.memory_space<vmem>>, vector<1x128xf32>
    %107 = vector.broadcast %106 : vector<1x128xf32> to vector<8x128xf32>
    %108 = arith.addf %105, %107 : vector<8x128xf32>
    %cst_64 = arith.constant 0.000000e+00 : f32
    %109 = vector.broadcast %cst_64 : f32 to vector<8x128xf32>
    %110 = arith.maximumf %108, %109 : vector<8x128xf32>
    %111 = arith.truncf %88 : vector<8x512xf32> to vector<8x512xbf16>
    %c0_65 = arith.constant 0 : index
    %c0_66 = arith.constant 0 : index
    %112 = vector.load %arg26[%c0_65, %c0_66] : memref<512x128xbf16, #tpu.memory_space<vmem>>, vector<512x128xbf16>
    %cst_67 = arith.constant dense<0.000000e+00> : vector<8x128xf32>
    %113 = tpu.matmul %111, %112, %cst_67 {dimension_numbers = #tpu.dot_dimension_numbers<[1], [0], [0], [1], [0, 0, 1, 1], [], []>} : vector<8x512xbf16>, vector<512x128xbf16>, vector<8x128xf32> -> vector<8x128xf32>
    %114 = arith.truncf %90 : vector<8x512xf32> to vector<8x512xbf16>
    %c0_68 = arith.constant 0 : index
    %c0_69 = arith.constant 0 : index
    %115 = vector.load %arg27[%c0_68, %c0_69] : memref<512x128xbf16, #tpu.memory_space<vmem>>, vector<512x128xbf16>
    %cst_70 = arith.constant dense<0.000000e+00> : vector<8x128xf32>
    %116 = tpu.matmul %114, %115, %cst_70 {dimension_numbers = #tpu.dot_dimension_numbers<[1], [0], [0], [1], [0, 0, 1, 1], [], []>} : vector<8x512xbf16>, vector<512x128xbf16>, vector<8x128xf32> -> vector<8x128xf32>
    %117 = arith.addf %113, %116 : vector<8x128xf32>
    %c0_71 = arith.constant 0 : index
    %c0_72 = arith.constant 0 : index
    %118 = vector.load %arg28[%c0_71, %c0_72] : memref<1x128xf32, #tpu.memory_space<vmem>>, vector<1x128xf32>
    %119 = vector.broadcast %118 : vector<1x128xf32> to vector<8x128xf32>
    %120 = arith.addf %117, %119 : vector<8x128xf32>
    %cst_73 = arith.constant 0.000000e+00 : f32
    %121 = vector.broadcast %cst_73 : f32 to vector<8x128xf32>
    %122 = arith.maximumf %120, %121 : vector<8x128xf32>
    %123 = arith.truncf %122 : vector<8x128xf32> to vector<8x128xbf16>
    %c0_74 = arith.constant 0 : index
    %c0_75 = arith.constant 0 : index
    %124 = vector.load %arg29[%c0_74, %c0_75] : memref<128x128xbf16, #tpu.memory_space<vmem>>, vector<128x128xbf16>
    %cst_76 = arith.constant dense<0.000000e+00> : vector<8x128xf32>
    %125 = tpu.matmul %123, %124, %cst_76 {dimension_numbers = #tpu.dot_dimension_numbers<[1], [0], [0], [1], [0, 0, 1, 1], [], []>} : vector<8x128xbf16>, vector<128x128xbf16>, vector<8x128xf32> -> vector<8x128xf32>
    %c0_77 = arith.constant 0 : index
    %c0_78 = arith.constant 0 : index
    %126 = vector.load %arg30[%c0_77, %c0_78] : memref<1x128xf32, #tpu.memory_space<vmem>>, vector<1x128xf32>
    %127 = vector.broadcast %126 : vector<1x128xf32> to vector<8x128xf32>
    %128 = arith.addf %125, %127 : vector<8x128xf32>
    %cst_79 = arith.constant 0.000000e+00 : f32
    %129 = vector.broadcast %cst_79 : f32 to vector<8x128xf32>
    %130 = arith.maximumf %128, %129 : vector<8x128xf32>
    %131 = arith.truncf %92 : vector<8x512xf32> to vector<8x512xbf16>
    %c0_80 = arith.constant 0 : index
    %c0_81 = arith.constant 0 : index
    %132 = vector.load %arg31[%c0_80, %c0_81] : memref<512x128xbf16, #tpu.memory_space<vmem>>, vector<512x128xbf16>
    %cst_82 = arith.constant dense<0.000000e+00> : vector<8x128xf32>
    %133 = tpu.matmul %131, %132, %cst_82 {dimension_numbers = #tpu.dot_dimension_numbers<[1], [0], [0], [1], [0, 0, 1, 1], [], []>} : vector<8x512xbf16>, vector<512x128xbf16>, vector<8x128xf32> -> vector<8x128xf32>
    %134 = arith.truncf %94 : vector<8x512xf32> to vector<8x512xbf16>
    %c0_83 = arith.constant 0 : index
    %c0_84 = arith.constant 0 : index
    %135 = vector.load %arg32[%c0_83, %c0_84] : memref<512x128xbf16, #tpu.memory_space<vmem>>, vector<512x128xbf16>
    %cst_85 = arith.constant dense<0.000000e+00> : vector<8x128xf32>
    %136 = tpu.matmul %134, %135, %cst_85 {dimension_numbers = #tpu.dot_dimension_numbers<[1], [0], [0], [1], [0, 0, 1, 1], [], []>} : vector<8x512xbf16>, vector<512x128xbf16>, vector<8x128xf32> -> vector<8x128xf32>
    %137 = arith.addf %133, %136 : vector<8x128xf32>
    %c0_86 = arith.constant 0 : index
    %c0_87 = arith.constant 0 : index
    %138 = vector.load %arg33[%c0_86, %c0_87] : memref<1x128xf32, #tpu.memory_space<vmem>>, vector<1x128xf32>
    %139 = vector.broadcast %138 : vector<1x128xf32> to vector<8x128xf32>
    %140 = arith.addf %137, %139 : vector<8x128xf32>
    %cst_88 = arith.constant 0.000000e+00 : f32
    %141 = vector.broadcast %cst_88 : f32 to vector<8x128xf32>
    %142 = arith.maximumf %140, %141 : vector<8x128xf32>
    %143 = arith.truncf %142 : vector<8x128xf32> to vector<8x128xbf16>
    %c0_89 = arith.constant 0 : index
    %c0_90 = arith.constant 0 : index
    %144 = vector.load %arg34[%c0_89, %c0_90] : memref<128x128xbf16, #tpu.memory_space<vmem>>, vector<128x128xbf16>
    %cst_91 = arith.constant dense<0.000000e+00> : vector<8x128xf32>
    %145 = tpu.matmul %143, %144, %cst_91 {dimension_numbers = #tpu.dot_dimension_numbers<[1], [0], [0], [1], [0, 0, 1, 1], [], []>} : vector<8x128xbf16>, vector<128x128xbf16>, vector<8x128xf32> -> vector<8x128xf32>
    %c0_92 = arith.constant 0 : index
    %c0_93 = arith.constant 0 : index
    %146 = vector.load %arg35[%c0_92, %c0_93] : memref<1x128xf32, #tpu.memory_space<vmem>>, vector<1x128xf32>
    %147 = vector.broadcast %146 : vector<1x128xf32> to vector<8x128xf32>
    %148 = arith.addf %145, %147 : vector<8x128xf32>
    %cst_94 = arith.constant 0.000000e+00 : f32
    %149 = vector.broadcast %cst_94 : f32 to vector<8x128xf32>
    %150 = arith.maximumf %148, %149 : vector<8x128xf32>
    %151 = arith.truncf %110 : vector<8x128xf32> to vector<8x128xbf16>
    %c0_95 = arith.constant 0 : index
    %c0_96 = arith.constant 0 : index
    %152 = vector.load %arg36[%c0_95, %c0_96] : memref<128x128xbf16, #tpu.memory_space<vmem>>, vector<128x128xbf16>
    %cst_97 = arith.constant dense<0.000000e+00> : vector<8x128xf32>
    %153 = tpu.matmul %151, %152, %cst_97 {dimension_numbers = #tpu.dot_dimension_numbers<[1], [0], [0], [1], [0, 0, 1, 1], [], []>} : vector<8x128xbf16>, vector<128x128xbf16>, vector<8x128xf32> -> vector<8x128xf32>
    %154 = arith.truncf %130 : vector<8x128xf32> to vector<8x128xbf16>
    %c0_98 = arith.constant 0 : index
    %c0_99 = arith.constant 0 : index
    %155 = vector.load %arg37[%c0_98, %c0_99] : memref<128x128xbf16, #tpu.memory_space<vmem>>, vector<128x128xbf16>
    %cst_100 = arith.constant dense<0.000000e+00> : vector<8x128xf32>
    %156 = tpu.matmul %154, %155, %cst_100 {dimension_numbers = #tpu.dot_dimension_numbers<[1], [0], [0], [1], [0, 0, 1, 1], [], []>} : vector<8x128xbf16>, vector<128x128xbf16>, vector<8x128xf32> -> vector<8x128xf32>
    %157 = arith.addf %153, %156 : vector<8x128xf32>
    %158 = arith.truncf %150 : vector<8x128xf32> to vector<8x128xbf16>
    %c0_101 = arith.constant 0 : index
    %c0_102 = arith.constant 0 : index
    %159 = vector.load %arg38[%c0_101, %c0_102] : memref<128x128xbf16, #tpu.memory_space<vmem>>, vector<128x128xbf16>
    %cst_103 = arith.constant dense<0.000000e+00> : vector<8x128xf32>
    %160 = tpu.matmul %158, %159, %cst_103 {dimension_numbers = #tpu.dot_dimension_numbers<[1], [0], [0], [1], [0, 0, 1, 1], [], []>} : vector<8x128xbf16>, vector<128x128xbf16>, vector<8x128xf32> -> vector<8x128xf32>
    %161 = arith.addf %157, %160 : vector<8x128xf32>
    %c0_104 = arith.constant 0 : index
    %c0_105 = arith.constant 0 : index
    %162 = vector.load %arg39[%c0_104, %c0_105] : memref<1x128xf32, #tpu.memory_space<vmem>>, vector<1x128xf32>
    %163 = vector.broadcast %162 : vector<1x128xf32> to vector<8x128xf32>
    %164 = arith.addf %161, %163 : vector<8x128xf32>
    %cst_106 = arith.constant 0.000000e+00 : f32
    %165 = vector.broadcast %cst_106 : f32 to vector<8x128xf32>
    %166 = arith.maximumf %164, %165 : vector<8x128xf32>
    %167 = arith.truncf %166 : vector<8x128xf32> to vector<8x128xbf16>
    %c0_107 = arith.constant 0 : index
    %c0_108 = arith.constant 0 : index
    %168 = vector.load %arg40[%c0_107, %c0_108] : memref<128x128xbf16, #tpu.memory_space<vmem>>, vector<128x128xbf16>
    %cst_109 = arith.constant dense<0.000000e+00> : vector<8x128xf32>
    %169 = tpu.matmul %167, %168, %cst_109 {dimension_numbers = #tpu.dot_dimension_numbers<[1], [0], [0], [1], [0, 0, 1, 1], [], []>} : vector<8x128xbf16>, vector<128x128xbf16>, vector<8x128xf32> -> vector<8x128xf32>
    %c0_110 = arith.constant 0 : index
    %c0_111 = arith.constant 0 : index
    %170 = vector.load %arg41[%c0_110, %c0_111] : memref<1x128xf32, #tpu.memory_space<vmem>>, vector<1x128xf32>
    %171 = vector.broadcast %170 : vector<1x128xf32> to vector<8x128xf32>
    %172 = arith.addf %169, %171 : vector<8x128xf32>
    %cst_112 = arith.constant 0.000000e+00 : f32
    %173 = vector.broadcast %cst_112 : f32 to vector<8x128xf32>
    %174 = arith.maximumf %172, %173 : vector<8x128xf32>
    %c0_113 = arith.constant 0 : index
    %c0_114 = arith.constant 0 : index
    %175 = vector.load %arg44[%c0_113, %c0_114] : memref<8x128xf32, #tpu.memory_space<vmem>>, vector<8x128xf32>
    tpu.vector_store %arg44[%c0_113, %c0_114], %174 {strides = array<i32>} : memref<8x128xf32, #tpu.memory_space<vmem>>, vector<8x128xf32>,
    %176 = arith.truncf %174 : vector<8x128xf32> to vector<8x128xbf16>
    %c0_115 = arith.constant 0 : index
    %c0_116 = arith.constant 0 : index
    %177 = vector.load %arg42[%c0_115, %c0_116] : memref<128x128xbf16, #tpu.memory_space<vmem>>, vector<128x128xbf16>
    %cst_117 = arith.constant dense<0.000000e+00> : vector<8x128xf32>
    %178 = tpu.matmul %176, %177, %cst_117 {dimension_numbers = #tpu.dot_dimension_numbers<[1], [0], [0], [1], [0, 0, 1, 1], [], []>} : vector<8x128xbf16>, vector<128x128xbf16>, vector<8x128xf32> -> vector<8x128xf32>
    %c0_118 = arith.constant 0 : index
    %c0_119 = arith.constant 0 : index
    %179 = vector.load %arg43[%c0_118, %c0_119] : memref<1x128xf32, #tpu.memory_space<vmem>>, vector<1x128xf32>
    %180 = vector.broadcast %179 : vector<1x128xf32> to vector<8x128xf32>
    %181 = arith.addf %178, %180 : vector<8x128xf32>
    %cst_120 = arith.constant 1.000000e+00 : f32
    %cst_121 = arith.constant 2.000000e+00 : f32
    %182 = vector.broadcast %cst_120 : f32 to vector<8x1xf32>
    %183 = vector.broadcast %cst_121 : f32 to vector<8x1xf32>
    %184 = arith.select %56, %182, %183 : vector<8x1xi1>, vector<8x1xf32>
    %cst_122 = arith.constant 0.000000e+00 : f32
    %185 = vector.broadcast %cst_122 : f32 to vector<8x1xf32>
    %186 = arith.select %53, %185, %184 : vector<8x1xi1>, vector<8x1xf32>
    %187 = tpu.iota {dimensions = array<i32: 1>} : vector<8x128xi32>
    %c7_i32 = arith.constant 7 : i32
    %188 = vector.broadcast %c7_i32 : i32 to vector<8x128xi32>
    %189 = arith.cmpi eq, %187, %188 : vector<8x128xi32>
    %190 = vector.shape_cast %186 : vector<8x1xf32> to vector<8x1xf32>
    %191 = vector.broadcast %190 : vector<8x1xf32> to vector<8x128xf32>
    %192 = arith.select %189, %191, %181 : vector<8x128xi1>, vector<8x128xf32>
    %c0_123 = arith.constant 0 : index
    %c0_124 = arith.constant 0 : index
    %193 = vector.load %arg45[%c0_123, %c0_124] : memref<8x128xf32, #tpu.memory_space<vmem>>, vector<8x128xf32>
    tpu.vector_store %arg45[%c0_123, %c0_124], %192 {strides = array<i32>} : memref<8x128xf32, #tpu.memory_space<vmem>>, vector<8x128xf32>,
    return
  }
  func.func @transform_0(%arg0: i32) -> (i32, i32) {
    %c0_i32 = arith.constant 0 : i32
    %c0_i32_0 = arith.constant 0 : i32
    return %arg0, %c0_i32 : i32, i32
  }
  func.func @transform_1(%arg0: i32) -> (i32, i32) {
    %c0_i32 = arith.constant 0 : i32
    %c0_i32_0 = arith.constant 0 : i32
    return %arg0, %c0_i32 : i32, i32
  }
  func.func @transform_2(%arg0: i32) -> (i32, i32) {
    %c0_i32 = arith.constant 0 : i32
    %c0_i32_0 = arith.constant 0 : i32
    return %arg0, %c0_i32 : i32, i32
  }
  func.func @transform_3(%arg0: i32) -> (i32, i32) {
    %c0_i32 = arith.constant 0 : i32
    %c0_i32_0 = arith.constant 0 : i32
    %c0_i32_1 = arith.constant 0 : i32
    return %c0_i32, %c0_i32_0 : i32, i32
  }
  func.func @transform_4(%arg0: i32) -> (i32, i32) {
    %c0_i32 = arith.constant 0 : i32
    %c0_i32_0 = arith.constant 0 : i32
    %c0_i32_1 = arith.constant 0 : i32
    return %c0_i32, %c0_i32_0 : i32, i32
  }
  func.func @transform_5(%arg0: i32) -> (i32, i32) {
    %c0_i32 = arith.constant 0 : i32
    %c0_i32_0 = arith.constant 0 : i32
    %c0_i32_1 = arith.constant 0 : i32
    return %c0_i32, %c0_i32_0 : i32, i32
  }
  func.func @transform_6(%arg0: i32) -> (i32, i32) {
    %c0_i32 = arith.constant 0 : i32
    %c0_i32_0 = arith.constant 0 : i32
    %c0_i32_1 = arith.constant 0 : i32
    return %c0_i32, %c0_i32_0 : i32, i32
  }
  func.func @transform_7(%arg0: i32) -> (i32, i32) {
    %c0_i32 = arith.constant 0 : i32
    %c0_i32_0 = arith.constant 0 : i32
    %c0_i32_1 = arith.constant 0 : i32
    return %c0_i32, %c0_i32_0 : i32, i32
  }
  func.func @transform_8(%arg0: i32) -> (i32, i32) {
    %c0_i32 = arith.constant 0 : i32
    %c0_i32_0 = arith.constant 0 : i32
    %c0_i32_1 = arith.constant 0 : i32
    return %c0_i32, %c0_i32_0 : i32, i32
  }
  func.func @transform_9(%arg0: i32) -> (i32, i32) {
    %c0_i32 = arith.constant 0 : i32
    %c0_i32_0 = arith.constant 0 : i32
    %c0_i32_1 = arith.constant 0 : i32
    return %c0_i32, %c0_i32_0 : i32, i32
  }
  func.func @transform_10(%arg0: i32) -> (i32, i32) {
    %c0_i32 = arith.constant 0 : i32
    %c0_i32_0 = arith.constant 0 : i32
    %c0_i32_1 = arith.constant 0 : i32
    return %c0_i32, %c0_i32_0 : i32, i32
  }
  func.func @transform_11(%arg0: i32) -> (i32, i32) {
    %c0_i32 = arith.constant 0 : i32
    %c0_i32_0 = arith.constant 0 : i32
    %c0_i32_1 = arith.constant 0 : i32
    return %c0_i32, %c0_i32_0 : i32, i32
  }
  func.func @transform_12(%arg0: i32) -> (i32, i32) {
    %c0_i32 = arith.constant 0 : i32
    %c0_i32_0 = arith.constant 0 : i32
    %c0_i32_1 = arith.constant 0 : i32
    return %c0_i32, %c0_i32_0 : i32, i32
  }
  func.func @transform_13(%arg0: i32) -> (i32, i32) {
    %c0_i32 = arith.constant 0 : i32
    %c0_i32_0 = arith.constant 0 : i32
    %c0_i32_1 = arith.constant 0 : i32
    return %c0_i32, %c0_i32_0 : i32, i32
  }
  func.func @transform_14(%arg0: i32) -> (i32, i32) {
    %c0_i32 = arith.constant 0 : i32
    %c0_i32_0 = arith.constant 0 : i32
    %c0_i32_1 = arith.constant 0 : i32
    return %c0_i32, %c0_i32_0 : i32, i32
  }
  func.func @transform_15(%arg0: i32) -> (i32, i32) {
    %c0_i32 = arith.constant 0 : i32
    %c0_i32_0 = arith.constant 0 : i32
    %c0_i32_1 = arith.constant 0 : i32
    return %c0_i32, %c0_i32_0 : i32, i32
  }
  func.func @transform_16(%arg0: i32) -> (i32, i32) {
    %c0_i32 = arith.constant 0 : i32
    %c0_i32_0 = arith.constant 0 : i32
    %c0_i32_1 = arith.constant 0 : i32
    return %c0_i32, %c0_i32_0 : i32, i32
  }
  func.func @transform_17(%arg0: i32) -> (i32, i32) {
    %c0_i32 = arith.constant 0 : i32
    %c0_i32_0 = arith.constant 0 : i32
    %c0_i32_1 = arith.constant 0 : i32
    return %c0_i32, %c0_i32_0 : i32, i32
  }
  func.func @transform_18(%arg0: i32) -> (i32, i32) {
    %c0_i32 = arith.constant 0 : i32
    %c0_i32_0 = arith.constant 0 : i32
    %c0_i32_1 = arith.constant 0 : i32
    return %c0_i32, %c0_i32_0 : i32, i32
  }
  func.func @transform_19(%arg0: i32) -> (i32, i32) {
    %c0_i32 = arith.constant 0 : i32
    %c0_i32_0 = arith.constant 0 : i32
    %c0_i32_1 = arith.constant 0 : i32
    return %c0_i32, %c0_i32_0 : i32, i32
  }
  func.func @transform_20(%arg0: i32) -> (i32, i32) {
    %c0_i32 = arith.constant 0 : i32
    %c0_i32_0 = arith.constant 0 : i32
    %c0_i32_1 = arith.constant 0 : i32
    return %c0_i32, %c0_i32_0 : i32, i32
  }
  func.func @transform_21(%arg0: i32) -> (i32, i32) {
    %c0_i32 = arith.constant 0 : i32
    %c0_i32_0 = arith.constant 0 : i32
    %c0_i32_1 = arith.constant 0 : i32
    return %c0_i32, %c0_i32_0 : i32, i32
  }
  func.func @transform_22(%arg0: i32) -> (i32, i32) {
    %c0_i32 = arith.constant 0 : i32
    %c0_i32_0 = arith.constant 0 : i32
    %c0_i32_1 = arith.constant 0 : i32
    return %c0_i32, %c0_i32_0 : i32, i32
  }
  func.func @transform_23(%arg0: i32) -> (i32, i32) {
    %c0_i32 = arith.constant 0 : i32
    %c0_i32_0 = arith.constant 0 : i32
    %c0_i32_1 = arith.constant 0 : i32
    return %c0_i32, %c0_i32_0 : i32, i32
  }
  func.func @transform_24(%arg0: i32) -> (i32, i32) {
    %c0_i32 = arith.constant 0 : i32
    %c0_i32_0 = arith.constant 0 : i32
    %c0_i32_1 = arith.constant 0 : i32
    return %c0_i32, %c0_i32_0 : i32, i32
  }
  func.func @transform_25(%arg0: i32) -> (i32, i32) {
    %c0_i32 = arith.constant 0 : i32
    %c0_i32_0 = arith.constant 0 : i32
    %c0_i32_1 = arith.constant 0 : i32
    return %c0_i32, %c0_i32_0 : i32, i32
  }
  func.func @transform_26(%arg0: i32) -> (i32, i32) {
    %c0_i32 = arith.constant 0 : i32
    %c0_i32_0 = arith.constant 0 : i32
    %c0_i32_1 = arith.constant 0 : i32
    return %c0_i32, %c0_i32_0 : i32, i32
  }
  func.func @transform_27(%arg0: i32) -> (i32, i32) {
    %c0_i32 = arith.constant 0 : i32
    %c0_i32_0 = arith.constant 0 : i32
    %c0_i32_1 = arith.constant 0 : i32
    return %c0_i32, %c0_i32_0 : i32, i32
  }
  func.func @transform_28(%arg0: i32) -> (i32, i32) {
    %c0_i32 = arith.constant 0 : i32
    %c0_i32_0 = arith.constant 0 : i32
    %c0_i32_1 = arith.constant 0 : i32
    return %c0_i32, %c0_i32_0 : i32, i32
  }
  func.func @transform_29(%arg0: i32) -> (i32, i32) {
    %c0_i32 = arith.constant 0 : i32
    %c0_i32_0 = arith.constant 0 : i32
    %c0_i32_1 = arith.constant 0 : i32
    return %c0_i32, %c0_i32_0 : i32, i32
  }
  func.func @transform_30(%arg0: i32) -> (i32, i32) {
    %c0_i32 = arith.constant 0 : i32
    %c0_i32_0 = arith.constant 0 : i32
    %c0_i32_1 = arith.constant 0 : i32
    return %c0_i32, %c0_i32_0 : i32, i32
  }
  func.func @transform_31(%arg0: i32) -> (i32, i32) {
    %c0_i32 = arith.constant 0 : i32
    %c0_i32_0 = arith.constant 0 : i32
    %c0_i32_1 = arith.constant 0 : i32
    return %c0_i32, %c0_i32_0 : i32, i32
  }
  func.func @transform_32(%arg0: i32) -> (i32, i32) {
    %c0_i32 = arith.constant 0 : i32
    %c0_i32_0 = arith.constant 0 : i32
    %c0_i32_1 = arith.constant 0 : i32
    return %c0_i32, %c0_i32_0 : i32, i32
  }
  func.func @transform_33(%arg0: i32) -> (i32, i32) {
    %c0_i32 = arith.constant 0 : i32
    %c0_i32_0 = arith.constant 0 : i32
    %c0_i32_1 = arith.constant 0 : i32
    return %c0_i32, %c0_i32_0 : i32, i32
  }
  func.func @transform_34(%arg0: i32) -> (i32, i32) {
    %c0_i32 = arith.constant 0 : i32
    %c0_i32_0 = arith.constant 0 : i32
    %c0_i32_1 = arith.constant 0 : i32
    return %c0_i32, %c0_i32_0 : i32, i32
  }
  func.func @transform_35(%arg0: i32) -> (i32, i32) {
    %c0_i32 = arith.constant 0 : i32
    %c0_i32_0 = arith.constant 0 : i32
    %c0_i32_1 = arith.constant 0 : i32
    return %c0_i32, %c0_i32_0 : i32, i32
  }
  func.func @transform_36(%arg0: i32) -> (i32, i32) {
    %c0_i32 = arith.constant 0 : i32
    %c0_i32_0 = arith.constant 0 : i32
    %c0_i32_1 = arith.constant 0 : i32
    return %c0_i32, %c0_i32_0 : i32, i32
  }
  func.func @transform_37(%arg0: i32) -> (i32, i32) {
    %c0_i32 = arith.constant 0 : i32
    %c0_i32_0 = arith.constant 0 : i32
    %c0_i32_1 = arith.constant 0 : i32
    return %c0_i32, %c0_i32_0 : i32, i32
  }
  func.func @transform_38(%arg0: i32) -> (i32, i32) {
    %c0_i32 = arith.constant 0 : i32
    %c0_i32_0 = arith.constant 0 : i32
    %c0_i32_1 = arith.constant 0 : i32
    return %c0_i32, %c0_i32_0 : i32, i32
  }
  func.func @transform_39(%arg0: i32) -> (i32, i32) {
    %c0_i32 = arith.constant 0 : i32
    %c0_i32_0 = arith.constant 0 : i32
    %c0_i32_1 = arith.constant 0 : i32
    return %c0_i32, %c0_i32_0 : i32, i32
  }
  func.func @transform_40(%arg0: i32) -> (i32, i32) {
    %c0_i32 = arith.constant 0 : i32
    %c0_i32_0 = arith.constant 0 : i32
    %c0_i32_1 = arith.constant 0 : i32
    return %c0_i32, %c0_i32_0 : i32, i32
  }
  func.func @transform_41(%arg0: i32) -> (i32, i32) {
    %c0_i32 = arith.constant 0 : i32
    %c0_i32_0 = arith.constant 0 : i32
    %c0_i32_1 = arith.constant 0 : i32
    return %c0_i32, %c0_i32_0 : i32, i32
  }
  func.func @transform_42(%arg0: i32) -> (i32, i32) {
    %c0_i32 = arith.constant 0 : i32
    %c0_i32_0 = arith.constant 0 : i32
    %c0_i32_1 = arith.constant 0 : i32
    return %c0_i32, %c0_i32_0 : i32, i32
  }
  func.func @transform_43(%arg0: i32) -> (i32, i32) {
    %c0_i32 = arith.constant 0 : i32
    %c0_i32_0 = arith.constant 0 : i32
    return %arg0, %c0_i32 : i32, i32
  }
  func.func @transform_44(%arg0: i32) -> (i32, i32) {
    %c0_i32 = arith.constant 0 : i32
    %c0_i32_0 = arith.constant 0 : i32
    return %arg0, %c0_i32 : i32, i32
  }
}

</mosaic_0001>

<bundles_post_ra>
// kernel: topn_lf_dnn_forward.1
= control target key start
LH: loop header
LB: loop body
LE: loop exit
PB: predicated region body
PF: predicated region fallthrough
CT: control target
= control target key end

     0   :  { %s8256_s6 = smov 1   ;;  %s8257_s10 = smov 2   ;;  %s9397_s0 = inlined_call_operand.smem [shape: u32[45], index: -1, kind: input, shape index: {}] }
   0x1   :  { %s8347_s5 = sld [smem:[%s9397_s0]]   ;;  %s8258_s14 = smov 3  }
   0x2   :  { %s8352_s9 = sld [smem:[%s9397_s0 + %s8256_s6]]   ;;  %s8259_s18 = smov 4  }
   0x3   :  { %s8357_s13 = sld [smem:[%s9397_s0 + %s8257_s10]]   ;;  %s8260_s22 = smov 5  }
   0x4   :  { %s8362_s17 = sld [smem:[%s9397_s0 + %s8258_s14]]   ;;  %s8261_s26 = smov 6  }
   0x5   :  { %s8367_s21 = sld [smem:[%s9397_s0 + %s8259_s18]]   ;;  %s8262_s30 = smov 7  }
   0x6   :  { %s8372_s25 = sld [smem:[%s9397_s0 + %s8260_s22]]   ;;  %s8263_s4 = smov 8  }
   0x7   :  { %9421 = sst [smem:[#allocation67_spill]] %s8347_s5  ;;  %s8264_s10 = smov 9  }
   0x8   :  { %9422 = sst [smem:[#allocation68_spill]] %s8352_s9  ;;  %s8265_s15 = smov 11  }
   0x9   :  { %9423 = sst [smem:[#allocation69_spill]] %s8357_s13  ;;  %s8266_s20 = smov 12  }
   0xa   :  { %9424 = sst [smem:[#allocation70_spill]] %s8362_s17  ;;  %s8268_s1 = smov 15  }
   0xb   :  { %9425 = sst [smem:[#allocation71_spill]] %s8367_s21  ;;  %s8269_s7 = smov 16  }
   0xc   :  { %9426 = sst [smem:[#allocation72_spill]] %s8372_s25  ;;  %s8272_s27 = smov 19  }
   0xd   :  { %s5863_s29 = sld [smem:[%s9397_s0 + %s8261_s26]]   ;;  %s8267_s26 = smov 13  }
   0xe   :  { %s8380_s3 = sld [smem:[%s9397_s0 + %s8262_s30]]   ;;  %s8299_s22 = smov 14  }
   0xf   :  { %s8385_s8 = sld [smem:[%s9397_s0 + %s8263_s4]]   ;;  %s8273_s4 = smov 20  }
  0x10   :  { %s8390_s14 = sld [smem:[%s9397_s0 + %s8264_s10]]  }
  0x11   :  { %s8395_s19 = sld [smem:[%s9397_s0 + %s8265_s15]]   ;;  %s8270_s15 = smov 17  }
  0x12   :  { %s8400_s24 = sld [smem:[%s9397_s0 + %s8266_s20]]  }
  0x13   :  { %s8405_s30 = sld [smem:[%s9397_s0 + %s8267_s26]]   ;;  %v95_v0 = vstv %s5863_s29  ;;  %s8271_s29 = smov 18  }
  0x14   :  { %s8410_s6 = sld [smem:[%s9397_s0 + %s8268_s1]]   ;;  %96 = vst [vmem:[#allocation2] sm:$0x1] %v95_v0 }
  0x15   :  { %9427 = sst [smem:[#allocation73_spill]] %s8385_s8 }
  0x16   :  { %s8415_s12 = sld [smem:[%s9397_s0 + %s8269_s7]]  }
  0x17   :  { %9428 = sst [smem:[#allocation74_spill]] %s8395_s19 }
  0x18   :  { %s8420_s20 = sld [smem:[%s9397_s0 + %s8270_s15]]   ;;  %s8274_s15 = smov 21  }
  0x19   :  { %9429 = sst [smem:[#allocation75_spill]] %s8405_s30 }
  0x1a   :  { %s8425_s26 = sld [smem:[%s9397_s0 + %s8271_s29]]   ;;  %s8275_s29 = smov 22  }
  0x1b   :  { %s8430_s2 = sld [smem:[%s9397_s0 + %s8272_s27]]   ;;  %s8276_s27 = smov 23  }
  0x1c   :  { %9430 = sst [smem:[#allocation76_spill]] %s8415_s12 }
  0x1d   :  { %s8435_s11 = sld [smem:[%s9397_s0 + %s8273_s4]]   ;;  %s8277_s4 = smov 24  }
  0x1e   :  { %s8440_s21 = sld [smem:[%s9397_s0 + %s8274_s15]]   ;;  %s8278_s15 = smov 25  }
  0x1f   :  { %s8445_s13 = sld [smem:[%s9397_s0 + %s8275_s29]]   ;;  %s8279_s29 = smov 26  }
  0x20   :  { %9431 = sst [smem:[#allocation77_spill]] %s8425_s26 }
  0x21   :  { %s8450_s5 = sld [smem:[%s9397_s0 + %s8276_s27]]   ;;  %s8280_s27 = smov 27  }
  0x22   :  { %s8455_s9 = sld [smem:[%s9397_s0 + %s8277_s4]]   ;;  %s8281_s4 = smov 28  }
  0x23   :  { %9432 = sst [smem:[#allocation78_spill]] %s8435_s11 }
  0x24   :  { %s8460_s17 = sld [smem:[%s9397_s0 + %s8278_s15]]   ;;  %s8282_s15 = smov 29  }
  0x25   :  { %9433 = sst [smem:[#allocation79_spill]] %s8445_s13 }
  0x26   :  { %s8465_s13 = sld [smem:[%s9397_s0 + %s8279_s29]]   ;;  %s8283_s29 = smov 30  }
  0x27   :  { %9434 = sst [smem:[#allocation80_spill]] %s8450_s5 }
  0x28   :  { %9435 = sst [smem:[#allocation81_spill]] %s8455_s9 }
  0x29   :  { %s8470_s5 = sld [smem:[%s9397_s0 + %s8280_s27]]   ;;  %s8284_s27 = smov 31  }
  0x2a   :  { %9436 = sst [smem:[#allocation82_spill]] %s8460_s17 }
  0x2b   :  { %s8475_s9 = sld [smem:[%s9397_s0 + %s8281_s4]]   ;;  %s8285_s4 = smov 32  }
  0x2c   :  { %s8480_s17 = sld [smem:[%s9397_s0 + %s8282_s15]]   ;;  %s8286_s15 = smov 33  }
  0x2d   :  { %s8485_s11 = sld [smem:[%s9397_s0 + %s8283_s29]]   ;;  %s8287_s29 = smov 34  }
  0x2e   :  { %s8495_s26 = sld [smem:[%s9397_s0 + %s8285_s4]]   ;;  %s8289_s4 = smov 36  }
  0x2f   :  { %9437 = sst [smem:[#allocation83_spill]] %s8470_s5 }
  0x30   :  { %s8490_s5 = sld [smem:[%s9397_s0 + %s8284_s27]]   ;;  %s8288_s27 = smov 35  }
  0x31   :  { %s8505_s12 = sld [smem:[%s9397_s0 + %s8287_s29]]   ;;  %s8291_s29 = smov 38  }
  0x32   :  { %9438 = sst [smem:[#allocation84_spill]] %s8480_s17 }
  0x33   :  { %s8500_s17 = sld [smem:[%s9397_s0 + %s8286_s15]]   ;;  %s8290_s15 = smov 37  }
  0x34   :  { %9440 = sst [smem:[#allocation86_spill]] %s8495_s26 }
  0x35   :  { %s8515_s26 = sld [smem:[%s9397_s0 + %s8289_s4]]   ;;  %s8293_s4 = smov 40  }
  0x36   :  { %9439 = sst [smem:[#allocation85_spill]] %s8490_s5 }
  0x37   :  { %9441 = sst [smem:[#allocation87_spill]] %s8505_s12 }
  0x38   :  { %s8510_s5 = sld [smem:[%s9397_s0 + %s8288_s27]]   ;;  %s8292_s27 = smov 39  }
  0x39   :  { %s8520_s30 = sld [smem:[%s9397_s0 + %s8290_s15]]   ;;  %s8294_s15 = smov 41  }
  0x3a   :  { %s8525_s12 = sld [smem:[%s9397_s0 + %s8291_s29]]   ;;  %s8295_s29 = smov 42  }
  0x3b   :  { %s8535_s19 = sld [smem:[%s9397_s0 + %s8293_s4]]   ;;  %s8297_s4 = smov 44  }
  0x3c   :  { %s8545_s8 = sld [smem:[%s9397_s0 + %s8295_s29]]  }
  0x3d   :  { %s8555_s25 = sld [smem:[%s9397_s0 + %s8297_s4]]  }
  0x3e   :  { %9442 = sst [smem:[#allocation88_spill]] %s8510_s5 }
  0x3f   :  { %9443 = sst [smem:[#allocation89_spill]] %s8520_s30 }
  0x40   :  { %s8530_s5 = sld [smem:[%s9397_s0 + %s8292_s27]]   ;;  %s8296_s27 = smov 43  }
  0x41   :  { %s8540_s30 = sld [smem:[%s9397_s0 + %s8294_s15]]   ;;  %s8298_s15 = smov 10  }
  0x42   :  { %9446 = sst [smem:[#allocation92_spill]] %s8545_s8 }
  0x43   :  { %s5871_s8 = sld [smem:[%s9397_s0 + %s8299_s22]]  }
  0x46   :  { %9444 = sst [smem:[#allocation90_spill]] %s8530_s5 }
  0x47   :  { %9445 = sst [smem:[#allocation91_spill]] %s8540_s30 }
  0x48   :  { %s8550_s5 = sld [smem:[%s9397_s0 + %s8296_s27]]  }
  0x49   :  { %s5867_s30 = sld [smem:[%s9397_s0 + %s8298_s15]]   ;;  %v99_v2 = vstv %s5871_s8 }
  0x4a   :  { %100 = vst [vmem:[#allocation4] sm:$0x1] %v99_v2 }
  0x4f   :  { %v97_v1 = vstv %s5867_s30 }
  0x50   :  { %98 = vst [vmem:[#allocation3] sm:$0x1] %v97_v1 }
  0x51   :  { %101 = vsyncpa [#allocation6], 0 }
  0x52   :  { %102 = vsyncpa [#allocation8], 0 }
  0x53   :  { %103 = vsyncpa [#allocation11], 0 }
  0x54   :  { %104 = vsyncpa [#allocation14], 0 }
  0x55   :  { %105 = vsyncpa [#allocation17], 0 }
  0x56   :  { %106 = vsyncpa [#allocation20], 0 }
  0x57   :  { %107 = vsyncpa [#allocation23], 0 }
  0x58   :  { %108 = vsyncpa [#allocation26], 0 }
  0x59   :  { %109 = vsyncpa [#allocation29], 0 }
  0x5a   :  { %110 = vsyncpa [#allocation32], 0 }
  0x5b   :  { %111 = vsyncpa [#allocation35], 0 }
  0x5c   :  { %112 = vsyncpa [#allocation38], 0 }
  0x5d   :  { %113 = vsyncpa [#allocation41], 0 }
  0x5e   :  { %114 = vsyncpa [#allocation44], 0 }
  0x5f   :  { %115 = vsyncpa [#allocation47], 0 }
  0x60   :  { %116 = vsyncpa [#allocation50], 0  ;;  %s8300_s0 = smov [#allocation7]   ;;  %s7564_s30 = scalar_lea.hbm %s8380_s3, 512 }
  0x61   :  { %s144_s8 = sshll.u32 %s8300_s0, 4  ;;  %p7565_p0 = scmp.ne.s32.totalorder %s8380_s3, %s7564_s30  ;;  %s145_s8 = int_to_ptr.vmem [resolvable:$true] %s144_s8 }
  0x62   :  { %p7568_p1 = scmp.lt.u32.totalorder %s7564_s30, %s8380_s3 }
  0x64   :  { %p7570_p2 = pnand %p7568_p1, %p7565_p0 }
  0x66   :  { %7573 = shalt.err (!%p7570_p2)
}
  0x67   :  { %s7574_s27 = scalar_lea.vmem %s145_s8, 512  ;;  %p7579_p4 = scmp.lt.s32.totalorder %s145_s8, %s145_s8 }
  0x68   :  { %p7575_p3 = scmp.ne.s32.totalorder %s145_s8, %s7574_s27  ;;  %p7580_p5 = scmp.lt.s32.totalorder %s7574_s27, %s7574_s27 }
  0x6a   :  { %p7581_p6 = por %p7580_p5, %p7579_p4 }
  0x6c   :  { %p7582_p7 = pnand %p7581_p6, %p7575_p3 }
  0x6e   :  { %7585 = shalt.err (!%p7582_p7)
}
  0x6f   :  { %s8301_s28 = smov 64   ;;  %s8302_s1 = smov 4  }
  0x70   :  { %150 = dma.hbm_to_vmem [thread:$0]  %s8380_s3, 512, %s145_s8, [#allocation8], %s8301_s28, %s8301_s28, %s8302_s1  }
  0x71   :  { %s8303_s4 = smov [#allocation10]   ;;  %s8304_s10 = smov [#allocation13]  }
  0x72   :  { %s167_s7 = sshll.u32 %s8303_s4, 4  ;;  %s191_s15 = sshll.u32 %s8304_s10, 4  ;;  %s168_s7 = int_to_ptr.vmem [resolvable:$true] %s167_s7  ;;  %s192_s15 = int_to_ptr.vmem [resolvable:$true] %s191_s15 }
  0x73   :  { %s7586_s16 = scalar_lea.hbm %s8390_s14, 16 }
  0x74   :  { %p7587_p8 = scmp.ne.s32.totalorder %s8390_s14, %s7586_s16  ;;  %p7590_p9 = scmp.lt.u32.totalorder %s7586_s16, %s8390_s14 }
  0x76   :  { %p7592_p10 = pnand %p7590_p9, %p7587_p8 }
  0x78   :  { %7595 = shalt.err (!%p7592_p10)
}
  0x79   :  { %s7596_s18 = scalar_lea.vmem %s168_s7, 16  ;;  %s7600_s22 = scalar_lea.vmem %s168_s7, 32 }
  0x7a   :  { %p7597_p11 = scmp.ne.s32.totalorder %s168_s7, %s7596_s18  ;;  %p7601_p12 = scmp.lt.s32.totalorder %s168_s7, %s168_s7 }
  0x7b   :  { %p7602_p13 = scmp.lt.s32.totalorder %s7600_s22, %s7596_s18 }
  0x7d   :  { %p7603_p0 = por %p7602_p13, %p7601_p12 }
  0x7f   :  { %p7604_p1 = pnand %p7603_p0, %p7597_p11 }
  0x81   :  { %7607 = shalt.err (!%p7604_p1)
}
  0x82   :  { %170 = dma.hbm_to_vmem [thread:$0]  %s8390_s14, 16, %s168_s7, [#allocation11]  }
  0x83   :  { %s7608_s3 = scalar_lea.hbm %s8400_s24, 16 }
  0x84   :  { %p7609_p2 = scmp.ne.s32.totalorder %s8400_s24, %s7608_s3  ;;  %p7612_p3 = scmp.lt.u32.totalorder %s7608_s3, %s8400_s24 }
  0x86   :  { %p7614_p4 = pnand %p7612_p3, %p7609_p2 }
  0x88   :  { %7617 = shalt.err (!%p7614_p4)
}
  0x89   :  { %s7618_s29 = scalar_lea.vmem %s192_s15, 16  ;;  %s7622_s23 = scalar_lea.vmem %s192_s15, 32 }
  0x8a   :  { %p7619_p5 = scmp.ne.s32.totalorder %s192_s15, %s7618_s29  ;;  %p7623_p6 = scmp.lt.s32.totalorder %s192_s15, %s192_s15 }
  0x8b   :  { %p7624_p7 = scmp.lt.s32.totalorder %s7622_s23, %s7618_s29 }
  0x8d   :  { %p7625_p8 = por %p7624_p7, %p7623_p6 }
  0x8f   :  { %p7626_p9 = pnand %p7625_p8, %p7619_p5 }
  0x91   :  { %7629 = shalt.err (!%p7626_p9)
}
  0x92   :  { %194 = dma.hbm_to_vmem [thread:$0]  %s8400_s24, 16, %s192_s15, [#allocation14]  }
  0x93   :  { %s8305_s14 = smov [#allocation16]   ;;  %s7630_s8 = scalar_lea.hbm %s8410_s6, 12288 }
  0x94   :  { %s212_s0 = sshll.u32 %s8305_s14, 4  ;;  %p7631_p10 = scmp.ne.s32.totalorder %s8410_s6, %s7630_s8  ;;  %s213_s0 = int_to_ptr.vmem [resolvable:$true] %s212_s0 }
  0x95   :  { %p7634_p11 = scmp.lt.u32.totalorder %s7630_s8, %s8410_s6 }
  0x97   :  { %p7636_p12 = pnand %p7634_p11, %p7631_p10 }
  0x99   :  { %7639 = shalt.err (!%p7636_p12)
}
  0x9a   :  { %s7640_s30 = scalar_lea.vmem %s213_s0, 12288  ;;  %p7645_p0 = scmp.lt.s32.totalorder %s213_s0, %s213_s0 }
  0x9b   :  { %p7641_p13 = scmp.ne.s32.totalorder %s213_s0, %s7640_s30  ;;  %p7646_p1 = scmp.lt.s32.totalorder %s7640_s30, %s7640_s30 }
  0x9d   :  { %p7647_p2 = por %p7646_p1, %p7645_p0 }
  0x9f   :  { %p7648_p3 = pnand %p7647_p2, %p7641_p13 }
  0xa1   :  { %7651 = shalt.err (!%p7648_p3)
}
  0xa2   :  { %s8306_s27 = smov 768   ;;  %s8307_s24 = smov 48  }
  0xa3   :  { %218 = dma.hbm_to_vmem [thread:$0]  %s8410_s6, 12288, %s213_s0, [#allocation17], %s8306_s27, %s8306_s27, %s8307_s24  }
  0xa4   :  { %s8308_s4 = smov [#allocation19]   ;;  %s8309_s10 = smov [#allocation22]  }
  0xa5   :  { %s234_s7 = sshll.u32 %s8308_s4, 4  ;;  %s256_s15 = sshll.u32 %s8309_s10, 4  ;;  %s235_s7 = int_to_ptr.vmem [resolvable:$true] %s234_s7  ;;  %s8585_s15 = int_to_ptr.vmem [resolvable:$true] %s256_s15 }
  0xa6   :  { %s7652_s16 = scalar_lea.hbm %s8420_s20, 6144 }
  0xa7   :  { %p7653_p4 = scmp.ne.s32.totalorder %s8420_s20, %s7652_s16  ;;  %p7656_p5 = scmp.lt.u32.totalorder %s7652_s16, %s8420_s20 }
  0xa9   :  { %p7658_p6 = pnand %p7656_p5, %p7653_p4 }
  0xab   :  { %7661 = shalt.err (!%p7658_p6)
}
  0xac   :  { %s7662_s18 = scalar_lea.vmem %s235_s7, 6144  ;;  %p7667_p8 = scmp.lt.s32.totalorder %s235_s7, %s235_s7 }
  0xad   :  { %p7663_p7 = scmp.ne.s32.totalorder %s235_s7, %s7662_s18  ;;  %p7668_p9 = scmp.lt.s32.totalorder %s7662_s18, %s7662_s18 }
  0xaf   :  { %p7669_p10 = por %p7668_p9, %p7667_p8 }
  0xb1   :  { %p7670_p11 = pnand %p7669_p10, %p7663_p7 }
  0xb3   :  { %7673 = shalt.err (!%p7670_p11)
}
  0xb4   :  { %240 = dma.hbm_to_vmem [thread:$0]  %s8420_s20, 6144, %s235_s7, [#allocation20], %s8306_s27, %s8306_s27, %s8307_s24  }
  0xb5   :  { %s7674_s6 = scalar_lea.hbm %s8430_s2, 9216 }
  0xb6   :  { %p7675_p12 = scmp.ne.s32.totalorder %s8430_s2, %s7674_s6  ;;  %p7678_p13 = scmp.lt.u32.totalorder %s7674_s6, %s8430_s2 }
  0xb8   :  { %p7680_p0 = pnand %p7678_p13, %p7675_p12 }
  0xba   :  { %7683 = shalt.err (!%p7680_p0)
}
  0xbb   :  { %s7684_s22 = scalar_lea.vmem %s8585_s15, 9216  ;;  %p7689_p2 = scmp.lt.s32.totalorder %s8585_s15, %s8585_s15 }
  0xbc   :  { %p7685_p1 = scmp.ne.s32.totalorder %s8585_s15, %s7684_s22  ;;  %p7690_p3 = scmp.lt.s32.totalorder %s7684_s22, %s7684_s22 }
  0xbe   :  { %p7691_p4 = por %p7690_p3, %p7689_p2 }
  0xc0   :  { %p7692_p5 = pnand %p7691_p4, %p7685_p1 }
  0xc2   :  { %7695 = shalt.err (!%p7692_p5)
}
  0xc3   :  { %262 = dma.hbm_to_vmem [thread:$0]  %s8430_s2, 9216, %s8585_s15, [#allocation23], %s8306_s27, %s8306_s27, %s8307_s24  }
  0xc4   :  { %s8310_s20 = smov [#allocation25]   ;;  %s8311_s29 = smov [#allocation28]  }
  0xc5   :  { %s278_s3 = sshll.u32 %s8310_s20, 4  ;;  %s308_s23 = sshll.u32 %s8311_s29, 4  ;;  %s279_s3 = int_to_ptr.vmem [resolvable:$true] %s278_s3  ;;  %s8606_s23 = int_to_ptr.vmem [resolvable:$true] %s308_s23 }
  0xc6   :  { %s7696_s14 = scalar_lea.hbm %s8440_s21, 4096 }
  0xc7   :  { %p7697_p6 = scmp.ne.s32.totalorder %s8440_s21, %s7696_s14  ;;  %p7700_p7 = scmp.lt.u32.totalorder %s7696_s14, %s8440_s21 }
  0xc9   :  { %p7702_p8 = pnand %p7700_p7, %p7697_p6 }
  0xcb   :  { %7705 = shalt.err (!%p7702_p8)
}
  0xcc   :  { %s7706_s0 = scalar_lea.vmem %s279_s3, 4096  ;;  %p7711_p10 = scmp.lt.s32.totalorder %s279_s3, %s279_s3 }
  0xcd   :  { %p7707_p9 = scmp.ne.s32.totalorder %s279_s3, %s7706_s0  ;;  %p7712_p11 = scmp.lt.s32.totalorder %s7706_s0, %s7706_s0 }
  0xcf   :  { %p7713_p12 = por %p7712_p11, %p7711_p10 }
  0xd1   :  { %p7714_p13 = pnand %p7713_p12, %p7707_p9 }
  0xd3   :  { %7717 = shalt.err (!%p7714_p13)
}
  0xd4   :  { %284 = dma.hbm_to_vmem [thread:$0]  %s8440_s21, 4096, %s279_s3, [#allocation26], %s8301_s28, %s8301_s28, %s8302_s1  }
  0xd5   :  { %s7718_s2 = scalar_lea.hbm %s8465_s13, 4096 }
  0xd6   :  { %p7719_p0 = scmp.ne.s32.totalorder %s8465_s13, %s7718_s2  ;;  %p7722_p1 = scmp.lt.u32.totalorder %s7718_s2, %s8465_s13 }
  0xd8   :  { %p7724_p2 = pnand %p7722_p1, %p7719_p0 }
  0xda   :  { %7727 = shalt.err (!%p7724_p2)
}
  0xdb   :  { %s7728_s8 = scalar_lea.vmem %s8606_s23, 4096  ;;  %p7733_p4 = scmp.lt.s32.totalorder %s8606_s23, %s8606_s23 }
  0xdc   :  { %p7729_p3 = scmp.ne.s32.totalorder %s8606_s23, %s7728_s8  ;;  %p7734_p5 = scmp.lt.s32.totalorder %s7728_s8, %s7728_s8 }
  0xde   :  { %p7735_p6 = por %p7734_p5, %p7733_p4 }
  0xe0   :  { %p7736_p7 = pnand %p7735_p6, %p7729_p3 }
  0xe2   :  { %7739 = shalt.err (!%p7736_p7)
}
  0xe3   :  { %314 = dma.hbm_to_vmem [thread:$0]  %s8465_s13, 4096, %s8606_s23, [#allocation29], %s8301_s28, %s8301_s28, %s8302_s1  }
  0xe4   :  { %s8312_s21 = smov [#allocation31]   ;;  %s8313_s27 = smov [#allocation34]  }
  0xe5   :  { %s330_s30 = sshll.u32 %s8312_s21, 4  ;;  %s352_s24 = sshll.u32 %s8313_s27, 4  ;;  %s331_s30 = int_to_ptr.vmem [resolvable:$true] %s330_s30  ;;  %s8627_s24 = int_to_ptr.vmem [resolvable:$true] %s352_s24 }
  0xe6   :  { %s7740_s4 = scalar_lea.hbm %s8475_s9, 1024 }
  0xe7   :  { %p7741_p8 = scmp.ne.s32.totalorder %s8475_s9, %s7740_s4  ;;  %p7744_p9 = scmp.lt.u32.totalorder %s7740_s4, %s8475_s9 }
  0xe9   :  { %p7746_p10 = pnand %p7744_p9, %p7741_p8 }
  0xeb   :  { %7749 = shalt.err (!%p7746_p10)
}
  0xec   :  { %s7750_s7 = scalar_lea.vmem %s331_s30, 1024  ;;  %p7755_p12 = scmp.lt.s32.totalorder %s331_s30, %s331_s30 }
  0xed   :  { %p7751_p11 = scmp.ne.s32.totalorder %s331_s30, %s7750_s7  ;;  %p7756_p13 = scmp.lt.s32.totalorder %s7750_s7, %s7750_s7 }
  0xef   :  { %p7757_p0 = por %p7756_p13, %p7755_p12 }
  0xf1   :  { %p7758_p1 = pnand %p7757_p0, %p7751_p11 }
  0xf3   :  { %7761 = shalt.err (!%p7758_p1)
}
  0xf4   :  { %336 = dma.hbm_to_vmem [thread:$0]  %s8475_s9, 1024, %s331_s30, [#allocation32], %s8301_s28, %s8301_s28, %s8302_s1  }
  0xf5   :  { %s7762_s13 = scalar_lea.hbm %s8485_s11, 4096 }
  0xf6   :  { %p7763_p2 = scmp.ne.s32.totalorder %s8485_s11, %s7762_s13  ;;  %p7766_p3 = scmp.lt.u32.totalorder %s7762_s13, %s8485_s11 }
  0xf8   :  { %p7768_p4 = pnand %p7766_p3, %p7763_p2 }
  0xfa   :  { %7771 = shalt.err (!%p7768_p4)
}
  0xfb   :  { %s7772_s10 = scalar_lea.vmem %s8627_s24, 4096  ;;  %p7777_p6 = scmp.lt.s32.totalorder %s8627_s24, %s8627_s24 }
  0xfc   :  { %p7773_p5 = scmp.ne.s32.totalorder %s8627_s24, %s7772_s10  ;;  %p7778_p7 = scmp.lt.s32.totalorder %s7772_s10, %s7772_s10 }
  0xfe   :  { %p7779_p8 = por %p7778_p7, %p7777_p6 }
 0x100   :  { %p7780_p9 = pnand %p7779_p8, %p7773_p5 }
 0x102   :  { %7783 = shalt.err (!%p7780_p9)
}
 0x103   :  { %358 = dma.hbm_to_vmem [thread:$0]  %s8485_s11, 4096, %s8627_s24, [#allocation35], %s8301_s28, %s8301_s28, %s8302_s1  }
 0x104   :  { %s8314_s9 = smov [#allocation37]   ;;  %s8315_s16 = smov [#allocation40]  }
 0x105   :  { %s378_s15 = sshll.u32 %s8314_s9, 4  ;;  %s404_s18 = sshll.u32 %s8315_s16, 4  ;;  %s379_s15 = int_to_ptr.vmem [resolvable:$true] %s378_s15  ;;  %s8648_s18 = int_to_ptr.vmem [resolvable:$true] %s404_s18 }
 0x106   :  { %s7784_s6 = scalar_lea.hbm %s8500_s17, 1024 }
 0x107   :  { %p7785_p10 = scmp.ne.s32.totalorder %s8500_s17, %s7784_s6  ;;  %p7788_p11 = scmp.lt.u32.totalorder %s7784_s6, %s8500_s17 }
 0x109   :  { %p7790_p12 = pnand %p7788_p11, %p7785_p10 }
 0x10b   :  { %7793 = shalt.err (!%p7790_p12)
}
 0x10c   :  { %s7794_s22 = scalar_lea.vmem %s379_s15, 1024  ;;  %p7799_p0 = scmp.lt.s32.totalorder %s379_s15, %s379_s15 }
 0x10d   :  { %p7795_p13 = scmp.ne.s32.totalorder %s379_s15, %s7794_s22  ;;  %p7800_p1 = scmp.lt.s32.totalorder %s7794_s22, %s7794_s22 }
 0x10f   :  { %p7801_p2 = por %p7800_p1, %p7799_p0 }
 0x111   :  { %p7802_p3 = pnand %p7801_p2, %p7795_p13 }
 0x113   :  { %7805 = shalt.err (!%p7802_p3)
}
 0x114   :  { %384 = dma.hbm_to_vmem [thread:$0]  %s8500_s17, 1024, %s379_s15, [#allocation38], %s8301_s28, %s8301_s28, %s8302_s1  }
 0x115   :  { %s7806_s11 = scalar_lea.hbm %s8515_s26, 1024 }
 0x116   :  { %p7807_p4 = scmp.ne.s32.totalorder %s8515_s26, %s7806_s11  ;;  %p7810_p5 = scmp.lt.u32.totalorder %s7806_s11, %s8515_s26 }
 0x118   :  { %p7812_p6 = pnand %p7810_p5, %p7807_p4 }
 0x11a   :  { %7815 = shalt.err (!%p7812_p6)
}
 0x11b   :  { %s7816_s20 = scalar_lea.vmem %s8648_s18, 1024  ;;  %p7821_p8 = scmp.lt.s32.totalorder %s8648_s18, %s8648_s18 }
 0x11c   :  { %p7817_p7 = scmp.ne.s32.totalorder %s8648_s18, %s7816_s20  ;;  %p7822_p9 = scmp.lt.s32.totalorder %s7816_s20, %s7816_s20 }
 0x11e   :  { %p7823_p10 = por %p7822_p9, %p7821_p8 }
 0x120   :  { %p7824_p11 = pnand %p7823_p10, %p7817_p7 }
 0x122   :  { %7827 = shalt.err (!%p7824_p11)
}
 0x123   :  { %410 = dma.hbm_to_vmem [thread:$0]  %s8515_s26, 1024, %s8648_s18, [#allocation41], %s8301_s28, %s8301_s28, %s8302_s1  }
 0x124   :  { %s8316_s17 = smov [#allocation43]   ;;  %s8317_s29 = smov [#allocation46]  }
 0x125   :  { %s429_s3 = sshll.u32 %s8316_s17, 4  ;;  %s451_s23 = sshll.u32 %s8317_s29, 4  ;;  %s430_s3 = int_to_ptr.vmem [resolvable:$true] %s429_s3  ;;  %s452_s23 = int_to_ptr.vmem [resolvable:$true] %s451_s23 }
 0x126   :  { %s7828_s14 = scalar_lea.hbm %s8525_s12, 16 }
 0x127   :  { %p7829_p12 = scmp.ne.s32.totalorder %s8525_s12, %s7828_s14  ;;  %p7832_p13 = scmp.lt.u32.totalorder %s7828_s14, %s8525_s12 }
 0x129   :  { %p7834_p0 = pnand %p7832_p13, %p7829_p12 }
 0x12b   :  { %7837 = shalt.err (!%p7834_p0)
}
 0x12c   :  { %s7838_s0 = scalar_lea.vmem %s430_s3, 16  ;;  %s7842_s2 = scalar_lea.vmem %s430_s3, 32 }
 0x12d   :  { %p7839_p1 = scmp.ne.s32.totalorder %s430_s3, %s7838_s0  ;;  %p7843_p2 = scmp.lt.s32.totalorder %s430_s3, %s430_s3 }
 0x12e   :  { %p7844_p3 = scmp.lt.s32.totalorder %s7842_s2, %s7838_s0 }
 0x130   :  { %p7845_p4 = por %p7844_p3, %p7843_p2 }
 0x132   :  { %p7846_p5 = pnand %p7845_p4, %p7839_p1 }
 0x134   :  { %7849 = shalt.err (!%p7846_p5)
}
 0x135   :  { %432 = dma.hbm_to_vmem [thread:$0]  %s8525_s12, 16, %s430_s3, [#allocation44]  }
 0x136   :  { %s7850_s26 = scalar_lea.hbm %s8535_s19, 16 }
 0x137   :  { %p7851_p6 = scmp.ne.s32.totalorder %s8535_s19, %s7850_s26  ;;  %p7854_p7 = scmp.lt.u32.totalorder %s7850_s26, %s8535_s19 }
 0x139   :  { %p7856_p8 = pnand %p7854_p7, %p7851_p6 }
 0x13b   :  { %7859 = shalt.err (!%p7856_p8)
}
 0x13c   :  { %s7860_s8 = scalar_lea.vmem %s452_s23, 16  ;;  %s7864_s21 = scalar_lea.vmem %s452_s23, 32 }
 0x13d   :  { %p7861_p9 = scmp.ne.s32.totalorder %s452_s23, %s7860_s8  ;;  %p7865_p10 = scmp.lt.s32.totalorder %s452_s23, %s452_s23 }
 0x13e   :  { %p7866_p11 = scmp.lt.s32.totalorder %s7864_s21, %s7860_s8 }
 0x140   :  { %p7867_p12 = por %p7866_p11, %p7865_p10 }
 0x142   :  { %p7868_p13 = pnand %p7867_p12, %p7861_p9 }
 0x144   :  { %7871 = shalt.err (!%p7868_p13)
}
 0x145   :  { %s9447_s30 = sld [smem:[#allocation72_spill]]  ;;  %s8318_s27 = smov [#allocation5]  }
 0x146   :  { %454 = dma.hbm_to_vmem [thread:$0]  %s8535_s19, 16, %s452_s23, [#allocation47]  }
 0x147   :  { %s133_s12 = sshll.u32 %s8318_s27, 4  ;;  %s8319_s24 = smov [#allocation9]   ;;  %s134_s12 = int_to_ptr.vmem [resolvable:$true] %s133_s12 }
 0x148   :  { %s157_s4 = sshll.u32 %s8319_s24, 4  ;;  %s158_s4 = int_to_ptr.vmem [resolvable:$true] %s157_s4 }
 0x14b   :  { %s7872_s7 = scalar_lea.hbm %s9447_s30, 16 }
 0x14c   :  { %p7873_p0 = scmp.ne.s32.totalorder %s9447_s30, %s7872_s7  ;;  %p7876_p1 = scmp.lt.u32.totalorder %s7872_s7, %s9447_s30 }
 0x14e   :  { %p7878_p2 = pnand %p7876_p1, %p7873_p0 }
 0x150   :  { %7881 = shalt.err (!%p7878_p2)
}
 0x151   :  { %s7882_s13 = scalar_lea.vmem %s134_s12, 16  ;;  %s7886_s10 = scalar_lea.vmem %s134_s12, 32 }
 0x152   :  { %p7883_p3 = scmp.ne.s32.totalorder %s134_s12, %s7882_s13  ;;  %p7887_p4 = scmp.lt.s32.totalorder %s134_s12, %s134_s12 }
 0x153   :  { %p7888_p5 = scmp.lt.s32.totalorder %s7886_s10, %s7882_s13 }
 0x155   :  { %p7889_p6 = por %p7888_p5, %p7887_p4 }
 0x157   :  { %p7890_p7 = pnand %p7889_p6, %p7883_p3 }
 0x159   :  { %7893 = shalt.err (!%p7890_p7)
}
 0x15a   :  { %s9448_s19 = sld [smem:[#allocation73_spill]] }
 0x15b   :  { %136 = dma.hbm_to_vmem [thread:$0]  %s9447_s30, 16, %s134_s12, [#allocation6]  }
 0x160   :  { %s7894_s9 = scalar_lea.hbm %s9448_s19, 16 }
 0x161   :  { %p7895_p8 = scmp.ne.s32.totalorder %s9448_s19, %s7894_s9  ;;  %p7898_p9 = scmp.lt.u32.totalorder %s7894_s9, %s9448_s19 }
 0x163   :  { %p7900_p10 = pnand %p7898_p9, %p7895_p8 }
 0x165   :  { %7903 = shalt.err (!%p7900_p10)
}
 0x166   :  { %s7904_s15 = scalar_lea.vmem %s158_s4, 16  ;;  %s7908_s16 = scalar_lea.vmem %s158_s4, 32 }
 0x167   :  { %p7905_p11 = scmp.ne.s32.totalorder %s158_s4, %s7904_s15  ;;  %p7909_p12 = scmp.lt.s32.totalorder %s158_s4, %s158_s4 }
 0x168   :  { %p7910_p13 = scmp.lt.s32.totalorder %s7908_s16, %s7904_s15 }
 0x16a   :  { %p7911_p0 = por %p7910_p13, %p7909_p12 }
 0x16c   :  { %p7912_p1 = pnand %p7911_p0, %p7905_p11 }
 0x16e   :  { %7915 = shalt.err (!%p7912_p1)
}
 0x16f   :  { %s9449_s18 = sld [smem:[#allocation74_spill]]  ;;  %s8320_s6 = smov [#allocation12]  }
 0x170   :  { %160 = dma.hbm_to_vmem [thread:$0]  %s9448_s19, 16, %s158_s4, [#allocation8]  }
 0x171   :  { %s178_s22 = sshll.u32 %s8320_s6, 4  ;;  %s8321_s11 = smov [#allocation15]   ;;  %s179_s22 = int_to_ptr.vmem [resolvable:$true] %s178_s22 }
 0x172   :  { %s201_s20 = sshll.u32 %s8321_s11, 4  ;;  %s202_s20 = int_to_ptr.vmem [resolvable:$true] %s201_s20 }
 0x175   :  { %s7916_s17 = scalar_lea.hbm %s9449_s18, 768 }
 0x176   :  { %p7917_p2 = scmp.ne.s32.totalorder %s9449_s18, %s7916_s17  ;;  %p7920_p3 = scmp.lt.u32.totalorder %s7916_s17, %s9449_s18 }
 0x178   :  { %p7922_p4 = pnand %p7920_p3, %p7917_p2 }
 0x17a   :  { %7925 = shalt.err (!%p7922_p4)
}
 0x17b   :  { %s7926_s3 = scalar_lea.vmem %s179_s22, 768  ;;  %p7931_p6 = scmp.lt.s32.totalorder %s179_s22, %s179_s22 }
 0x17c   :  { %p7927_p5 = scmp.ne.s32.totalorder %s179_s22, %s7926_s3  ;;  %p7932_p7 = scmp.lt.s32.totalorder %s7926_s3, %s7926_s3 }
 0x17e   :  { %p7933_p8 = por %p7932_p7, %p7931_p6 }
 0x180   :  { %p7934_p9 = pnand %p7933_p8, %p7927_p5 }
 0x182   :  { %7937 = shalt.err (!%p7934_p9)
}
 0x183   :  { %s9450_s29 = sld [smem:[#allocation75_spill]] }
 0x184   :  { %184 = dma.hbm_to_vmem [thread:$0]  %s9449_s18, 768, %s179_s22, [#allocation11], %s8301_s28, %s8301_s28, %s8302_s1  }
 0x189   :  { %s7938_s23 = scalar_lea.hbm %s9450_s29, 16 }
 0x18a   :  { %p7939_p10 = scmp.ne.s32.totalorder %s9450_s29, %s7938_s23  ;;  %p7942_p11 = scmp.lt.u32.totalorder %s7938_s23, %s9450_s29 }
 0x18c   :  { %p7944_p12 = pnand %p7942_p11, %p7939_p10 }
 0x18e   :  { %7947 = shalt.err (!%p7944_p12)
}
 0x18f   :  { %s7948_s14 = scalar_lea.vmem %s202_s20, 16  ;;  %s7952_s0 = scalar_lea.vmem %s202_s20, 32 }
 0x190   :  { %p7949_p13 = scmp.ne.s32.totalorder %s202_s20, %s7948_s14  ;;  %p7953_p0 = scmp.lt.s32.totalorder %s202_s20, %s202_s20 }
 0x191   :  { %p7954_p1 = scmp.lt.s32.totalorder %s7952_s0, %s7948_s14 }
 0x193   :  { %p7955_p2 = por %p7954_p1, %p7953_p0 }
 0x195   :  { %p7956_p3 = pnand %p7955_p2, %p7949_p13 }
 0x197   :  { %7959 = shalt.err (!%p7956_p3)
}
 0x198   :  { %s9451_s2 = sld [smem:[#allocation76_spill]]  ;;  %s8322_s26 = smov [#allocation18]  }
 0x199   :  { %204 = dma.hbm_to_vmem [thread:$0]  %s9450_s29, 16, %s202_s20, [#allocation14]  }
 0x19a   :  { %s225_s8 = sshll.u32 %s8322_s26, 4  ;;  %s8323_s21 = smov [#allocation21]   ;;  %s226_s8 = int_to_ptr.vmem [resolvable:$true] %s225_s8 }
 0x19b   :  { %s247_s30 = sshll.u32 %s8323_s21, 4  ;;  %s248_s30 = int_to_ptr.vmem [resolvable:$true] %s247_s30 }
 0x19e   :  { %s7960_s27 = scalar_lea.hbm %s9451_s2, 192 }
 0x19f   :  { %p7961_p4 = scmp.ne.s32.totalorder %s9451_s2, %s7960_s27  ;;  %p7964_p5 = scmp.lt.u32.totalorder %s7960_s27, %s9451_s2 }
 0x1a1   :  { %p7966_p6 = pnand %p7964_p5, %p7961_p4 }
 0x1a3   :  { %7969 = shalt.err (!%p7966_p6)
}
 0x1a4   :  { %s7970_s12 = scalar_lea.vmem %s226_s8, 192  ;;  %p7975_p8 = scmp.lt.s32.totalorder %s226_s8, %s226_s8 }
 0x1a5   :  { %p7971_p7 = scmp.ne.s32.totalorder %s226_s8, %s7970_s12  ;;  %p7976_p9 = scmp.lt.s32.totalorder %s7970_s12, %s7970_s12 }
 0x1a7   :  { %p7977_p10 = por %p7976_p9, %p7975_p8 }
 0x1a9   :  { %p7978_p11 = pnand %p7977_p10, %p7971_p7 }
 0x1ab   :  { %7981 = shalt.err (!%p7978_p11)
}
 0x1ac   :  { %s9452_s24 = sld [smem:[#allocation77_spill]] }
 0x1ad   :  { %228 = dma.hbm_to_vmem [thread:$0]  %s9451_s2, 192, %s226_s8, [#allocation17]  }
 0x1b2   :  { %s7982_s4 = scalar_lea.hbm %s9452_s24, 192 }
 0x1b3   :  { %p7983_p12 = scmp.ne.s32.totalorder %s9452_s24, %s7982_s4  ;;  %p7986_p13 = scmp.lt.u32.totalorder %s7982_s4, %s9452_s24 }
 0x1b5   :  { %p7988_p0 = pnand %p7986_p13, %p7983_p12 }
 0x1b7   :  { %7991 = shalt.err (!%p7988_p0)
}
 0x1b8   :  { %s7992_s7 = scalar_lea.vmem %s248_s30, 192  ;;  %p7997_p2 = scmp.lt.s32.totalorder %s248_s30, %s248_s30 }
 0x1b9   :  { %p7993_p1 = scmp.ne.s32.totalorder %s248_s30, %s7992_s7  ;;  %p7998_p3 = scmp.lt.s32.totalorder %s7992_s7, %s7992_s7 }
 0x1bb   :  { %p7999_p4 = por %p7998_p3, %p7997_p2 }
 0x1bd   :  { %p8000_p5 = pnand %p7999_p4, %p7993_p1 }
 0x1bf   :  { %8003 = shalt.err (!%p8000_p5)
}
 0x1c0   :  { %s9453_s13 = sld [smem:[#allocation78_spill]]  ;;  %s8324_s10 = smov [#allocation24]  }
 0x1c1   :  { %250 = dma.hbm_to_vmem [thread:$0]  %s9452_s24, 192, %s248_s30, [#allocation20]  }
 0x1c2   :  { %s269_s19 = sshll.u32 %s8324_s10, 4  ;;  %s8325_s9 = smov [#allocation27]   ;;  %s270_s19 = int_to_ptr.vmem [resolvable:$true] %s269_s19 }
 0x1c3   :  { %s296_s15 = sshll.u32 %s8325_s9, 4  ;;  %s8704_s15 = int_to_ptr.vmem [resolvable:$true] %s296_s15 }
 0x1c6   :  { %s8004_s16 = scalar_lea.hbm %s9453_s13, 192 }
 0x1c7   :  { %p8005_p6 = scmp.ne.s32.totalorder %s9453_s13, %s8004_s16  ;;  %p8008_p7 = scmp.lt.u32.totalorder %s8004_s16, %s9453_s13 }
 0x1c9   :  { %p8010_p8 = pnand %p8008_p7, %p8005_p6 }
 0x1cb   :  { %8013 = shalt.err (!%p8010_p8)
}
 0x1cc   :  { %s8014_s18 = scalar_lea.vmem %s270_s19, 192  ;;  %p8019_p10 = scmp.lt.s32.totalorder %s270_s19, %s270_s19 }
 0x1cd   :  { %p8015_p9 = scmp.ne.s32.totalorder %s270_s19, %s8014_s18  ;;  %p8020_p11 = scmp.lt.s32.totalorder %s8014_s18, %s8014_s18 }
 0x1cf   :  { %p8021_p12 = por %p8020_p11, %p8019_p10 }
 0x1d1   :  { %p8022_p13 = pnand %p8021_p12, %p8015_p9 }
 0x1d3   :  { %8025 = shalt.err (!%p8022_p13)
}
 0x1d4   :  { %s9454_s6 = sld [smem:[#allocation82_spill]] }
 0x1d5   :  { %272 = dma.hbm_to_vmem [thread:$0]  %s9453_s13, 192, %s270_s19, [#allocation23]  }
 0x1da   :  { %s8026_s22 = scalar_lea.hbm %s9454_s6, 4096 }
 0x1db   :  { %p8027_p0 = scmp.ne.s32.totalorder %s9454_s6, %s8026_s22  ;;  %p8030_p1 = scmp.lt.u32.totalorder %s8026_s22, %s9454_s6 }
 0x1dd   :  { %p8032_p2 = pnand %p8030_p1, %p8027_p0 }
 0x1df   :  { %8035 = shalt.err (!%p8032_p2)
}
 0x1e0   :  { %s8036_s11 = scalar_lea.vmem %s8704_s15, 4096  ;;  %p8041_p4 = scmp.lt.s32.totalorder %s8704_s15, %s8704_s15 }
 0x1e1   :  { %p8037_p3 = scmp.ne.s32.totalorder %s8704_s15, %s8036_s11  ;;  %p8042_p5 = scmp.lt.s32.totalorder %s8036_s11, %s8036_s11 }
 0x1e3   :  { %p8043_p6 = por %p8042_p5, %p8041_p4 }
 0x1e5   :  { %p8044_p7 = pnand %p8043_p6, %p8037_p3 }
 0x1e7   :  { %8047 = shalt.err (!%p8044_p7)
}
 0x1e8   :  { %s9455_s20 = sld [smem:[#allocation83_spill]]  ;;  %s8326_s17 = smov [#allocation30]  }
 0x1e9   :  { %302 = dma.hbm_to_vmem [thread:$0]  %s9454_s6, 4096, %s8704_s15, [#allocation26], %s8301_s28, %s8301_s28, %s8302_s1  }
 0x1ea   :  { %s321_s3 = sshll.u32 %s8326_s17, 4  ;;  %s8327_s29 = smov [#allocation33]   ;;  %s322_s3 = int_to_ptr.vmem [resolvable:$true] %s321_s3 }
 0x1eb   :  { %s343_s23 = sshll.u32 %s8327_s29, 4  ;;  %s344_s23 = int_to_ptr.vmem [resolvable:$true] %s343_s23 }
 0x1ee   :  { %s8048_s14 = scalar_lea.hbm %s9455_s20, 16 }
 0x1ef   :  { %p8049_p8 = scmp.ne.s32.totalorder %s9455_s20, %s8048_s14  ;;  %p8052_p9 = scmp.lt.u32.totalorder %s8048_s14, %s9455_s20 }
 0x1f1   :  { %p8054_p10 = pnand %p8052_p9, %p8049_p8 }
 0x1f3   :  { %8057 = shalt.err (!%p8054_p10)
}
 0x1f4   :  { %s8058_s0 = scalar_lea.vmem %s322_s3, 16  ;;  %s8062_s2 = scalar_lea.vmem %s322_s3, 32 }
 0x1f5   :  { %p8059_p11 = scmp.ne.s32.totalorder %s322_s3, %s8058_s0  ;;  %p8063_p12 = scmp.lt.s32.totalorder %s322_s3, %s322_s3 }
 0x1f6   :  { %p8064_p13 = scmp.lt.s32.totalorder %s8062_s2, %s8058_s0 }
 0x1f8   :  { %p8065_p0 = por %p8064_p13, %p8063_p12 }
 0x1fa   :  { %p8066_p1 = pnand %p8065_p0, %p8059_p11 }
 0x1fc   :  { %8069 = shalt.err (!%p8066_p1)
}
 0x1fd   :  { %s9456_s26 = sld [smem:[#allocation84_spill]] }
 0x1fe   :  { %324 = dma.hbm_to_vmem [thread:$0]  %s9455_s20, 16, %s322_s3, [#allocation29]  }
 0x203   :  { %s8070_s8 = scalar_lea.hbm %s9456_s26, 16 }
 0x204   :  { %p8071_p2 = scmp.ne.s32.totalorder %s9456_s26, %s8070_s8  ;;  %p8074_p3 = scmp.lt.u32.totalorder %s8070_s8, %s9456_s26 }
 0x206   :  { %p8076_p4 = pnand %p8074_p3, %p8071_p2 }
 0x208   :  { %8079 = shalt.err (!%p8076_p4)
}
 0x209   :  { %s8080_s21 = scalar_lea.vmem %s344_s23, 16  ;;  %s8084_s30 = scalar_lea.vmem %s344_s23, 32 }
 0x20a   :  { %p8081_p5 = scmp.ne.s32.totalorder %s344_s23, %s8080_s21  ;;  %p8085_p6 = scmp.lt.s32.totalorder %s344_s23, %s344_s23 }
 0x20b   :  { %p8086_p7 = scmp.lt.s32.totalorder %s8084_s30, %s8080_s21 }
 0x20d   :  { %p8087_p8 = por %p8086_p7, %p8085_p6 }
 0x20f   :  { %p8088_p9 = pnand %p8087_p8, %p8081_p5 }
 0x211   :  { %8091 = shalt.err (!%p8088_p9)
}
 0x212   :  { %s9457_s27 = sld [smem:[#allocation85_spill]]  ;;  %s8328_s12 = smov [#allocation36]  }
 0x213   :  { %346 = dma.hbm_to_vmem [thread:$0]  %s9456_s26, 16, %s344_s23, [#allocation32]  }
 0x214   :  { %s364_s24 = sshll.u32 %s8328_s12, 4  ;;  %s8329_s4 = smov [#allocation39]   ;;  %s365_s24 = int_to_ptr.vmem [resolvable:$true] %s364_s24 }
 0x215   :  { %s392_s7 = sshll.u32 %s8329_s4, 4  ;;  %s8730_s7 = int_to_ptr.vmem [resolvable:$true] %s392_s7 }
 0x218   :  { %s8092_s13 = scalar_lea.hbm %s9457_s27, 4096 }
 0x219   :  { %p8093_p10 = scmp.ne.s32.totalorder %s9457_s27, %s8092_s13  ;;  %p8096_p11 = scmp.lt.u32.totalorder %s8092_s13, %s9457_s27 }
 0x21b   :  { %p8098_p12 = pnand %p8096_p11, %p8093_p10 }
 0x21d   :  { %8101 = shalt.err (!%p8098_p12)
}
 0x21e   :  { %s8102_s10 = scalar_lea.vmem %s365_s24, 4096  ;;  %p8107_p0 = scmp.lt.s32.totalorder %s365_s24, %s365_s24 }
 0x21f   :  { %p8103_p13 = scmp.ne.s32.totalorder %s365_s24, %s8102_s10  ;;  %p8108_p1 = scmp.lt.s32.totalorder %s8102_s10, %s8102_s10 }
 0x221   :  { %p8109_p2 = por %p8108_p1, %p8107_p0 }
 0x223   :  { %p8110_p3 = pnand %p8109_p2, %p8103_p13 }
 0x225   :  { %8113 = shalt.err (!%p8110_p3)
}
 0x226   :  { %s9458_s19 = sld [smem:[#allocation88_spill]] }
 0x227   :  { %370 = dma.hbm_to_vmem [thread:$0]  %s9457_s27, 4096, %s365_s24, [#allocation35], %s8301_s28, %s8301_s28, %s8302_s1  }
 0x22c   :  { %s8114_s9 = scalar_lea.hbm %s9458_s19, 1024 }
 0x22d   :  { %p8115_p4 = scmp.ne.s32.totalorder %s9458_s19, %s8114_s9  ;;  %p8118_p5 = scmp.lt.u32.totalorder %s8114_s9, %s9458_s19 }
 0x22f   :  { %p8120_p6 = pnand %p8118_p5, %p8115_p4 }
 0x231   :  { %8123 = shalt.err (!%p8120_p6)
}
 0x232   :  { %s8124_s15 = scalar_lea.vmem %s8730_s7, 1024  ;;  %p8129_p8 = scmp.lt.s32.totalorder %s8730_s7, %s8730_s7 }
 0x233   :  { %p8125_p7 = scmp.ne.s32.totalorder %s8730_s7, %s8124_s15  ;;  %p8130_p9 = scmp.lt.s32.totalorder %s8124_s15, %s8124_s15 }
 0x235   :  { %p8131_p10 = por %p8130_p9, %p8129_p8 }
 0x237   :  { %p8132_p11 = pnand %p8131_p10, %p8125_p7 }
 0x239   :  { %8135 = shalt.err (!%p8132_p11)
}
 0x23a   :  { %s9459_s16 = sld [smem:[#allocation89_spill]]  ;;  %s8330_s18 = smov [#allocation42]  }
 0x23b   :  { %398 = dma.hbm_to_vmem [thread:$0]  %s9458_s19, 1024, %s8730_s7, [#allocation38], %s8301_s28, %s8301_s28, %s8302_s1  }
 0x23c   :  { %s416_s6 = sshll.u32 %s8330_s18, 4  ;;  %s8331_s22 = smov [#allocation45]   ;;  %s417_s6 = int_to_ptr.vmem [resolvable:$true] %s416_s6 }
 0x23d   :  { %s438_s11 = sshll.u32 %s8331_s22, 4  ;;  %s8751_s11 = int_to_ptr.vmem [resolvable:$true] %s438_s11 }
 0x240   :  { %s8136_s20 = scalar_lea.hbm %s9459_s16, 1024 }
 0x241   :  { %p8137_p12 = scmp.ne.s32.totalorder %s9459_s16, %s8136_s20  ;;  %p8140_p13 = scmp.lt.u32.totalorder %s8136_s20, %s9459_s16 }
 0x243   :  { %p8142_p0 = pnand %p8140_p13, %p8137_p12 }
 0x245   :  { %8145 = shalt.err (!%p8142_p0)
}
 0x246   :  { %s8146_s17 = scalar_lea.vmem %s417_s6, 1024  ;;  %p8151_p2 = scmp.lt.s32.totalorder %s417_s6, %s417_s6 }
 0x247   :  { %p8147_p1 = scmp.ne.s32.totalorder %s417_s6, %s8146_s17  ;;  %p8152_p3 = scmp.lt.s32.totalorder %s8146_s17, %s8146_s17 }
 0x249   :  { %p8153_p4 = por %p8152_p3, %p8151_p2 }
 0x24b   :  { %p8154_p5 = pnand %p8153_p4, %p8147_p1 }
 0x24d   :  { %8157 = shalt.err (!%p8154_p5)
}
 0x24e   :  { %s9460_s3 = sld [smem:[#allocation90_spill]] }
 0x24f   :  { %422 = dma.hbm_to_vmem [thread:$0]  %s9459_s16, 1024, %s417_s6, [#allocation41], %s8301_s28, %s8301_s28, %s8302_s1  }
 0x254   :  { %s8158_s29 = scalar_lea.hbm %s9460_s3, 1024 }
 0x255   :  { %p8159_p6 = scmp.ne.s32.totalorder %s9460_s3, %s8158_s29  ;;  %p8162_p7 = scmp.lt.u32.totalorder %s8158_s29, %s9460_s3 }
 0x257   :  { %p8164_p8 = pnand %p8162_p7, %p8159_p6 }
 0x259   :  { %8167 = shalt.err (!%p8164_p8)
}
 0x25a   :  { %s8168_s23 = scalar_lea.vmem %s8751_s11, 1024  ;;  %p8173_p10 = scmp.lt.s32.totalorder %s8751_s11, %s8751_s11 }
 0x25b   :  { %p8169_p9 = scmp.ne.s32.totalorder %s8751_s11, %s8168_s23  ;;  %p8174_p11 = scmp.lt.s32.totalorder %s8168_s23, %s8168_s23 }
 0x25d   :  { %p8175_p12 = por %p8174_p11, %p8173_p10 }
 0x25f   :  { %p8176_p13 = pnand %p8175_p12, %p8169_p9 }
 0x261   :  { %8179 = shalt.err (!%p8176_p13)
}
 0x262   :  { %s9461_s14 = sld [smem:[#allocation91_spill]]  ;;  %s8332_s0 = smov [#allocation48]  }
 0x263   :  { %444 = dma.hbm_to_vmem [thread:$0]  %s9460_s3, 1024, %s8751_s11, [#allocation44], %s8301_s28, %s8301_s28, %s8302_s1  }
 0x264   :  { %s460_s2 = sshll.u32 %s8332_s0, 4  ;;  %s8333_s26 = smov [#allocation49]   ;;  %s461_s2 = int_to_ptr.vmem [resolvable:$true] %s460_s2 }
 0x265   :  { %s473_s8 = sshll.u32 %s8333_s26, 4  ;;  %s474_s8 = int_to_ptr.vmem [resolvable:$true] %s473_s8 }
 0x268   :  { %s8180_s21 = scalar_lea.hbm %s9461_s14, 1024 }
 0x269   :  { %p8181_p0 = scmp.ne.s32.totalorder %s9461_s14, %s8180_s21  ;;  %p8184_p1 = scmp.lt.u32.totalorder %s8180_s21, %s9461_s14 }
 0x26b   :  { %p8186_p2 = pnand %p8184_p1, %p8181_p0 }
 0x26d   :  { %8189 = shalt.err (!%p8186_p2)
}
 0x26e   :  { %s8190_s30 = scalar_lea.vmem %s461_s2, 1024  ;;  %p8195_p4 = scmp.lt.s32.totalorder %s461_s2, %s461_s2 }
 0x26f   :  { %p8191_p3 = scmp.ne.s32.totalorder %s461_s2, %s8190_s30  ;;  %p8196_p5 = scmp.lt.s32.totalorder %s8190_s30, %s8190_s30 }
 0x271   :  { %p8197_p6 = por %p8196_p5, %p8195_p4 }
 0x273   :  { %p8198_p7 = pnand %p8197_p6, %p8191_p3 }
 0x275   :  { %8201 = shalt.err (!%p8198_p7)
}
 0x276   :  { %s9462_s27 = sld [smem:[#allocation92_spill]] }
 0x277   :  { %466 = dma.hbm_to_vmem [thread:$0]  %s9461_s14, 1024, %s461_s2, [#allocation47], %s8301_s28, %s8301_s28, %s8302_s1  }
 0x27c   :  { %s8202_s12 = scalar_lea.hbm %s9462_s27, 16 }
 0x27d   :  { %p8203_p8 = scmp.ne.s32.totalorder %s9462_s27, %s8202_s12  ;;  %p8206_p9 = scmp.lt.u32.totalorder %s8202_s12, %s9462_s27 }
 0x27f   :  { %p8208_p10 = pnand %p8206_p9, %p8203_p8 }
 0x281   :  { %8211 = shalt.err (!%p8208_p10)
}
 0x282   :  { %s8212_s24 = scalar_lea.vmem %s474_s8, 16  ;;  %s8216_s4 = scalar_lea.vmem %s474_s8, 32 }
 0x283   :  { %p8213_p11 = scmp.ne.s32.totalorder %s474_s8, %s8212_s24  ;;  %p8217_p12 = scmp.lt.s32.totalorder %s474_s8, %s474_s8 }
 0x284   :  { %p8218_p13 = scmp.lt.s32.totalorder %s8216_s4, %s8212_s24 }
 0x286   :  { %p8219_p0 = por %p8218_p13, %p8217_p12 }
 0x288   :  { %p8220_p1 = pnand %p8219_p0, %p8213_p11 }
 0x28a   :  { %8223 = shalt.err (!%p8220_p1)
}
 0x28b   :  { %476 = dma.hbm_to_vmem [thread:$0]  %s9462_s27, 16, %s474_s8, [#allocation50]  }
 0x28c   :  { %8224 = dma.done.wait [#allocation6], 16  }
 0x28d   :  { %8225 = vsyncadd [#allocation6], 4294967280 }
 0x28e   :  { %8226 = dma.done.wait [#allocation8], 528  }
 0x28f   :  { %8227 = vsyncadd [#allocation8], 4294966768 }
 0x290   :  { %8228 = dma.done.wait [#allocation11], 784  }
 0x291   :  { %8229 = vsyncadd [#allocation11], 4294966512 }
 0x292   :  { %8230 = dma.done.wait [#allocation14], 32  }
 0x293   :  { %8231 = vsyncadd [#allocation14], 4294967264 }
 0x294   :  { %8232 = dma.done.wait [#allocation17], 12480  }
 0x295   :  { %8233 = vsyncadd [#allocation17], 4294954816 }
 0x296   :  { %8234 = dma.done.wait [#allocation20], 6336  }
 0x297   :  { %8235 = vsyncadd [#allocation20], 4294960960 }
 0x298   :  { %8236 = dma.done.wait [#allocation23], 9408  }
 0x299   :  { %8237 = vsyncadd [#allocation23], 4294957888 }
 0x29a   :  { %8238 = dma.done.wait [#allocation26], 8192  }
 0x29b   :  { %8239 = vsyncadd [#allocation26], 4294959104 }
 0x29c   :  { %8240 = dma.done.wait [#allocation29], 4112  }
 0x29d   :  { %8241 = vsyncadd [#allocation29], 4294963184 }
 0x29e   :  { %8242 = dma.done.wait [#allocation32], 1040  }
 0x29f   :  { %8243 = vsyncadd [#allocation32], 4294966256 }
 0x2a0   :  { %8244 = dma.done.wait [#allocation35], 8192  }
 0x2a1   :  { %8245 = vsyncadd [#allocation35], 4294959104 }
 0x2a2   :  { %8246 = dma.done.wait [#allocation38], 2048  }
 0x2a3   :  { %8247 = vsyncadd [#allocation38], 4294965248 }
 0x2a4   :  { %8248 = dma.done.wait [#allocation41], 2048  }
 0x2a5   :  { %8249 = vsyncadd [#allocation41], 4294965248 }
 0x2a6   :  { %8250 = dma.done.wait [#allocation44], 1040  }
 0x2a7   :  { %8251 = vsyncadd [#allocation44], 4294966256 }
 0x2a8   :  { %8252 = dma.done.wait [#allocation47], 1040  }
 0x2a9   :  { %8253 = vsyncadd [#allocation47], 4294966256 }
 0x2aa   :  { %8254 = dma.done.wait [#allocation50], 16  }
 0x2ab   :  { %8255 = vsyncadd [#allocation50], 4294967280  ;;  %s9463_s28 = sld [smem:[#allocation70_spill]]  ;;  %v9417_v3 = vmov 0.0   ;;  %vm8335_vm0 = vmmov 0   ;;  %v8336_v4 = vmov 0  }
 0x2ac   :  { %6705 = vmatprep.subr.bf16.mxu0 %v9417_v3  ;;  %6725 = vmatprep.subr.bf16.mxu1 %v9417_v3  ;;  %v6999_v6 = vld [vmem:[#allocation7] sm:$0xff]   ;;  %s9464_s1 = sld [smem:[#allocation68_spill]]  ;;  %v7001_v8 = vld [vmem:[#allocation7 + $0x8] sm:$0xff]   ;;  %v7003_v10 = vld [vmem:[#allocation7 + $0x10] sm:$0xff]   ;;  %vm743_vm1 = vcmask 523264   ;;  %s9465_s7 = sld [smem:[#allocation67_spill]] }
 0x2ad   :  { %6733 = vmatprep.mubr.msk.bf16.mxu1 %vm8335_vm0, %v9417_v3  ;;  %6721 = vmatprep.mubr.msk.bf16.mxu0 %vm8335_vm0, %v9417_v3  ;;  %v7005_v12 = vld [vmem:[#allocation7 + $0x18] sm:$0xff]   ;;  %v7007_v16 = vld [vmem:[#allocation12] sm:$0xff]   ;;  %v7009_v18 = vld [vmem:[#allocation12 + $0x8] sm:$0xff]   ;;  %s9466_s13 = sld [smem:[#allocation69_spill]]  ;;  %vm861_vm2 = vcmask 785408   ;;  %s9467_s10 = sld [smem:[#allocation71_spill]] }
 0x2ae   :  { %6997 = vset.pattern.permute.xlu0 %v8336_v4  ;;  %6996 = vset.pattern.permute.xlu1 %v8336_v4  ;;  %v7011_v20 = vld [vmem:[#allocation12 + $0x10] sm:$0xff]   ;;  %v7013_v22 = vld [vmem:[#allocation12 + $0x18] sm:$0xff]   ;;  %v7014_v26 = vld [vmem:[#allocation12 + $0x20] sm:$0xff]   ;;  %vm8337_vm7 = vmmov 1   ;;  %s9472_s19 = sld [smem:[#allocation80_spill]]  ;;  %s9478_s9 = sld [smem:[#allocation79_spill]] }
 0x2af   :  { %6726 = vmatpush3.bf16.msra.mxu1 %v6999_v6  ;;  %v7018_v24 = vld [vmem:[#allocation16 + $0x4] ss:$48 sps:$4 sm:$0xff]   ;;  %v7016_v27 = vld [vmem:[#allocation16] ss:$48 sps:$4 sm:$0xff]   ;;  %v7021_v33 = vld [vmem:[#allocation16 + $0xc] ss:$48 sps:$4 sm:$0xff]  }
 0x2b0   :  { %6727 = vmatprep.subr.bf16.mxu1 %v9417_v3  ;;  %v7024_v28 = vld [vmem:[#allocation16 + $0x64] ss:$48 sps:$4 sm:$0xff]   ;;  %v7022_v31 = vld [vmem:[#allocation16 + $0x60] ss:$48 sps:$4 sm:$0xff]   ;;  %v7019_v35 = vld [vmem:[#allocation16 + $0x8] ss:$48 sps:$4 sm:$0xff]  }
 0x2b1   :  { %v6998_v5 = vld [vmem:[%s9463_s28] sm:$0xff]   ;;  %v7000_v7 = vld [vmem:[%s9463_s28 + $0x8] sm:$0xff]   ;;  %v7002_v9 = vld [vmem:[%s9463_s28 + $0x10] sm:$0xff]   ;;  %s9479_s15 = sld [smem:[#allocation86_spill]]  ;;  %s9480_s16 = sld [smem:[#allocation81_spill]] }
 0x2b2   :  { %6706 = vmatpush3.bf16.msra.mxu0 %v6998_v5  ;;  %v7004_v11 = vld [vmem:[%s9463_s28 + $0x18] sm:$0xff]   ;;  %v570_v13 = vld [vmem:[%s9464_s1] sm:$0xff]  ;;  %v7008_v17 = vld [vmem:[%s9463_s28 + $0x28] sm:$0xff]   ;;  %s9481_s18 = sld [smem:[#allocation87_spill]] }
 0x2b3   :  { %6707 = vmatprep.subr.bf16.mxu0 %v9417_v3  ;;  %6728 = vmatpush3.bf16.msra.mxu1 %v7001_v8  ;;  %v8802_v14 = vpack.c.bf16 %v570_v13, %v570_v13  ;;  %v7006_v15 = vld [vmem:[%s9463_s28 + $0x20] sm:$0xff]   ;;  %v7010_v19 = vld [vmem:[%s9463_s28 + $0x30] sm:$0xff]   ;;  %v7012_v21 = vld [vmem:[%s9463_s28 + $0x38] sm:$0xff]  }
 0x2b4   :  { %6729 = vmatprep.subr.bf16.mxu1 %v9417_v3  ;;  %v568_v23 = vld [vmem:[%s9465_s7] sm:$0xff]  ;;  %v7015_v29 = vld [vmem:[#allocation12 + $0x28] sm:$0xff]   ;;  %v7027_v38 = vld [vmem:[#allocation16 + $0x6c] ss:$48 sps:$4 sm:$0xff]  }
 0x2b5   :  { %v8821_v25 = vpack.c.bf16 %v568_v23, %v568_v23  ;;  %v572_v30 = vld [vmem:[%s9466_s13] sm:$0xff]  ;;  %v7033_v42 = vld [vmem:[#allocation16 + $0xcc] ss:$48 sps:$4 sm:$0xff]  }
 0x2b6   :  { %6708 = vmatpush3.bf16.msra.mxu0 %v7000_v7  ;;  %v7030_v32 = vld [vmem:[#allocation16 + $0xc4] ss:$48 sps:$4 sm:$0xff]   ;;  %v8828_v34 = vpack.c.bf16 %v572_v30, %v572_v30  ;;  %v7028_v36 = vld [vmem:[#allocation16 + $0xc0] ss:$48 sps:$4 sm:$0xff]   ;;  %v7025_v39 = vld [vmem:[#allocation16 + $0x68] ss:$48 sps:$4 sm:$0xff]  }
 0x2b7   :  { %6709 = vmatprep.subr.bf16.mxu0 %v9417_v3  ;;  %6730 = vmatpush3.bf16.msra.mxu1 %v7003_v10  ;;  %v7036_v37 = vld [vmem:[#allocation16 + $0x124] ss:$48 sps:$4 sm:$0xff]   ;;  %v7034_v40 = vld [vmem:[#allocation16 + $0x120] ss:$48 sps:$4 sm:$0xff]   ;;  %v7031_v43 = vld [vmem:[#allocation16 + $0xc8] ss:$48 sps:$4 sm:$0xff]  }
 0x2b8   :  { %6731 = vmatprep.subr.bf16.mxu1 %v9417_v3  ;;  %v7042_v41 = vld [vmem:[#allocation16 + $0x184] ss:$48 sps:$4 sm:$0xff]   ;;  %v7040_v44 = vld [vmem:[#allocation16 + $0x180] ss:$48 sps:$4 sm:$0xff]   ;;  %v7039_v46 = vld [vmem:[#allocation16 + $0x12c] ss:$48 sps:$4 sm:$0xff]  }
 0x2b9   :  { %v7048_v45 = vld [vmem:[#allocation16 + $0x1e4] ss:$48 sps:$4 sm:$0xff]   ;;  %v7037_v47 = vld [vmem:[#allocation16 + $0x128] ss:$48 sps:$4 sm:$0xff]   ;;  %v7046_v48 = vld [vmem:[#allocation16 + $0x1e0] ss:$48 sps:$4 sm:$0xff]  }
 0x2ba   :  { %6710 = vmatpush3.bf16.msra.mxu0 %v7002_v9  ;;  %v7054_v49 = vld [vmem:[#allocation16 + $0x244] ss:$48 sps:$4 sm:$0xff]   ;;  %v7045_v50 = vld [vmem:[#allocation16 + $0x18c] ss:$48 sps:$4 sm:$0xff]   ;;  %v7043_v51 = vld [vmem:[#allocation16 + $0x188] ss:$48 sps:$4 sm:$0xff]  }
 0x2bb   :  { %6711 = vmatprep.subr.bf16.mxu0 %v9417_v3  ;;  %6732 = vmatpush3.bf16.msra.mxu1 %v7005_v12  ;;  %v7052_v52 = vld [vmem:[#allocation16 + $0x240] ss:$48 sps:$4 sm:$0xff]   ;;  %v7060_v53 = vld [vmem:[#allocation16 + $0x2a4] ss:$48 sps:$4 sm:$0xff]   ;;  %v7051_v54 = vld [vmem:[#allocation16 + $0x1ec] ss:$48 sps:$4 sm:$0xff]  }
 0x2bc   :  { %6737 = vmatprep.subr.bf16.mxu1 %v9417_v3  ;;  %v7049_v55 = vld [vmem:[#allocation16 + $0x1e8] ss:$48 sps:$4 sm:$0xff]   ;;  %v7058_v56 = vld [vmem:[#allocation16 + $0x2a0] ss:$48 sps:$4 sm:$0xff]   ;;  %v7066_v57 = vld [vmem:[#allocation16 + $0x14] ss:$48 sps:$4 sm:$0xff]  }
 0x2bd   :  { %v7057_v58 = vld [vmem:[#allocation16 + $0x24c] ss:$48 sps:$4 sm:$0xff]   ;;  %v7055_v59 = vld [vmem:[#allocation16 + $0x248] ss:$48 sps:$4 sm:$0xff]   ;;  %v7064_v60 = vld [vmem:[#allocation16 + $0x10] ss:$48 sps:$4 sm:$0xff]  }
 0x2be   :  { %6712 = vmatpush3.bf16.msra.mxu0 %v7004_v11  ;;  %6734 = vmatmul.mubr.msk.bf16.vlgmr.msra.gmra.mrb[0].mxu1 %vm743_vm1, %v8802_v14  ;;  %v7072_v61 = vld [vmem:[#allocation16 + $0x74] ss:$48 sps:$4 sm:$0xff]   ;;  %v7063_v62 = vld [vmem:[#allocation16 + $0x2ac] ss:$48 sps:$4 sm:$0xff]   ;;  %v7061_v63 = vld [vmem:[#allocation16 + $0x2a8] ss:$48 sps:$4 sm:$0xff]  }
 0x2bf   :  { %6713 = vmatprep.subr.bf16.mxu0 %v9417_v3  ;;  %6738 = vmatpush3.bf16.msra.mxu1 %v7007_v16  ;;  %v7070_v0 = vld [vmem:[#allocation16 + $0x70] ss:$48 sps:$4 sm:$0xff]   ;;  %v7078_v1 = vld [vmem:[#allocation16 + $0xd4] ss:$48 sps:$4 sm:$0xff]   ;;  %v7069_v2 = vld [vmem:[#allocation16 + $0x1c] ss:$48 sps:$4 sm:$0xff]  }
 0x2c0   :  { %6739 = vmatprep.subr.bf16.mxu1 %v9417_v3  ;;  %6749 = vmatprep.mubr.msk.bf16.mxu1 %vm8335_vm0, %v9417_v3  ;;  %v7067_v5 = vld [vmem:[#allocation16 + $0x18] ss:$48 sps:$4 sm:$0xff]   ;;  %v7076_v6 = vld [vmem:[#allocation16 + $0xd0] ss:$48 sps:$4 sm:$0xff]   ;;  %v7084_v7 = vld [vmem:[#allocation16 + $0x134] ss:$48 sps:$4 sm:$0xff]  }
 0x2c1   :  { %v7075_v8 = vld [vmem:[#allocation16 + $0x7c] ss:$48 sps:$4 sm:$0xff]   ;;  %v7073_v9 = vld [vmem:[#allocation16 + $0x78] ss:$48 sps:$4 sm:$0xff]   ;;  %v7082_v10 = vld [vmem:[#allocation16 + $0x130] ss:$48 sps:$4 sm:$0xff]  }
 0x2c2   :  { %6714 = vmatpush3.bf16.msra.mxu0 %v7006_v15  ;;  %v7090_v11 = vld [vmem:[#allocation16 + $0x194] ss:$48 sps:$4 sm:$0xff]   ;;  %v7081_v12 = vld [vmem:[#allocation16 + $0xdc] ss:$48 sps:$4 sm:$0xff]   ;;  %v7079_v13 = vld [vmem:[#allocation16 + $0xd8] ss:$48 sps:$4 sm:$0xff]  }
 0x2c3   :  { %6715 = vmatprep.subr.bf16.mxu0 %v9417_v3  ;;  %6740 = vmatpush3.bf16.msra.mxu1 %v7009_v18  ;;  %v7088_v15 = vld [vmem:[#allocation16 + $0x190] ss:$48 sps:$4 sm:$0xff]   ;;  %v7096_v16 = vld [vmem:[#allocation16 + $0x1f4] ss:$48 sps:$4 sm:$0xff]   ;;  %v7085_v18 = vld [vmem:[#allocation16 + $0x138] ss:$48 sps:$4 sm:$0xff]  }
 0x2c4   :  { %6741 = vmatprep.subr.bf16.mxu1 %v9417_v3  ;;  %v7100_v23 = vld [vmem:[#allocation16 + $0x250] ss:$48 sps:$4 sm:$0xff]   ;;  %v7105_v30 = vld [vmem:[#allocation16 + $0x25c] ss:$48 sps:$4 sm:$0xff]  }
 0x2c6   :  { %6716 = vmatpush3.bf16.msra.mxu0 %v7008_v17  ;;  %v7087_v17 = vld [vmem:[#allocation16 + $0x13c] ss:$48 sps:$4 sm:$0xff]  }
 0x2c7   :  { %6717 = vmatprep.subr.bf16.mxu0 %v9417_v3  ;;  %6742 = vmatpush3.bf16.msra.mxu1 %v7011_v20  ;;  %v7102_v20 = vld [vmem:[#allocation16 + $0x254] ss:$48 sps:$4 sm:$0xff]  }
 0x2c8   :  { %6743 = vmatprep.subr.bf16.mxu1 %v9417_v3 }
 0x2ca   :  { %6718 = vmatpush3.bf16.msra.mxu0 %v7010_v19  ;;  %v7094_v19 = vld [vmem:[#allocation16 + $0x1f0] ss:$48 sps:$4 sm:$0xff]  }
 0x2cb   :  { %6719 = vmatprep.subr.bf16.mxu0 %v9417_v3  ;;  %6744 = vmatpush3.bf16.msra.mxu1 %v7013_v22  ;;  %v7091_v22 = vld [vmem:[#allocation16 + $0x198] ss:$48 sps:$4 sm:$0xff]  }
 0x2cc   :  { %6745 = vmatprep.subr.bf16.mxu1 %v9417_v3 }
 0x2ce   :  { %6720 = vmatpush3.bf16.msra.mxu0 %v7012_v21  ;;  %v7093_v21 = vld [vmem:[#allocation16 + $0x19c] ss:$48 sps:$4 sm:$0xff]  }
 0x2cf   :  { %1570 = vmatprep.subr.bf16.mxu0 %v7018_v24  ;;  %6746 = vmatpush3.bf16.msra.mxu1 %v7014_v26  ;;  %v7108_v24 = vld [vmem:[#allocation16 + $0x2b4] ss:$48 sps:$4 sm:$0xff]   ;;  %v7099_v26 = vld [vmem:[#allocation16 + $0x1fc] ss:$48 sps:$4 sm:$0xff]  }
 0x2d0   :  { %6747 = vmatprep.subr.bf16.mxu1 %v9417_v3 }
 0x2d1   :  { %6722 = vmatmul.mubr.bf16.vlgmr.msra.gmra.mrb[0].mxu0 %v8821_v25 }
 0x2d2   :  { %1571 = vmatpush1.bf16.msra.mxu0 %v7016_v27  ;;  %1602 = vmatprep.mubr.bf16.mxu0 %v8336_v4  ;;  %v7097_v27 = vld [vmem:[#allocation16 + $0x1f8] ss:$48 sps:$4 sm:$0xff]  }
 0x2d3   :  { %1572 = vmatprep.subr.bf16.mxu0 %v7024_v28  ;;  %6748 = vmatpush3.bf16.msra.mxu1 %v7015_v29  ;;  %v7106_v28 = vld [vmem:[#allocation16 + $0x2b0] ss:$48 sps:$4 sm:$0xff]   ;;  %v7114_v29 = vld [vmem:[#allocation16 + $0x24] ss:$48 sps:$4 sm:$0xff]  }
 0x2d4   :  { %1611 = vmatprep.subr.bf16.mxu1 %v7021_v33  ;;  %v7120_v33 = vld [vmem:[#allocation16 + $0x84] ss:$48 sps:$4 sm:$0xff]  }
 0x2d6   :  { %1573 = vmatpush1.bf16.msra.mxu0 %v7022_v31  ;;  %6750 = vmatmul.mubr.msk.bf16.vlgmr.msra.gmra.mrb[4].mxu1 %vm861_vm2, %v8828_v34  ;;  %v7103_v31 = vld [vmem:[#allocation16 + $0x258] ss:$48 sps:$4 sm:$0xff]  }
 0x2d7   :  { %1574 = vmatprep.subr.bf16.mxu0 %v7030_v32  ;;  %1612 = vmatpush1.bf16.msra.mxu1 %v7019_v35  ;;  %v7112_v32 = vld [vmem:[#allocation16 + $0x20] ss:$48 sps:$4 sm:$0xff]   ;;  %v7111_v35 = vld [vmem:[#allocation16 + $0x2bc] ss:$48 sps:$4 sm:$0xff]  }
 0x2d8   :  { %1613 = vmatprep.subr.bf16.mxu1 %v7027_v38  ;;  %1643 = vmatprep.mubr.bf16.mxu1 %v8336_v4  ;;  %v7126_v38 = vld [vmem:[#allocation16 + $0xe4] ss:$48 sps:$4 sm:$0xff]  }
 0x2da   :  { %1575 = vmatpush1.bf16.msra.mxu0 %v7028_v36  ;;  %v7109_v36 = vld [vmem:[#allocation16 + $0x2b8] ss:$48 sps:$4 sm:$0xff]  }
 0x2db   :  { %1576 = vmatprep.subr.bf16.mxu0 %v7036_v37  ;;  %1614 = vmatpush1.bf16.msra.mxu1 %v7025_v39  ;;  %v7118_v37 = vld [vmem:[#allocation16 + $0x80] ss:$48 sps:$4 sm:$0xff]   ;;  %v7117_v39 = vld [vmem:[#allocation16 + $0x2c] ss:$48 sps:$4 sm:$0xff]  }
 0x2dc   :  { %1615 = vmatprep.subr.bf16.mxu1 %v7033_v42  ;;  %v7132_v42 = vld [vmem:[#allocation16 + $0x144] ss:$48 sps:$4 sm:$0xff]  }
 0x2de   :  { %1577 = vmatpush1.bf16.msra.mxu0 %v7034_v40  ;;  %v7115_v40 = vld [vmem:[#allocation16 + $0x28] ss:$48 sps:$4 sm:$0xff]  }
 0x2df   :  { %1578 = vmatprep.subr.bf16.mxu0 %v7042_v41  ;;  %1616 = vmatpush1.bf16.msra.mxu1 %v7031_v43  ;;  %v7124_v41 = vld [vmem:[#allocation16 + $0xe0] ss:$48 sps:$4 sm:$0xff]   ;;  %v7123_v43 = vld [vmem:[#allocation16 + $0x8c] ss:$48 sps:$4 sm:$0xff]  }
 0x2e0   :  { %1617 = vmatprep.subr.bf16.mxu1 %v7039_v46  ;;  %v7138_v46 = vld [vmem:[#allocation16 + $0x1a4] ss:$48 sps:$4 sm:$0xff]  }
 0x2e2   :  { %1579 = vmatpush1.bf16.msra.mxu0 %v7040_v44  ;;  %v7121_v44 = vld [vmem:[#allocation16 + $0x88] ss:$48 sps:$4 sm:$0xff]  }
 0x2e3   :  { %1580 = vmatprep.subr.bf16.mxu0 %v7048_v45  ;;  %1618 = vmatpush1.bf16.msra.mxu1 %v7037_v47  ;;  %v7130_v45 = vld [vmem:[#allocation16 + $0x140] ss:$48 sps:$4 sm:$0xff]   ;;  %v7129_v47 = vld [vmem:[#allocation16 + $0xec] ss:$48 sps:$4 sm:$0xff]  }
 0x2e4   :  { %1619 = vmatprep.subr.bf16.mxu1 %v7045_v50  ;;  %v7144_v50 = vld [vmem:[#allocation16 + $0x204] ss:$48 sps:$4 sm:$0xff]  }
 0x2e6   :  { %1581 = vmatpush1.bf16.msra.mxu0 %v7046_v48  ;;  %v7127_v48 = vld [vmem:[#allocation16 + $0xe8] ss:$48 sps:$4 sm:$0xff]  }
 0x2e7   :  { %1582 = vmatprep.subr.bf16.mxu0 %v7054_v49  ;;  %1620 = vmatpush1.bf16.msra.mxu1 %v7043_v51  ;;  %v7136_v49 = vld [vmem:[#allocation16 + $0x1a0] ss:$48 sps:$4 sm:$0xff]   ;;  %v7135_v51 = vld [vmem:[#allocation16 + $0x14c] ss:$48 sps:$4 sm:$0xff]  }
 0x2e8   :  { %1621 = vmatprep.subr.bf16.mxu1 %v7051_v54  ;;  %v7150_v54 = vld [vmem:[#allocation16 + $0x264] ss:$48 sps:$4 sm:$0xff]  }
 0x2ea   :  { %1583 = vmatpush1.bf16.msra.mxu0 %v7052_v52  ;;  %v7142_v52 = vld [vmem:[#allocation16 + $0x200] ss:$48 sps:$4 sm:$0xff]  }
 0x2eb   :  { %1584 = vmatprep.subr.bf16.mxu0 %v7060_v53  ;;  %1622 = vmatpush1.bf16.msra.mxu1 %v7049_v55  ;;  %v7133_v53 = vld [vmem:[#allocation16 + $0x148] ss:$48 sps:$4 sm:$0xff]   ;;  %v7141_v55 = vld [vmem:[#allocation16 + $0x1ac] ss:$48 sps:$4 sm:$0xff]  }
 0x2ec   :  { %1623 = vmatprep.subr.bf16.mxu1 %v7057_v58  ;;  %v7156_v58 = vld [vmem:[#allocation16 + $0x2c4] ss:$48 sps:$4 sm:$0xff]  }
 0x2ee   :  { %1585 = vmatpush1.bf16.msra.mxu0 %v7058_v56  ;;  %v7148_v56 = vld [vmem:[#allocation16 + $0x260] ss:$48 sps:$4 sm:$0xff]  }
 0x2ef   :  { %1652 = vmatprep.subr.bf16.mxu0 %v7066_v57  ;;  %1624 = vmatpush1.bf16.msra.mxu1 %v7055_v59  ;;  %v7139_v57 = vld [vmem:[#allocation16 + $0x1a8] ss:$48 sps:$4 sm:$0xff]   ;;  %v7147_v59 = vld [vmem:[#allocation16 + $0x20c] ss:$48 sps:$4 sm:$0xff]  }
 0x2f0   :  { %1625 = vmatprep.subr.bf16.mxu1 %v7063_v62  ;;  %v7153_v62 = vld [vmem:[#allocation16 + $0x26c] ss:$48 sps:$4 sm:$0xff]  }
 0x2f1   :  { %1603 = vmatmul.mubr.bf16.vlgmr.msra.gmra.mrb[4].mxu0 %v8821_v25 }
 0x2f2   :  { %1653 = vmatpush1.bf16.msra.mxu0 %v7064_v60  ;;  %1684 = vmatprep.mubr.bf16.mxu0 %v8336_v4  ;;  %v7154_v60 = vld [vmem:[#allocation16 + $0x2c0] ss:$48 sps:$4 sm:$0xff]  }
 0x2f3   :  { %1654 = vmatprep.subr.bf16.mxu0 %v7072_v61  ;;  %1626 = vmatpush1.bf16.msra.mxu1 %v7061_v63  ;;  %v7145_v61 = vld [vmem:[#allocation16 + $0x208] ss:$48 sps:$4 sm:$0xff]   ;;  %v7162_v63 = vld [vmem:[#allocation19 + $0x4] ss:$48 sps:$4 sm:$0xff]  }
 0x2f4   :  { %1693 = vmatprep.subr.bf16.mxu1 %v7069_v2  ;;  %v7168_v2 = vld [vmem:[#allocation19 + $0x64] ss:$48 sps:$4 sm:$0xff]  }
 0x2f6   :  { %1655 = vmatpush1.bf16.msra.mxu0 %v7070_v0  ;;  %1644 = vmatmul.mubr.bf16.vlgmr.msra.gmra.mrb[8].mxu1 %v8821_v25  ;;  %v7151_v0 = vld [vmem:[#allocation16 + $0x268] ss:$48 sps:$4 sm:$0xff]  }
 0x2f7   :  { %1656 = vmatprep.subr.bf16.mxu0 %v7078_v1  ;;  %1694 = vmatpush1.bf16.msra.mxu1 %v7067_v5  ;;  %v7160_v1 = vld [vmem:[#allocation19] ss:$48 sps:$4 sm:$0xff]  }
 0x2f8   :  { %1695 = vmatprep.subr.bf16.mxu1 %v7075_v8  ;;  %1725 = vmatprep.mubr.bf16.mxu1 %v8336_v4  ;;  %v7159_v5 = vld [vmem:[#allocation16 + $0x2cc] ss:$48 sps:$4 sm:$0xff]   ;;  %v7174_v8 = vld [vmem:[#allocation19 + $0xc4] ss:$48 sps:$4 sm:$0xff]  }
 0x2fa   :  { %1657 = vmatpush1.bf16.msra.mxu0 %v7076_v6  ;;  %v7157_v6 = vld [vmem:[#allocation16 + $0x2c8] ss:$48 sps:$4 sm:$0xff]  }
 0x2fb   :  { %1658 = vmatprep.subr.bf16.mxu0 %v7084_v7  ;;  %1696 = vmatpush1.bf16.msra.mxu1 %v7073_v9  ;;  %v7166_v7 = vld [vmem:[#allocation19 + $0x60] ss:$48 sps:$4 sm:$0xff]   ;;  %v7165_v9 = vld [vmem:[#allocation19 + $0xc] ss:$48 sps:$4 sm:$0xff]  }
 0x2fc   :  { %1697 = vmatprep.subr.bf16.mxu1 %v7081_v12  ;;  %v7180_v12 = vld [vmem:[#allocation19 + $0x124] ss:$48 sps:$4 sm:$0xff]  }
 0x2fe   :  { %1659 = vmatpush1.bf16.msra.mxu0 %v7082_v10  ;;  %v7172_v10 = vld [vmem:[#allocation19 + $0xc0] ss:$48 sps:$4 sm:$0xff]  }
 0x2ff   :  { %1660 = vmatprep.subr.bf16.mxu0 %v7090_v11  ;;  %1698 = vmatpush1.bf16.msra.mxu1 %v7079_v13  ;;  %v7163_v11 = vld [vmem:[#allocation19 + $0x8] ss:$48 sps:$4 sm:$0xff]   ;;  %v7171_v13 = vld [vmem:[#allocation19 + $0x6c] ss:$48 sps:$4 sm:$0xff]  }
 0x300   :  { %1699 = vmatprep.subr.bf16.mxu1 %v7087_v17  ;;  %v7186_v17 = vld [vmem:[#allocation19 + $0x14] ss:$48 sps:$4 sm:$0xff]  }
 0x302   :  { %1661 = vmatpush1.bf16.msra.mxu0 %v7088_v15  ;;  %v7178_v15 = vld [vmem:[#allocation19 + $0x120] ss:$48 sps:$4 sm:$0xff]  }
 0x303   :  { %1662 = vmatprep.subr.bf16.mxu0 %v7096_v16  ;;  %1700 = vmatpush1.bf16.msra.mxu1 %v7085_v18  ;;  %v7169_v16 = vld [vmem:[#allocation19 + $0x68] ss:$48 sps:$4 sm:$0xff]   ;;  %v7177_v18 = vld [vmem:[#allocation19 + $0xcc] ss:$48 sps:$4 sm:$0xff]  }
 0x304   :  { %1701 = vmatprep.subr.bf16.mxu1 %v7093_v21  ;;  %v7192_v21 = vld [vmem:[#allocation19 + $0x74] ss:$48 sps:$4 sm:$0xff]  }
 0x306   :  { %1663 = vmatpush1.bf16.msra.mxu0 %v7094_v19  ;;  %v7184_v19 = vld [vmem:[#allocation19 + $0x10] ss:$48 sps:$4 sm:$0xff]  }
 0x307   :  { %1664 = vmatprep.subr.bf16.mxu0 %v7102_v20  ;;  %1702 = vmatpush1.bf16.msra.mxu1 %v7091_v22  ;;  %v7175_v20 = vld [vmem:[#allocation19 + $0xc8] ss:$48 sps:$4 sm:$0xff]   ;;  %v7183_v22 = vld [vmem:[#allocation19 + $0x12c] ss:$48 sps:$4 sm:$0xff]  }
 0x308   :  { %1703 = vmatprep.subr.bf16.mxu1 %v7099_v26  ;;  %v7189_v26 = vld [vmem:[#allocation19 + $0x1c] ss:$48 sps:$4 sm:$0xff]  }
 0x30a   :  { %1665 = vmatpush1.bf16.msra.mxu0 %v7100_v23  ;;  %v7181_v23 = vld [vmem:[#allocation19 + $0x128] ss:$48 sps:$4 sm:$0xff]  }
 0x30b   :  { %1666 = vmatprep.subr.bf16.mxu0 %v7108_v24  ;;  %1704 = vmatpush1.bf16.msra.mxu1 %v7097_v27  ;;  %v7198_v24 = vld [vmem:[#allocation19 + $0xd4] ss:$48 sps:$4 sm:$0xff]   ;;  %v7196_v27 = vld [vmem:[#allocation19 + $0xd0] ss:$48 sps:$4 sm:$0xff]  }
 0x30c   :  { %1705 = vmatprep.subr.bf16.mxu1 %v7105_v30  ;;  %v7195_v30 = vld [vmem:[#allocation19 + $0x7c] ss:$48 sps:$4 sm:$0xff]  }
 0x30e   :  { %1667 = vmatpush1.bf16.msra.mxu0 %v7106_v28  ;;  %v7187_v28 = vld [vmem:[#allocation19 + $0x18] ss:$48 sps:$4 sm:$0xff]  }
 0x30f   :  { %1734 = vmatprep.subr.bf16.mxu0 %v7114_v29  ;;  %1706 = vmatpush1.bf16.msra.mxu1 %v7103_v31  ;;  %v7204_v29 = vld [vmem:[#allocation19 + $0x134] ss:$48 sps:$4 sm:$0xff]   ;;  %v7202_v31 = vld [vmem:[#allocation19 + $0x130] ss:$48 sps:$4 sm:$0xff]  }
 0x310   :  { %1707 = vmatprep.subr.bf16.mxu1 %v7111_v35  ;;  %v7201_v35 = vld [vmem:[#allocation19 + $0xdc] ss:$48 sps:$4 sm:$0xff]  }
 0x311   :  { %1685 = vmatmul.mubr.bf16.vlgmr.msra.gmra.mrb[8].mxu0 %v8821_v25 }
 0x312   :  { %1735 = vmatpush1.bf16.msra.mxu0 %v7112_v32  ;;  %1766 = vmatprep.mubr.bf16.mxu0 %v8336_v4  ;;  %v7193_v32 = vld [vmem:[#allocation19 + $0x78] ss:$48 sps:$4 sm:$0xff]  }
 0x313   :  { %1736 = vmatprep.subr.bf16.mxu0 %v7120_v33  ;;  %1708 = vmatpush1.bf16.msra.mxu1 %v7109_v36  ;;  %v7210_v33 = vld [vmem:[#allocation19 + $0x24] ss:$48 sps:$4 sm:$0xff]   ;;  %v7208_v36 = vld [vmem:[#allocation19 + $0x20] ss:$48 sps:$4 sm:$0xff]  }
 0x314   :  { %1775 = vmatprep.subr.bf16.mxu1 %v7117_v39  ;;  %v7207_v39 = vld [vmem:[#allocation19 + $0x13c] ss:$48 sps:$4 sm:$0xff]  }
 0x316   :  { %1737 = vmatpush1.bf16.msra.mxu0 %v7118_v37  ;;  %1726 = vmatmul.mubr.bf16.vlgmr.msra.gmra.mrb[12].mxu1 %v8821_v25  ;;  %v7199_v37 = vld [vmem:[#allocation19 + $0xd8] ss:$48 sps:$4 sm:$0xff]  }
 0x317   :  { %1738 = vmatprep.subr.bf16.mxu0 %v7126_v38  ;;  %1776 = vmatpush1.bf16.msra.mxu1 %v7115_v40  ;;  %v7216_v38 = vld [vmem:[#allocation19 + $0x84] ss:$48 sps:$4 sm:$0xff]   ;;  %v7214_v40 = vld [vmem:[#allocation19 + $0x80] ss:$48 sps:$4 sm:$0xff]  }
 0x318   :  { %1777 = vmatprep.subr.bf16.mxu1 %v7123_v43  ;;  %1807 = vmatprep.mubr.bf16.mxu1 %v8336_v4  ;;  %v7213_v43 = vld [vmem:[#allocation19 + $0x2c] ss:$48 sps:$4 sm:$0xff]  }
 0x31a   :  { %1739 = vmatpush1.bf16.msra.mxu0 %v7124_v41  ;;  %v7205_v41 = vld [vmem:[#allocation19 + $0x138] ss:$48 sps:$4 sm:$0xff]  }
 0x31b   :  { %1740 = vmatprep.subr.bf16.mxu0 %v7132_v42  ;;  %1778 = vmatpush1.bf16.msra.mxu1 %v7121_v44  ;;  %v7222_v42 = vld [vmem:[#allocation19 + $0xe4] ss:$48 sps:$4 sm:$0xff]   ;;  %v7220_v44 = vld [vmem:[#allocation19 + $0xe0] ss:$48 sps:$4 sm:$0xff]  }
 0x31c   :  { %1779 = vmatprep.subr.bf16.mxu1 %v7129_v47  ;;  %v7219_v47 = vld [vmem:[#allocation19 + $0x8c] ss:$48 sps:$4 sm:$0xff]  }
 0x31e   :  { %1741 = vmatpush1.bf16.msra.mxu0 %v7130_v45  ;;  %v7211_v45 = vld [vmem:[#allocation19 + $0x28] ss:$48 sps:$4 sm:$0xff]  }
 0x31f   :  { %1742 = vmatprep.subr.bf16.mxu0 %v7138_v46  ;;  %1780 = vmatpush1.bf16.msra.mxu1 %v7127_v48  ;;  %v7228_v46 = vld [vmem:[#allocation19 + $0x144] ss:$48 sps:$4 sm:$0xff]   ;;  %v7226_v48 = vld [vmem:[#allocation19 + $0x140] ss:$48 sps:$4 sm:$0xff]  }
 0x320   :  { %1781 = vmatprep.subr.bf16.mxu1 %v7135_v51  ;;  %v7225_v51 = vld [vmem:[#allocation19 + $0xec] ss:$48 sps:$4 sm:$0xff]  }
 0x322   :  { %1743 = vmatpush1.bf16.msra.mxu0 %v7136_v49  ;;  %v7217_v49 = vld [vmem:[#allocation19 + $0x88] ss:$48 sps:$4 sm:$0xff]  }
 0x323   :  { %1744 = vmatprep.subr.bf16.mxu0 %v7144_v50  ;;  %1782 = vmatpush1.bf16.msra.mxu1 %v7133_v53  ;;  %v7234_v50 = vld [vmem:[#allocation22 + $0x4] ss:$48 sps:$4 sm:$0xff]   ;;  %v7223_v53 = vld [vmem:[#allocation19 + $0xe8] ss:$48 sps:$4 sm:$0xff]  }
 0x324   :  { %1783 = vmatprep.subr.bf16.mxu1 %v7141_v55  ;;  %v7231_v55 = vld [vmem:[#allocation19 + $0x14c] ss:$48 sps:$4 sm:$0xff]  }
 0x326   :  { %1745 = vmatpush1.bf16.msra.mxu0 %v7142_v52  ;;  %v7232_v52 = vld [vmem:[#allocation22] ss:$48 sps:$4 sm:$0xff]  }
 0x327   :  { %1746 = vmatprep.subr.bf16.mxu0 %v7150_v54  ;;  %1784 = vmatpush1.bf16.msra.mxu1 %v7139_v57  ;;  %v7240_v54 = vld [vmem:[#allocation22 + $0x64] ss:$48 sps:$4 sm:$0xff]   ;;  %v7229_v57 = vld [vmem:[#allocation19 + $0x148] ss:$48 sps:$4 sm:$0xff]  }
 0x328   :  { %1785 = vmatprep.subr.bf16.mxu1 %v7147_v59  ;;  %v7237_v59 = vld [vmem:[#allocation22 + $0xc] ss:$48 sps:$4 sm:$0xff]  }
 0x32a   :  { %1747 = vmatpush1.bf16.msra.mxu0 %v7148_v56  ;;  %v7238_v56 = vld [vmem:[#allocation22 + $0x60] ss:$48 sps:$4 sm:$0xff]  }
 0x32b   :  { %1748 = vmatprep.subr.bf16.mxu0 %v7156_v58  ;;  %1786 = vmatpush1.bf16.msra.mxu1 %v7145_v61  ;;  %v7246_v58 = vld [vmem:[#allocation22 + $0xc4] ss:$48 sps:$4 sm:$0xff]   ;;  %v7235_v61 = vld [vmem:[#allocation22 + $0x8] ss:$48 sps:$4 sm:$0xff]  }
 0x32c   :  { %1787 = vmatprep.subr.bf16.mxu1 %v7153_v62  ;;  %v7252_v62 = vld [vmem:[#allocation22 + $0x124] ss:$48 sps:$4 sm:$0xff]  }
 0x32e   :  { %1749 = vmatpush1.bf16.msra.mxu0 %v7154_v60  ;;  %v7244_v60 = vld [vmem:[#allocation22 + $0xc0] ss:$48 sps:$4 sm:$0xff]  }
 0x32f   :  { %2168 = vmatprep.subr.bf16.mxu0 %v7162_v63  ;;  %1788 = vmatpush1.bf16.msra.mxu1 %v7151_v0  ;;  %v7243_v63 = vld [vmem:[#allocation22 + $0x6c] ss:$48 sps:$4 sm:$0xff]   ;;  %v7250_v0 = vld [vmem:[#allocation22 + $0x120] ss:$48 sps:$4 sm:$0xff]  }
 0x330   :  { %1789 = vmatprep.subr.bf16.mxu1 %v7159_v5  ;;  %v7249_v5 = vld [vmem:[#allocation22 + $0xcc] ss:$48 sps:$4 sm:$0xff]  }
 0x331   :  { %1767 = vmatmul.mubr.bf16.vlgmr.msra.gmra.mrb[12].mxu0 %v8821_v25 }
 0x332   :  { %2169 = vmatpush1.bf16.msra.mxu0 %v7160_v1  ;;  %2200 = vmatprep.mubr.bf16.mxu0 %v8336_v4  ;;  %v7241_v1 = vld [vmem:[#allocation22 + $0x68] ss:$48 sps:$4 sm:$0xff]  }
 0x333   :  { %2170 = vmatprep.subr.bf16.mxu0 %v7168_v2  ;;  %1790 = vmatpush1.bf16.msra.mxu1 %v7157_v6  ;;  %v7258_v2 = vld [vmem:[#allocation22 + $0x184] ss:$48 sps:$4 sm:$0xff]   ;;  %v7256_v6 = vld [vmem:[#allocation22 + $0x180] ss:$48 sps:$4 sm:$0xff]  }
 0x334   :  { %2209 = vmatprep.subr.bf16.mxu1 %v7165_v9  ;;  %v7255_v9 = vld [vmem:[#allocation22 + $0x12c] ss:$48 sps:$4 sm:$0xff]  }
 0x336   :  { %2171 = vmatpush1.bf16.msra.mxu0 %v7166_v7  ;;  %1808 = vmatmul.mubr.bf16.vlgmr.msra.gmra.mrb[16].mxu1 %v8821_v25  ;;  %v7190_v25 = vld [vmem:[#allocation19 + $0x70] ss:$48 sps:$4 sm:$0xff]   ;;  %v7247_v7 = vld [vmem:[#allocation22 + $0xc8] ss:$48 sps:$4 sm:$0xff]  }
 0x337   :  { %2172 = vmatprep.subr.bf16.mxu0 %v7174_v8  ;;  %2210 = vmatpush1.bf16.msra.mxu1 %v7163_v11  ;;  %v7264_v8 = vld [vmem:[#allocation22 + $0x1e4] ss:$48 sps:$4 sm:$0xff]   ;;  %v7253_v11 = vld [vmem:[#allocation22 + $0x128] ss:$48 sps:$4 sm:$0xff]  }
 0x338   :  { %2211 = vmatprep.subr.bf16.mxu1 %v7171_v13  ;;  %2241 = vmatprep.mubr.bf16.mxu1 %v8336_v4  ;;  %v7261_v13 = vld [vmem:[#allocation22 + $0x18c] ss:$48 sps:$4 sm:$0xff]  }
 0x33a   :  { %2173 = vmatpush1.bf16.msra.mxu0 %v7172_v10  ;;  %v7262_v10 = vld [vmem:[#allocation22 + $0x1e0] ss:$48 sps:$4 sm:$0xff]  }
 0x33b   :  { %2174 = vmatprep.subr.bf16.mxu0 %v7180_v12  ;;  %2212 = vmatpush1.bf16.msra.mxu1 %v7169_v16  ;;  %v7270_v12 = vld [vmem:[#allocation22 + $0x14] ss:$48 sps:$4 sm:$0xff]  }
 0x33c   :  { %2213 = vmatprep.subr.bf16.mxu1 %v7177_v18  ;;  %v7276_v16 = vld [vmem:[#allocation22 + $0x74] ss:$48 sps:$4 sm:$0xff]   ;;  %v7274_v18 = vld [vmem:[#allocation22 + $0x70] ss:$48 sps:$4 sm:$0xff]  }
 0x33e   :  { %2175 = vmatpush1.bf16.msra.mxu0 %v7178_v15  ;;  %v7259_v15 = vld [vmem:[#allocation22 + $0x188] ss:$48 sps:$4 sm:$0xff]  }
 0x33f   :  { %2250 = vmatprep.subr.bf16.mxu0 %v7186_v17  ;;  %2214 = vmatpush1.bf16.msra.mxu1 %v7175_v20  ;;  %v7267_v17 = vld [vmem:[#allocation22 + $0x1ec] ss:$48 sps:$4 sm:$0xff]   ;;  %v7282_v20 = vld [vmem:[#allocation22 + $0xd4] ss:$48 sps:$4 sm:$0xff]  }
 0x340   :  { %2215 = vmatprep.subr.bf16.mxu1 %v7183_v22  ;;  %v7280_v22 = vld [vmem:[#allocation22 + $0xd0] ss:$48 sps:$4 sm:$0xff]  }
 0x341   :  { %6075 = vmatmul.mubr.msk.bf16.vlgmr.msra.gmra.mrb[16].mxu0 %vm743_vm1, %v8802_v14 }
 0x342   :  { %2251 = vmatpush1.bf16.msra.mxu0 %v7184_v19  ;;  %2282 = vmatprep.mubr.bf16.mxu0 %v8336_v4  ;;  %v7265_v19 = vld [vmem:[#allocation22 + $0x1e8] ss:$48 sps:$4 sm:$0xff]  }
 0x343   :  { %2252 = vmatprep.subr.bf16.mxu0 %v7192_v21  ;;  %2216 = vmatpush1.bf16.msra.mxu1 %v7181_v23  ;;  %v7273_v21 = vld [vmem:[#allocation22 + $0x1c] ss:$48 sps:$4 sm:$0xff]   ;;  %v7288_v23 = vld [vmem:[#allocation22 + $0x134] ss:$48 sps:$4 sm:$0xff]  }
 0x344   :  { %2291 = vmatprep.subr.bf16.mxu1 %v7189_v26  ;;  %v7286_v26 = vld [vmem:[#allocation22 + $0x130] ss:$48 sps:$4 sm:$0xff]  }
 0x346   :  { %2253 = vmatpush1.bf16.msra.mxu0 %v7190_v25  ;;  %6076 = vmatmul.mubr.msk.bf16.vlgmr.msra.gmra.mrb[20].mxu1 %vm743_vm1, %v8802_v14  ;;  %v7271_v25 = vld [vmem:[#allocation22 + $0x18] ss:$48 sps:$4 sm:$0xff]  }
 0x347   :  { %2254 = vmatprep.subr.bf16.mxu0 %v7198_v24  ;;  %2292 = vmatpush1.bf16.msra.mxu1 %v7187_v28  ;;  %v7279_v24 = vld [vmem:[#allocation22 + $0x7c] ss:$48 sps:$4 sm:$0xff]   ;;  %v7294_v28 = vld [vmem:[#allocation22 + $0x194] ss:$48 sps:$4 sm:$0xff]  }
 0x348   :  { %2293 = vmatprep.subr.bf16.mxu1 %v7195_v30  ;;  %2323 = vmatprep.mubr.bf16.mxu1 %v8336_v4  ;;  %v7292_v30 = vld [vmem:[#allocation22 + $0x190] ss:$48 sps:$4 sm:$0xff]  }
 0x34a   :  { %2255 = vmatpush1.bf16.msra.mxu0 %v7196_v27  ;;  %v7277_v27 = vld [vmem:[#allocation22 + $0x78] ss:$48 sps:$4 sm:$0xff]  }
 0x34b   :  { %2256 = vmatprep.subr.bf16.mxu0 %v7204_v29  ;;  %2294 = vmatpush1.bf16.msra.mxu1 %v7193_v32  ;;  %v7285_v29 = vld [vmem:[#allocation22 + $0xdc] ss:$48 sps:$4 sm:$0xff]   ;;  %v7300_v32 = vld [vmem:[#allocation22 + $0x1f4] ss:$48 sps:$4 sm:$0xff]  }
 0x34c   :  { %2295 = vmatprep.subr.bf16.mxu1 %v7201_v35  ;;  %v7298_v35 = vld [vmem:[#allocation22 + $0x1f0] ss:$48 sps:$4 sm:$0xff]  }
 0x34e   :  { %2257 = vmatpush1.bf16.msra.mxu0 %v7202_v31  ;;  %v7283_v31 = vld [vmem:[#allocation22 + $0xd8] ss:$48 sps:$4 sm:$0xff]  }
 0x34f   :  { %2332 = vmatprep.subr.bf16.mxu0 %v7210_v33  ;;  %2296 = vmatpush1.bf16.msra.mxu1 %v7199_v37  ;;  %v7291_v33 = vld [vmem:[#allocation22 + $0x13c] ss:$48 sps:$4 sm:$0xff]   ;;  %v7306_v37 = vld [vmem:[#allocation22 + $0x24] ss:$48 sps:$4 sm:$0xff]  }
 0x350   :  { %2297 = vmatprep.subr.bf16.mxu1 %v7207_v39  ;;  %v7304_v39 = vld [vmem:[#allocation22 + $0x20] ss:$48 sps:$4 sm:$0xff]  }
 0x351   :  { %6077 = vmatmul.mubr.msk.bf16.vlgmr.msra.gmra.mrb[20].mxu0 %vm743_vm1, %v8802_v14 }
 0x352   :  { %2333 = vmatpush1.bf16.msra.mxu0 %v7208_v36  ;;  %2364 = vmatprep.mubr.bf16.mxu0 %v8336_v4  ;;  %v7289_v36 = vld [vmem:[#allocation22 + $0x138] ss:$48 sps:$4 sm:$0xff]  }
 0x353   :  { %2334 = vmatprep.subr.bf16.mxu0 %v7216_v38  ;;  %2298 = vmatpush1.bf16.msra.mxu1 %v7205_v41  ;;  %v7297_v38 = vld [vmem:[#allocation22 + $0x19c] ss:$48 sps:$4 sm:$0xff]   ;;  %v7312_v41 = vld [vmem:[#allocation22 + $0x84] ss:$48 sps:$4 sm:$0xff]  }
 0x354   :  { %2373 = vmatprep.subr.bf16.mxu1 %v7213_v43  ;;  %v7310_v43 = vld [vmem:[#allocation22 + $0x80] ss:$48 sps:$4 sm:$0xff]  }
 0x356   :  { %2335 = vmatpush1.bf16.msra.mxu0 %v7214_v40  ;;  %6078 = vmatmul.mubr.msk.bf16.vlgmr.msra.gmra.mrb[24].mxu1 %vm743_vm1, %v8802_v14  ;;  %v7295_v40 = vld [vmem:[#allocation22 + $0x198] ss:$48 sps:$4 sm:$0xff]  }
 0x357   :  { %2336 = vmatprep.subr.bf16.mxu0 %v7222_v42  ;;  %2374 = vmatpush1.bf16.msra.mxu1 %v7211_v45  ;;  %v7303_v42 = vld [vmem:[#allocation22 + $0x1fc] ss:$48 sps:$4 sm:$0xff]   ;;  %v7318_v45 = vld [vmem:[#allocation22 + $0xe4] ss:$48 sps:$4 sm:$0xff]  }
 0x358   :  { %2375 = vmatprep.subr.bf16.mxu1 %v7219_v47  ;;  %2405 = vmatprep.mubr.bf16.mxu1 %v8336_v4  ;;  %v7316_v47 = vld [vmem:[#allocation22 + $0xe0] ss:$48 sps:$4 sm:$0xff]  }
 0x35a   :  { %2337 = vmatpush1.bf16.msra.mxu0 %v7220_v44  ;;  %v7301_v44 = vld [vmem:[#allocation22 + $0x1f8] ss:$48 sps:$4 sm:$0xff]  }
 0x35b   :  { %2338 = vmatprep.subr.bf16.mxu0 %v7228_v46  ;;  %2376 = vmatpush1.bf16.msra.mxu1 %v7217_v49  ;;  %v7309_v46 = vld [vmem:[#allocation22 + $0x2c] ss:$48 sps:$4 sm:$0xff]   ;;  %v7307_v49 = vld [vmem:[#allocation22 + $0x28] ss:$48 sps:$4 sm:$0xff]  }
 0x35c   :  { %2377 = vmatprep.subr.bf16.mxu1 %v7225_v51 }
 0x35e   :  { %2339 = vmatpush1.bf16.msra.mxu0 %v7226_v48 }
 0x35f   :  { %2910 = vmatprep.subr.bf16.mxu0 %v7234_v50  ;;  %2378 = vmatpush1.bf16.msra.mxu1 %v7223_v53  ;;  %v7324_v50 = vld [vmem:[#allocation22 + $0x144] ss:$48 sps:$4 sm:$0xff]  }
 0x360   :  { %2379 = vmatprep.subr.bf16.mxu1 %v7231_v55  ;;  %v7322_v55 = vld [vmem:[#allocation22 + $0x140] ss:$48 sps:$4 sm:$0xff]  }
 0x361   :  { %6079 = vmatmul.mubr.msk.bf16.vlgmr.msra.gmra.mrb[24].mxu0 %vm743_vm1, %v8802_v14 }
 0x362   :  { %2911 = vmatpush1.bf16.msra.mxu0 %v7232_v52  ;;  %2942 = vmatprep.mubr.bf16.mxu0 %v8336_v4  ;;  %v7315_v52 = vld [vmem:[#allocation22 + $0x8c] ss:$48 sps:$4 sm:$0xff]  }
 0x363   :  { %2912 = vmatprep.subr.bf16.mxu0 %v7240_v54  ;;  %2380 = vmatpush1.bf16.msra.mxu1 %v7229_v57  ;;  %v7330_v57 = vld [vmem:[#allocation22 + $0x1a4] ss:$48 sps:$4 sm:$0xff]  }
 0x364   :  { %2951 = vmatprep.subr.bf16.mxu1 %v7237_v59  ;;  %v7328_v59 = vld [vmem:[#allocation22 + $0x1a0] ss:$48 sps:$4 sm:$0xff]  }
 0x366   :  { %2913 = vmatpush1.bf16.msra.mxu0 %v7238_v56  ;;  %6080 = vmatmul.mubr.msk.bf16.vlgmr.msra.gmra.mrb[28].mxu1 %vm743_vm1, %v8802_v14  ;;  %v7268_v14 = vld [vmem:[#allocation22 + $0x10] ss:$48 sps:$4 sm:$0xff]   ;;  %v7313_v56 = vld [vmem:[#allocation22 + $0x88] ss:$48 sps:$4 sm:$0xff]  }
 0x367   :  { %2914 = vmatprep.subr.bf16.mxu0 %v7246_v58  ;;  %2952 = vmatpush1.bf16.msra.mxu1 %v7235_v61  ;;  %v7321_v58 = vld [vmem:[#allocation22 + $0xec] ss:$48 sps:$4 sm:$0xff]   ;;  %v7319_v61 = vld [vmem:[#allocation22 + $0xe8] ss:$48 sps:$4 sm:$0xff]  }
 0x368   :  { %2953 = vmatprep.subr.bf16.mxu1 %v7243_v63  ;;  %2983 = vmatprep.mubr.bf16.mxu1 %v8336_v4  ;;  %v7327_v63 = vld [vmem:[#allocation22 + $0x14c] ss:$48 sps:$4 sm:$0xff]  }
 0x36a   :  { %2915 = vmatpush1.bf16.msra.mxu0 %v7244_v60  ;;  %v5913_v60 = vld [vmem:[#allocation9] ss:$0 sm:$0xff] }
 0x36b   :  { %2916 = vmatprep.subr.bf16.mxu0 %v7252_v62  ;;  %2954 = vmatpush1.bf16.msra.mxu1 %v7241_v1  ;;  %v7336_v62 = vld [vmem:[#allocation22 + $0x204] ss:$48 sps:$4 sm:$0xff]   ;;  %v7334_v1 = vld [vmem:[#allocation22 + $0x200] ss:$48 sps:$4 sm:$0xff]  }
 0x36c   :  { %2955 = vmatprep.subr.bf16.mxu1 %v7249_v5 }
 0x36e   :  { %2917 = vmatpush1.bf16.msra.mxu0 %v7250_v0  ;;  %v5902_v0 = vld [vmem:[%s9467_s10] ss:$0 sm:$0xff] }
 0x36f   :  { %2918 = vmatprep.subr.bf16.mxu0 %v7258_v2  ;;  %2956 = vmatpush1.bf16.msra.mxu1 %v7247_v7  ;;  %v7325_v2 = vld [vmem:[#allocation22 + $0x148] ss:$48 sps:$4 sm:$0xff]  }
 0x370   :  { %2957 = vmatprep.subr.bf16.mxu1 %v7255_v9 }
 0x372   :  { %2919 = vmatpush1.bf16.msra.mxu0 %v7256_v6  ;;  %v7333_v6 = vld [vmem:[#allocation22 + $0x1ac] ss:$48 sps:$4 sm:$0xff]  }
 0x373   :  { %2920 = vmatprep.subr.bf16.mxu0 %v7264_v8  ;;  %2958 = vmatpush1.bf16.msra.mxu1 %v7253_v11  ;;  %v5911_v8 = vld [vmem:[#allocation5] ss:$0 sm:$0xff]  ;;  %v7331_v11 = vld [vmem:[#allocation22 + $0x1a8] ss:$48 sps:$4 sm:$0xff]  }
 0x374   :  { %2959 = vmatprep.subr.bf16.mxu1 %v7261_v13 }
 0x376   :  { %2921 = vmatpush1.bf16.msra.mxu0 %v7262_v10 }
 0x377   :  { %2992 = vmatprep.subr.bf16.mxu0 %v7270_v12  ;;  %2960 = vmatpush1.bf16.msra.mxu1 %v7259_v15 }
 0x378   :  { %2961 = vmatprep.subr.bf16.mxu1 %v7267_v17  ;;  %v5919_v17 = vld [vmem:[#allocation10] ss:$0 sm:$0xff] }
 0x379   :  { %6153 = vmatmul.mubr.msk.bf16.vlgmr.msra.gmra.mrb[28].mxu0 %vm861_vm2, %v8828_v34 }
 0x37a   :  { %2993 = vmatpush1.bf16.msra.mxu0 %v7268_v14  ;;  %3024 = vmatprep.mubr.bf16.mxu0 %v8336_v4  ;;  %v7339_v14 = vld [vmem:[#allocation22 + $0x20c] ss:$48 sps:$4 sm:$0xff]  }
 0x37b   :  { %2994 = vmatprep.subr.bf16.mxu0 %v7276_v16  ;;  %2962 = vmatpush1.bf16.msra.mxu1 %v7265_v19  ;;  %v5921_v19 = vld [vmem:[#allocation13] ss:$0 sm:$0xff] }
 0x37c   :  { %3033 = vmatprep.subr.bf16.mxu1 %v7273_v21 }
 0x37e   :  { %2995 = vmatpush1.bf16.msra.mxu0 %v7274_v18  ;;  %6154 = vmatmul.mubr.msk.bf16.vlgmr.msra.gmra.mrb[32].mxu1 %vm861_vm2, %v8828_v34 }
 0x37f   :  { %2996 = vmatprep.subr.bf16.mxu0 %v7282_v20  ;;  %3034 = vmatpush1.bf16.msra.mxu1 %v7271_v25  ;;  %v7337_v20 = vld [vmem:[#allocation22 + $0x208] ss:$48 sps:$4 sm:$0xff]   ;;  %v5929_v25 = vld [vmem:[#allocation15] ss:$0 sm:$0xff] }
 0x380   :  { %3035 = vmatprep.subr.bf16.mxu1 %v7279_v24  ;;  %3065 = vmatprep.mubr.bf16.mxu1 %v8336_v4 }
 0x382   :  { %2997 = vmatpush1.bf16.msra.mxu0 %v7280_v22 }
 0x383   :  { %2998 = vmatprep.subr.bf16.mxu0 %v7288_v23  ;;  %3036 = vmatpush1.bf16.msra.mxu1 %v7277_v27 }
 0x384   :  { %3037 = vmatprep.subr.bf16.mxu1 %v7285_v29 }
 0x386   :  { %2999 = vmatpush1.bf16.msra.mxu0 %v7286_v26 }
 0x387   :  { %3000 = vmatprep.subr.bf16.mxu0 %v7294_v28  ;;  %3038 = vmatpush1.bf16.msra.mxu1 %v7283_v31 }
 0x388   :  { %3039 = vmatprep.subr.bf16.mxu1 %v7291_v33 }
 0x38a   :  { %3001 = vmatpush1.bf16.msra.mxu0 %v7292_v30  ;;  %v9416_v30 = vlaneseq }
 0x38b   :  { %3002 = vmatprep.subr.bf16.mxu0 %v7300_v32  ;;  %3040 = vmatpush1.bf16.msra.mxu1 %v7289_v36 }
 0x38c   :  { %3041 = vmatprep.subr.bf16.mxu1 %v7297_v38 }
 0x38e   :  { %3003 = vmatpush1.bf16.msra.mxu0 %v7298_v35  ;;  %v8885_v35 = vshrl.u32 %v9416_v30, 7 }
 0x38f   :  { %3074 = vmatprep.subr.bf16.mxu0 %v7306_v37  ;;  %3042 = vmatpush1.bf16.msra.mxu1 %v7295_v40 }
 0x390   :  { %3043 = vmatprep.subr.bf16.mxu1 %v7303_v42  ;;  %v8890_v38 = vsub.s32 6, %v8885_v35  ;;  %v8898_v40 = vsub.s32 2, %v8885_v35  ;;  %v8902_v42 = vld [vmem:[#allocation18 + $0x8] sm:$0xf] }
 0x391   :  { %6155 = vmatmul.mubr.msk.bf16.vlgmr.msra.gmra.mrb[32].mxu0 %vm861_vm2, %v8828_v34  ;;  %v781_v48 = vpop.f32.mrb[0].mxu1 }
 0x392   :  { %3075 = vmatpush1.bf16.msra.mxu0 %v7304_v39  ;;  %3106 = vmatprep.mubr.bf16.mxu0 %v8336_v4  ;;  %v6735_v51 = vpop.f32.mrb[1].mxu1  ;;  %v782_v5 = vadd.f32 %v5913_v60, %v781_v48  ;;  %v8893_v39 = vsub.s32 7, %v8885_v35  ;;  %v7343_v48 = vld [vmem:[#allocation25] sm:$0xff]   ;;  %v7347_v60 = vld [vmem:[#allocation25 + $0x8] sm:$0xff]  }
 0x393   :  { %3076 = vmatprep.subr.bf16.mxu0 %v7312_v41  ;;  %v784_v53 = vpop.f32.mrb[2].mxu1  ;;  %3044 = vmatpush1.bf16.msra.mxu1 %v7301_v44  ;;  %v1073_v51 = vrot.slane %v8902_v42, %v8898_v40 }
 0x394   :  { %v6736_v54 = vpop.f32.mrb[3].mxu1  ;;  %3115 = vmatprep.subr.bf16.mxu1 %v7309_v46  ;;  %v787_v12 = vmax.f32 %v782_v5, 0.0  ;;  %v7341_v46 = vld [vmem:[#allocation25 + $0x40] sm:$0xff]   ;;  %v7345_v53 = vld [vmem:[#allocation25 + $0x48] sm:$0xff]   ;;  %v7352_v5 = vld [vmem:[#allocation25 + $0xd8] sm:$0xff]  }
 0x395   :  { %v8910_v54 = vld [vmem:[#allocation21] sm:$0xff] }
 0x396   :  { %3077 = vmatpush1.bf16.msra.mxu0 %v7310_v43  ;;  %6156 = vmatmul.mubr.msk.bf16.vlgmr.msra.gmra.mrb[36].mxu1 %vm861_vm2, %v8828_v34  ;;  %v795_v22 = vmul.f32 %v5919_v17, %v787_v12  ;;  %v7340_v43 = vld [vmem:[#allocation25 + $0xc0] sm:$0xff]  }
 0x397   :  { %3078 = vmatprep.subr.bf16.mxu0 %v7318_v45  ;;  %3116 = vmatpush1.bf16.msra.mxu1 %v7307_v49  ;;  %v7358_v12 = vld [vmem:[#allocation25 + $0xa0] sm:$0xff]  }
 0x398   :  { %3117 = vmatprep.subr.bf16.mxu1 %v7315_v52  ;;  %3147 = vmatprep.mubr.bf16.mxu1 %v8336_v4  ;;  %v7344_v52 = vld [vmem:[#allocation25 + $0xc8] sm:$0xff]  }
 0x39a   :  { %3079 = vmatpush1.bf16.msra.mxu0 %v7316_v47  ;;  %v7342_v47 = vld [vmem:[#allocation25 + $0x80] sm:$0xff]  }
 0x39b   :  { %3080 = vmatprep.subr.bf16.mxu0 %v7324_v50  ;;  %3118 = vmatpush1.bf16.msra.mxu1 %v7313_v56  ;;  %v1899_v56 = vrot.slane %v8910_v54, %v8893_v39 }
 0x39c   :  { %3119 = vmatprep.subr.bf16.mxu1 %v7321_v58  ;;  %v7346_v58 = vld [vmem:[#allocation25 + $0x88] sm:$0xff]  }
 0x39e   :  { %3081 = vmatpush1.bf16.msra.mxu0 %v7322_v55  ;;  %v1895_v55 = vrot.slane %v8910_v54, %v8890_v38 }
 0x39f   :  { %3082 = vmatprep.subr.bf16.mxu0 %v7330_v57  ;;  %3120 = vmatpush1.bf16.msra.mxu1 %v7319_v61  ;;  %v8916_v57 = vld [vmem:[#allocation21 + $0x8] sm:$0xf] }
 0x3a0   :  { %3121 = vmatprep.subr.bf16.mxu1 %v7327_v63  ;;  %v7348_v61 = vld [vmem:[#allocation25 + $0xd0] sm:$0xff]  }
 0x3a1   :  { %v8920_v63 = vld [vmem:[#allocation24] sm:$0xff] }
 0x3a2   :  { %3083 = vmatpush1.bf16.msra.mxu0 %v7328_v59  ;;  %v1911_v59 = vrot.slane %v8916_v57, %v8898_v40 }
 0x3a3   :  { %3084 = vmatprep.subr.bf16.mxu0 %v7336_v62  ;;  %3122 = vmatpush1.bf16.msra.mxu1 %v7325_v2  ;;  %v7349_v62 = vld [vmem:[#allocation25 + $0x50] sm:$0xff]  }
 0x3a4   :  { %v679_v7 = vpop.f32.mrb[0].mxu0  ;;  %3123 = vmatprep.subr.bf16.mxu1 %v7333_v6  ;;  %v7351_v2 = vld [vmem:[#allocation25 + $0x10] sm:$0xff]   ;;  %v7353_v6 = vld [vmem:[#allocation25 + $0x58] sm:$0xff]  }
 0x3a5   :  { %v680_v9 = vadd.f32 %v5902_v0, %v679_v7  ;;  %v6723_v10 = vpop.f32.mrb[1].mxu0  ;;  %v8923_v0 = vsub.s32 4, %v8885_v35  ;;  %v7354_v7 = vld [vmem:[#allocation25 + $0x98] sm:$0xff]  }
 0x3a6   :  { %v682_v13 = vpop.f32.mrb[2].mxu0  ;;  %3085 = vmatpush1.bf16.msra.mxu0 %v7334_v1  ;;  %v7350_v1 = vld [vmem:[#allocation25 + $0x90] sm:$0xff]   ;;  %v7356_v10 = vld [vmem:[#allocation25 + $0xe0] sm:$0xff]  }
 0x3a7   :  { %v685_v15 = vmax.f32 %v680_v9, 0.0  ;;  %v6724_v16 = vpop.f32.mrb[3].mxu0  ;;  %3124 = vmatpush1.bf16.msra.mxu1 %v7331_v11  ;;  %6413 = vmatprep.subr.bf16.mxu0 %v7341_v46  ;;  %v7355_v9 = vld [vmem:[#allocation25 + $0x18] sm:$0xff]   ;;  %v7357_v11 = vld [vmem:[#allocation25 + $0x60] sm:$0xff]   ;;  %v7364_v46 = vld [vmem:[#allocation25 + $0xf0] sm:$0xff]  }
 0x3a8   :  { %3125 = vmatprep.subr.bf16.mxu1 %v7339_v14  ;;  %v7359_v13 = vld [vmem:[#allocation25 + $0x20] sm:$0xff]   ;;  %v2517_v16 = vrot.slane %v8920_v63, %v8890_v38 }
 0x3a9   :  { %v693_v18 = vmul.f32 %v5911_v8, %v685_v15  ;;  %6157 = vmatmul.mubr.msk.bf16.vlgmr.msra.gmra.mrb[36].mxu0 %vm861_vm2, %v8828_v34  ;;  %v899_v21 = vpop.f32.mrb[4].mxu1  ;;  %v2509_v8 = vrot.slane %v8920_v63, %v8923_v0 }
 0x3aa   :  { %v900_v23 = vadd.f32 %v5921_v19, %v899_v21  ;;  %v6751_v24 = vpop.f32.mrb[5].mxu1  ;;  %6414 = vmatpush3.bf16.msra.mxu0 %v7343_v48  ;;  %v8949_v48 = vsub.s32 3, %v8885_v35 }
 0x3ab   :  { %694 = vadd.xlane.f32.xlu0 %v693_v18  ;;  %v902_v26 = vpop.f32.mrb[6].mxu1  ;;  %3126 = vmatpush1.bf16.msra.mxu1 %v7337_v20  ;;  %v8934_v18 = vsub.s32 5, %v8885_v35  ;;  %v2521_v24 = vrot.slane %v8920_v63, %v8893_v39 }
 0x3ac   :  { %v905_v27 = vmax.f32 %v900_v23, 0.0  ;;  %v6752_v28 = vpop.f32.mrb[7].mxu1  ;;  %6435 = vmatprep.subr.bf16.mxu1 %v7340_v43  ;;  %6415 = vmatprep.subr.bf16.mxu0 %v7345_v53 }
 0x3ad   :  { %v2513_v23 = vrot.slane %v8920_v63, %v8934_v18  ;;  %v7361_v28 = vld [vmem:[#allocation25 + $0x68] sm:$0xff]  }
 0x3ae   :  { %v913_v29 = vmul.f32 %v5929_v25, %v905_v27  ;;  %6158 = vmatmul.mubr.msk.bf16.vlgmr.msra.gmra.mrb[40].mxu1 %vm861_vm2, %v8828_v34  ;;  %v8895_v34 = vld [vmem:[#allocation18] sm:$0xff]  ;;  %6416 = vmatpush3.bf16.msra.mxu0 %v7347_v60  ;;  %v7360_v25 = vld [vmem:[#allocation25 + $0xe8] sm:$0xff]  }
 0x3af   :  { %796 = vadd.xlane.f32.xlu0 %v795_v22  ;;  %v1057_v45 = vrot.slane %v8895_v34, %v8890_v38  ;;  %v1061_v50 = vrot.slane %v8895_v34, %v8893_v39  ;;  %6436 = vmatpush3.bf16.msra.mxu1 %v7342_v47  ;;  %v9039_v39 = vsub.s32 1, %v8885_v35 }
 0x3b0   :  { %914 = vadd.xlane.f32.xlu1 %v913_v29  ;;  %6437 = vmatprep.subr.bf16.mxu1 %v7344_v52  ;;  %v7362_v29 = vld [vmem:[#allocation25 + $0xa8] sm:$0xff]  }
 0x3b1   :  { %6417 = vmatprep.subr.bf16.mxu0 %v7349_v62 }
 0x3b2   :  { %6418 = vmatpush3.bf16.msra.mxu0 %v7351_v2 }
 0x3b3   :  { %6438 = vmatpush3.bf16.msra.mxu1 %v7346_v58  ;;  %6419 = vmatprep.subr.bf16.mxu0 %v7353_v6 }
 0x3b4   :  { %6439 = vmatprep.subr.bf16.mxu1 %v7348_v61 }
 0x3b6   :  { %6420 = vmatpush3.bf16.msra.mxu0 %v7355_v9 }
 0x3b7   :  { %6440 = vmatpush3.bf16.msra.mxu1 %v7350_v1  ;;  %6421 = vmatprep.subr.bf16.mxu0 %v7357_v11 }
 0x3b8   :  { %6441 = vmatprep.subr.bf16.mxu1 %v7352_v5 }
 0x3ba   :  { %6422 = vmatpush3.bf16.msra.mxu0 %v7359_v13 }
 0x3bb   :  { %6442 = vmatpush3.bf16.msra.mxu1 %v7354_v7  ;;  %6423 = vmatprep.subr.bf16.mxu0 %v7361_v28 }
 0x3bc   :  { %6443 = vmatprep.subr.bf16.mxu1 %v7356_v10 }
 0x3bf   :  { %6444 = vmatpush3.bf16.msra.mxu1 %v7358_v12 }
 0x3c0   :  { %6445 = vmatprep.subr.bf16.mxu1 %v7360_v25 }
 0x3c3   :  { %6446 = vmatpush3.bf16.msra.mxu1 %v7362_v29 }
 0x3c4   :  { %v8880_v31 = vpop.f32.mrb[4].mxu0  ;;  %6447 = vmatprep.subr.bf16.mxu1 %v7364_v46  ;;  %v1915_v46 = vrot.slane %v8916_v57, %v8949_v48 }
 0x3c5   :  { %v8882_v32 = vpop.f32.mrb[5].mxu0 }
 0x3c6   :  { %v1608_v33 = vpop.f32.mrb[6].mxu0 }
 0x3c7   :  { %v1609_v36 = vpop.f32.mrb[7].mxu0  ;;  %v7363_v33 = vld [vmem:[#allocation25 + $0x28] sm:$0xff]  }
 0x3c8   :  { %6424 = vmatpush3.bf16.msra.mxu0 %v7363_v33 }
 0x3c9   :  { %v8887_v37 = vpop.f32.mrb[8].mxu1 }
 0x3ca   :  { %v8900_v41 = vpop.f32.mrb[9].mxu1 }
 0x3cb   :  { %v1649_v44 = vpop.f32.mrb[10].mxu1 }
 0x3cc   :  { %v1650_v49 = vpop.f32.mrb[11].mxu1 }
 0x3cd   :  { %v1077_v49 = vrot.slane %v8902_v42, %v8949_v48 }
 0x3e4   :  { %v8927_v14 = vpop.f32.mrb[8].mxu0 }
 0x3e5   :  { %v8929_v15 = vpop.f32.mrb[9].mxu0 }
 0x3e6   :  { %v1690_v17 = vpop.f32.mrb[10].mxu0 }
 0x3e7   :  { %v1691_v19 = vpop.f32.mrb[11].mxu0 }
 0x3e9   :  { %v1727_v20 = vpop.f32.mrb[12].mxu1 }
 0x3ea   :  { %v8936_v21 = vadd.f32 %v1727_v20, %v1057_v45  ;;  %v1729_v22 = vpop.f32.mrb[13].mxu1 }
 0x3eb   :  { %v8942_v26 = vadd.f32 %v1729_v22, %v1061_v50  ;;  %v1731_v27 = vpop.f32.mrb[14].mxu1 }
 0x3ec   :  { %v1732_v36 = vpop.f32.mrb[15].mxu1 }
 0x404   :  { %v8944_v43 = vpop.f32.mrb[12].mxu0 }
 0x405   :  { %v8946_v44 = vpop.f32.mrb[13].mxu0 }
 0x406   :  { %v1772_v45 = vpop.f32.mrb[14].mxu0 }
 0x407   :  { %v1773_v47 = vpop.f32.mrb[15].mxu0 }
 0x408   :  { %v5920_v47 = vld [vmem:[#allocation3] ss:$0 sm:$0xff] }
 0x409   :  { %v1809_v50 = vpop.f32.mrb[16].mxu1 }
 0x40a   :  { %v8956_v52 = vadd.f32 %v1809_v50, %v1073_v51  ;;  %v1811_v53 = vpop.f32.mrb[17].mxu1 }
 0x40b   :  { %v8958_v58 = vadd.f32 %v1811_v53, %v1077_v49  ;;  %v1813_v60 = vpop.f32.mrb[18].mxu1 }
 0x40c   :  { %9468 = vst [vmem:[#allocation93_spill] sm:$0xff] %v8956_v52  ;;  %v1814_v61 = vpop.f32.mrb[19].mxu1  ;;  %v5930_v60 = vld [vmem:[#allocation4] ss:$0 sm:$0xff] }
 0x414   :  { %v8960_v62 = vpop.f32.mrb[16].mxu0 }
 0x415   :  { %v8962_v1 = vpop.f32.mrb[17].mxu0 }
 0x416   :  { %v2206_v2 = vpop.f32.mrb[18].mxu0 }
 0x417   :  { %v2207_v5 = vpop.f32.mrb[19].mxu0 }
 0x419   :  { %v8964_v6 = vpop.f32.mrb[20].mxu1 }
 0x41a   :  { %v8966_v7 = vpop.f32.mrb[21].mxu1 }
 0x41b   :  { %v2247_v9 = vpop.f32.mrb[22].mxu1 }
 0x41c   :  { %v2248_v10 = vpop.f32.mrb[23].mxu1 }
 0x424   :  { %v8968_v11 = vpop.f32.mrb[20].mxu0 }
 0x425   :  { %v8970_v51 = vpop.f32.mrb[21].mxu0 }
 0x426   :  { %v2288_v12 = vpop.f32.mrb[22].mxu0 }
 0x427   :  { %v2289_v13 = vpop.f32.mrb[23].mxu0 }
 0x429   :  { %v2325_v17 = vpop.f32.mrb[24].mxu1 }
 0x42a   :  { %v8975_v19 = vadd.f32 %v2325_v17, %v1895_v55  ;;  %v2327_v20 = vpop.f32.mrb[25].mxu1  ;;  %v5912_v55 = vld [vmem:[#allocation2] ss:$0 sm:$0xff] }
 0x42b   :  { %v8980_v22 = vadd.f32 %v2327_v20, %v1899_v56  ;;  %v2329_v25 = vpop.f32.mrb[26].mxu1  ;;  %v7365_v20 = vld [vmem:[#allocation25 + $0x70] sm:$0xff]  }
 0x42c   :  { %v2330_v27 = vpop.f32.mrb[27].mxu1  ;;  %v7366_v25 = vld [vmem:[#allocation25 + $0xb0] sm:$0xff]   ;;  %6425 = vmatprep.subr.bf16.mxu0 %v7365_v20 }
 0x42d   :  { %v7367_v27 = vld [vmem:[#allocation25 + $0x30] sm:$0xff]   ;;  %6448 = vmatpush3.bf16.msra.mxu1 %v7366_v25 }
 0x42e   :  { %6426 = vmatpush3.bf16.msra.mxu0 %v7367_v27 }
 0x434   :  { %v8982_v28 = vpop.f32.mrb[24].mxu0 }
 0x435   :  { %v8984_v29 = vpop.f32.mrb[25].mxu0 }
 0x436   :  { %v2370_v33 = vpop.f32.mrb[26].mxu0 }
 0x437   :  { %v2371_v36 = vpop.f32.mrb[27].mxu0 }
 0x438   :  { %v695_v45 = vpop.xlane.xlu0 %694  ;;  %v7368_v36 = vld [vmem:[#allocation25 + $0xf8] sm:$0xff]  }
 0x439   :  { %v2407_v50 = vpop.f32.mrb[28].mxu1  ;;  %v703_v5 = vadd.f32 %v5912_v55, %v695_v45  ;;  %v8338_v45 = vmov 2.0   ;;  %v7369_v55 = vld [vmem:[#allocation25 + $0x78] sm:$0xff]   ;;  %6449 = vmatprep.subr.bf16.mxu1 %v7368_v36 }
 0x43a   :  { %v8991_v56 = vadd.f32 %v2407_v50, %v1911_v59  ;;  %v2409_v53 = vpop.f32.mrb[29].mxu1  ;;  %6427 = vmatprep.subr.bf16.mxu0 %v7369_v55 }
 0x43b   :  { %v8993_v61 = vadd.f32 %v2409_v53, %v1915_v46  ;;  %v2411_v2 = vpop.f32.mrb[30].mxu1 }
 0x43c   :  { %v797_v49 = vpop.xlane.xlu0 %796  ;;  %v2412_v10 = vpop.f32.mrb[31].mxu1 }
 0x43d   :  { %v805_v9 = vadd.f32 %v5920_v47, %v797_v49  ;;  %v915_v12 = vpop.xlane.xlu1 %914  ;;  %v7370_v47 = vld [vmem:[#allocation25 + $0xb8] sm:$0xff]  }
 0x43e   :  { %v923_v13 = vadd.f32 %v5930_v60, %v915_v12  ;;  %v7371_v49 = vld [vmem:[#allocation25 + $0x38] sm:$0xff]   ;;  %6450 = vmatpush3.bf16.msra.mxu1 %v7370_v47  ;;  %v7372_v60 = vld [vmem:[#allocation28 + $0x40] sm:$0xff]  }
 0x43f   :  { %vm924_vm3 = vcmp.ge.f32.partialorder %v703_v5, %v805_v9  ;;  %6428 = vmatpush3.bf16.msra.mxu0 %v7371_v49  ;;  %6466 = vmatprep.subr.bf16.mxu1 %v7372_v60  ;;  %v2487_v60 = vld [vmem:[#allocation24 + $0x8] sm:$0xf] }
 0x440   :  { %vm925_vm4 = vcmp.ge.f32.partialorder %v703_v5, %v923_v13  ;;  %vm928_vm6 = vcmp.ge.f32.partialorder %v805_v9, %v923_v13  ;;  %6753 = vmatprep.subr.bf16.mxu0 %v9417_v3 }
 0x441   :  { %vm8995_vm5 = vmand %vm924_vm3, %vm925_vm4 }
 0x442   :  { %v3156_v59 = vsel %vm8995_vm5, 1, %v8336_v4  ;;  %vm927_vm8 = vmxor %vm8995_vm5, %vm8337_vm7 }
 0x443   :  { %3158 = vperm.xlu0 %6997, %v3156_v59   ;;  %vm929_vm9 = vmand %vm927_vm8, %vm928_vm6 }
 0x444   :  { %v3161_v33 = vsel %vm929_vm9, 1, %v8336_v4  ;;  %v5822_v46 = vsel %vm929_vm9, 1.0, %v8338_v45 }
 0x445   :  { %3163 = vperm.xlu1 %6996, %v3161_v33   ;;  %v5823_v50 = vsel %vm8995_vm5, 0.0, %v5822_v46 }
 0x449   :  { %5829 = vperm.xlu1 %6996, %v5823_v50  }
 0x44c   :  { %v9007_v53 = vpop.f32.mrb[28].mxu0 }
 0x44d   :  { %v9009_v4 = vpop.f32.mrb[29].mxu0 }
 0x44e   :  { %v2948_v2 = vpop.f32.mrb[30].mxu0 }
 0x44f   :  { %v2949_v5 = vpop.f32.mrb[31].mxu0 }
 0x450   :  { %v2533_v5 = vrot.slane %v2487_v60, %v8898_v40 }
 0x451   :  { %v2985_v9 = vpop.f32.mrb[32].mxu1 }
 0x452   :  { %v2987_v10 = vpop.f32.mrb[33].mxu1 }
 0x453   :  { %v2989_v12 = vpop.f32.mrb[34].mxu1 }
 0x454   :  { %v2990_v13 = vpop.f32.mrb[35].mxu1 }
 0x464   :  { %v3026_v20 = vpop.f32.mrb[32].mxu0 }
 0x465   :  { %v9015_v17 = vadd.f32 %v3026_v20, %v2509_v8  ;;  %v3028_v25 = vpop.f32.mrb[33].mxu0 }
 0x466   :  { %v9020_v59 = vadd.f32 %v3028_v25, %v2513_v23  ;;  %v3030_v27 = vpop.f32.mrb[34].mxu0  ;;  %v9036_v25 = vsub.s32 0, %v8885_v35  ;;  %v1049_v35 = vrot.slane %v8895_v34, %v8923_v0 }
 0x467   :  { %v3031_v33 = vpop.f32.mrb[35].mxu0  ;;  %v1037_v27 = vrot.slane %v8895_v34, %v9039_v39 }
 0x468   :  { %v1041_v33 = vrot.slane %v8895_v34, %v8898_v40  ;;  %v2525_v30 = vrot.slane %v2487_v60, %v9036_v25 }
 0x469   :  { %v3067_v36 = vpop.f32.mrb[36].mxu1 }
 0x46a   :  { %v9025_v45 = vadd.f32 %v3067_v36, %v2517_v16  ;;  %v3069_v46 = vpop.f32.mrb[37].mxu1  ;;  %v1045_v36 = vrot.slane %v8895_v34, %v8949_v48 }
 0x46b   :  { %v9030_v8 = vadd.f32 %v3069_v46, %v2521_v24  ;;  %v3071_v55 = vpop.f32.mrb[38].mxu1  ;;  %v1033_v24 = vrot.slane %v8895_v34, %v9036_v25 }
 0x46c   :  { %9471 = vst [vmem:[#allocation94_spill] sm:$0xff] %v9025_v45  ;;  %v3072_v47 = vpop.f32.mrb[39].mxu1  ;;  %v1607_v55 = vadd.f32 %v8882_v32, %v1037_v27  ;;  %v1879_v32 = vrot.slane %v8910_v54, %v8898_v40  ;;  %v1887_v27 = vrot.slane %v8910_v54, %v8923_v0  ;;  %v2537_v0 = vrot.slane %v2487_v60, %v8949_v48 }
 0x46d   :  { %v1605_v46 = vadd.f32 %v8880_v31, %v1033_v24  ;;  %v1646_v47 = vadd.f32 %v8887_v37, %v1041_v33  ;;  %v2493_v37 = vrot.slane %v8920_v63, %v9036_v25  ;;  %v1883_v24 = vrot.slane %v8910_v54, %v8949_v48 }
 0x46e   :  { %v1891_v33 = vrot.slane %v8910_v54, %v8934_v18  ;;  %v2529_v31 = vrot.slane %v2487_v60, %v9039_v39  ;;  %v2244_v45 = vadd.f32 %v8964_v6, %v1879_v32  ;;  %v7374_v32 = vld [vmem:[#allocation28 + $0x48] sm:$0xff]  }
 0x47c   :  { %v3108_v49 = vpop.f32.mrb[36].mxu0 }
 0x47d   :  { %v3110_v50 = vpop.f32.mrb[37].mxu0 }
 0x47e   :  { %v3112_v23 = vpop.f32.mrb[38].mxu0 }
 0x47f   :  { %v3113_v2 = vpop.f32.mrb[39].mxu0  ;;  %v1871_v23 = vrot.slane %v8910_v54, %v9036_v25 }
 0x480   :  { %v1875_v2 = vrot.slane %v8910_v54, %v9039_v39  ;;  %v2945_v54 = vadd.f32 %v9007_v53, %v2493_v37 }
 0x481   :  { %v3149_v12 = vpop.f32.mrb[40].mxu1 }
 0x482   :  { %v9033_v13 = vadd.f32 %v3149_v12, %v2533_v5  ;;  %v3151_v38 = vpop.f32.mrb[41].mxu1  ;;  %v1648_v5 = vadd.f32 %v8900_v41, %v1045_v36  ;;  %v1053_v12 = vrot.slane %v8895_v34, %v8934_v18  ;;  %v2505_v41 = vrot.slane %v8920_v63, %v8949_v48 }
 0x483   :  { %v3153_v16 = vpop.f32.mrb[42].mxu1  ;;  %v1903_v36 = vrot.slane %v8916_v57, %v9036_v25  ;;  %v2203_v34 = vadd.f32 %v8960_v62, %v1871_v23  ;;  %v2285_v62 = vadd.f32 %v8968_v11, %v1887_v27  ;;  %v2287_v23 = vadd.f32 %v8970_v51, %v1891_v33  ;;  %v7376_v33 = vld [vmem:[#allocation28 + $0x50] sm:$0xff]  }
 0x484   :  { %v3154_v20 = vpop.f32.mrb[43].mxu1  ;;  %v2501_v16 = vrot.slane %v8920_v63, %v8898_v40  ;;  %v1687_v40 = vadd.f32 %v8927_v14, %v1049_v35  ;;  %v1689_v3 = vadd.f32 %v8929_v15, %v1053_v12  ;;  %v2988_v35 = vadd.f32 %v2987_v10, %v2505_v41  ;;  %v7373_v12 = vld [vmem:[#allocation28] sm:$0xff]   ;;  %v7375_v41 = vld [vmem:[#allocation28 + $0x8] sm:$0xff]  }
 0x485   :  { %v2497_v20 = vrot.slane %v8920_v63, %v9039_v39  ;;  %v1907_v63 = vrot.slane %v8916_v57, %v9039_v39  ;;  %v2205_v57 = vadd.f32 %v8962_v1, %v1875_v2  ;;  %v2246_v15 = vadd.f32 %v8966_v7, %v1883_v24  ;;  %v7405_v24 = vld [vmem:[%s9472_s19 + $0x8] sm:$0xff]  }
 0x486   :  { %v2986_v18 = vadd.f32 %v2985_v9, %v2501_v16  ;;  %v2367_v48 = vadd.f32 %v8982_v28, %v1903_v36  ;;  %v9102_v9 = vadd.f32 %v3108_v49, %v2525_v30  ;;  %v3111_v10 = vadd.f32 %v3110_v50, %v2529_v31  ;;  %v7404_v31 = vld [vmem:[%s9472_s19] sm:$0xff]  }
 0x487   :  { %v2947_v14 = vadd.f32 %v9009_v4, %v2497_v20  ;;  %v2369_v53 = vadd.f32 %v8984_v29, %v1907_v63  ;;  %v9107_v1 = vadd.f32 %v3151_v38, %v2537_v0  ;;  %v9473_v63 = vrot.slane %v8902_v42, %v9036_v25 }
 0x489   :  { %v1769_v0 = vadd.f32 %v8944_v43, %v9473_v63  ;;  %v7410_v63 = vld [vmem:[%s9472_s19 + $0x30] sm:$0xff]  }
 0x4c2   :  { %v9093_v52 = vpop.permute.xlu0 %3158 }
 0x4c3   :  { %vm3160_vm10 = vcmp.eq.s32.totalorder %v9093_v52, 1  ;;  %v7386_v52 = vld [vmem:[#allocation28 + $0x78] sm:$0xff]  }
 0x4c4   :  { %v9104_v4 = vpop.permute.xlu1 %3163 }
 0x4c5   :  { %vm3165_vm11 = vcmp.eq.s32.totalorder %v9104_v4, 1  ;;  %v7384_v4 = vld [vmem:[#allocation28 + $0x70] sm:$0xff]  }
 0x4c6   :  { %v3167_v6 = vsel %vm3165_vm11, %v2205_v57, %v2947_v14  ;;  %v3169_v7 = vsel %vm3165_vm11, %v2246_v15, %v2988_v35  ;;  %v3166_v30 = vsel %vm3165_vm11, %v2203_v34, %v2945_v54  ;;  %v3168_v11 = vsel %vm3165_vm11, %v2244_v45, %v2986_v18  ;;  %v7378_v57 = vld [vmem:[#allocation28 + $0x58] sm:$0xff]  }
 0x4c7   :  { %v3171_v51 = vsel %vm3160_vm10, %v1607_v55, %v3167_v6  ;;  %v3173_v28 = vsel %vm3160_vm10, %v1648_v5, %v3169_v7  ;;  %v3170_v29 = vsel %vm3160_vm10, %v1605_v46, %v3166_v30  ;;  %v3172_v49 = vsel %vm3160_vm10, %v1646_v47, %v3168_v11  ;;  %v7379_v6 = vld [vmem:[#allocation28 + $0x18] sm:$0xff]   ;;  %v7380_v7 = vld [vmem:[#allocation28 + $0x60] sm:$0xff]  }
 0x4c8   :  { %v3207_v50 = vpack.c.bf16 %v3171_v51, %v3171_v51  ;;  %v3209_v60 = vpack.c.bf16 %v3173_v28, %v3173_v28  ;;  %v3206_v38 = vpack.c.bf16 %v3170_v29, %v3170_v29  ;;  %v3208_v2 = vpack.c.bf16 %v3172_v49, %v3172_v49  ;;  %v7381_v29 = vld [vmem:[#allocation28 + $0x20] sm:$0xff]  }
 0x4c9   :  { %v3183_v45 = vsel %vm3165_vm11, %v2287_v23, %v3111_v10  ;;  %v3182_v55 = vsel %vm3165_vm11, %v2285_v62, %v9102_v9  ;;  %v3175_v46 = vsel %vm3165_vm11, %v1689_v3, %v2369_v53  ;;  %v3174_v47 = vsel %vm3165_vm11, %v1687_v40, %v2367_v48  ;;  %v7408_v49 = vld [vmem:[%s9472_s19 + $0x20] sm:$0xff]  }
 0x4ca   :  { %3505 = vmatprep.mubr.bf16.mxu0 %v3207_v50  ;;  %3545 = vmatprep.mubr.bf16.mxu1 %v3209_v60  ;;  %v3187_v5 = vsel %vm3160_vm10, %v1689_v3, %v3183_v45  ;;  %v9140_v37 = vsel %vm3160_vm10, %v1687_v40, %v3182_v55  ;;  %v9144_v16 = vsel %vm3160_vm10, %v2287_v23, %v3175_v46  ;;  %v9475_v14 = vmov 0.0   ;;  %v7388_v50 = vld [vmem:[#allocation27 + $0x40] sm:$0xff]   ;;  %v7392_v45 = vld [vmem:[#allocation27 + $0x50] sm:$0xff]   ;;  %v7394_v55 = vld [vmem:[#allocation27 + $0x58] sm:$0xff]  }
 0x4cb   :  { %3506 = vmatmul.mubr.bf16.vlgmr.msra.gmra.mrb[40].mxu0 %v3206_v38  ;;  %3546 = vmatmul.mubr.bf16.vlgmr.msra.gmra.mrb[44].mxu1 %v3208_v2  ;;  %v3736_v20 = vpack.c.bf16 %v3187_v5, %v3187_v5  ;;  %v9148_v34 = vsel %vm3160_vm10, %v2285_v62, %v3174_v47  ;;  %v3185_v3 = vsel %vm3165_vm11, %v8980_v22, %v9107_v1  ;;  %v7389_v60 = vld [vmem:[#allocation27] sm:$0xff]   ;;  %v7390_v2 = vld [vmem:[#allocation27 + $0x48] sm:$0xff]   ;;  %v7395_v46 = vld [vmem:[#allocation27 + $0x18] sm:$0xff]  }
 0x4cc   :  { %6467 = vmatpush3.bf16.msra.mxu1 %v7373_v12  ;;  %6754 = vmatpush3.bf16.msra.mxu0 %v7404_v31  ;;  %v3184_v27 = vsel %vm3165_vm11, %v8975_v19, %v9033_v13  ;;  %v9162_v40 = vsel %vm3160_vm10, %v8942_v26, %v3185_v3  ;;  %v9474_v54 = vrot.slane %v8902_v42, %v9039_v39  ;;  %v7406_v39 = vld [vmem:[%s9472_s19 + $0x10] sm:$0xff]   ;;  %v7396_v47 = vld [vmem:[#allocation27 + $0x60] sm:$0xff]   ;;  %v7403_v3 = vld [vmem:[#allocation27 + $0x38] sm:$0xff]  }
 0x4cd   :  { %4027 = vmatprep.mubr.bf16.mxu1 %v3736_v20  ;;  %6468 = vmatprep.subr.bf16.mxu1 %v7374_v32  ;;  %v9167_v36 = vsel %vm3160_vm10, %v8936_v21, %v3184_v27  ;;  %v3177_v35 = vsel %vm3165_vm11, %v8942_v26, %v8993_v61  ;;  %v3176_v42 = vsel %vm3165_vm11, %v8936_v21, %v8991_v56  ;;  %v7377_v26 = vld [vmem:[#allocation28 + $0x10] sm:$0xff]   ;;  %v7391_v31 = vld [vmem:[#allocation27 + $0x8] sm:$0xff]   ;;  %v7397_v5 = vld [vmem:[#allocation27 + $0x20] sm:$0xff]  }
 0x4ce   :  { %v1771_v18 = vadd.f32 %v8946_v44, %v9474_v54  ;;  %6755 = vmatprep.subr.bf16.mxu0 %v9475_v14  ;;  %6769 = vmatprep.mubr.msk.bf16.mxu0 %vm8335_vm0, %v9475_v14  ;;  %v9187_v25 = vsel %vm3160_vm10, %v8980_v22, %v3177_v35  ;;  %v3199_v43 = vsel %vm3165_vm11, %v2369_v53, %v9020_v59  ;;  %v7393_v32 = vld [vmem:[#allocation27 + $0x10] sm:$0xff]   ;;  %v7412_v54 = vld [vmem:[#allocation28 + $0xc0] sm:$0xff]   ;;  %v6159_v35 = vld [vmem:[%s9478_s9] ss:$0 sm:$0xff] }
 0x4cf   :  { %v3198_v44 = vsel %vm3165_vm11, %v2367_v48, %v9015_v17  ;;  %v9203_v22 = vsel %vm3160_vm10, %v8975_v19, %v3176_v42  ;;  %v3190_v19 = vsel %vm3165_vm11, %v9102_v9, %v1769_v0  ;;  %v3201_v23 = vsel %vm3165_vm11, %v8993_v61, %v9030_v8  ;;  %v9476_v9 = vld [vmem:[#allocation94_spill] sm:$0xff] }
 0x4d0   :  { %6469 = vmatpush3.bf16.msra.mxu1 %v7375_v41  ;;  %6756 = vmatpush3.bf16.msra.mxu0 %v7405_v24  ;;  %v9207_v21 = vsel %vm3160_vm10, %v1771_v18, %v3199_v43  ;;  %v9212_v15 = vsel %vm3160_vm10, %v1769_v0, %v3198_v44  ;;  %v3191_v62 = vsel %vm3165_vm11, %v3111_v10, %v1771_v18  ;;  %v7400_v20 = vld [vmem:[#allocation27 + $0x70] sm:$0xff]   ;;  %v7402_v24 = vld [vmem:[#allocation27 + $0x78] sm:$0xff]  }
 0x4d1   :  { %6470 = vmatprep.subr.bf16.mxu1 %v7376_v33  ;;  %6757 = vmatprep.subr.bf16.mxu0 %v9475_v14  ;;  %v9226_v48 = vsel %vm3160_vm10, %v9020_v59, %v3191_v62  ;;  %v9231_v53 = vsel %vm3160_vm10, %v9015_v17, %v3190_v19  ;;  %v9236_v10 = vsel %vm3160_vm10, %v8958_v58, %v3201_v23  ;;  %v7407_v59 = vld [vmem:[%s9472_s19 + $0x18] sm:$0xff]   ;;  %v9477_v17 = vld [vmem:[#allocation93_spill] sm:$0xff] }
 0x4d2   :  { %v3200_v61 = vsel %vm3165_vm11, %v8991_v56, %v9476_v9  ;;  %v3193_v11 = vsel %vm3165_vm11, %v9107_v1, %v8958_v58  ;;  %v3192_v56 = vsel %vm3165_vm11, %v9033_v13, %v9477_v17  ;;  %v7382_v58 = vld [vmem:[#allocation28 + $0x68] sm:$0xff]   ;;  %v7387_v1 = vld [vmem:[#allocation28 + $0x38] sm:$0xff]   ;;  %v3735_v38 = vpack.c.bf16 %v9140_v37, %v9140_v37  ;;  %v7401_v41 = vld [vmem:[#allocation27 + $0x30] sm:$0xff]  }
 0x4d3   :  { %v9247_v30 = vsel %vm3160_vm10, %v9477_v17, %v3200_v61  ;;  %v9260_v51 = vsel %vm3160_vm10, %v9030_v8, %v3193_v11  ;;  %v9265_v28 = vsel %vm3160_vm10, %v9476_v9, %v3192_v56  ;;  %v7383_v13 = vld [vmem:[#allocation28 + $0x28] sm:$0xff]   ;;  %v7385_v8 = vld [vmem:[#allocation28 + $0x30] sm:$0xff]   ;;  %v3668_v12 = vpack.c.bf16 %v9144_v16, %v9144_v16 }
 0x4d4   :  { %6471 = vmatpush3.bf16.msra.mxu1 %v7377_v26  ;;  %6758 = vmatpush3.bf16.msra.mxu0 %v7406_v39  ;;  %v7398_v37 = vld [vmem:[#allocation27 + $0x68] sm:$0xff]   ;;  %v3667_v27 = vpack.c.bf16 %v9148_v34, %v9148_v34  ;;  %v7411_v0 = vld [vmem:[%s9472_s19 + $0x38] sm:$0xff]   ;;  %v3738_v17 = vpack.c.bf16 %v9162_v40, %v9162_v40 }
 0x4d5   :  { %6472 = vmatprep.subr.bf16.mxu1 %v7378_v57  ;;  %6759 = vmatprep.subr.bf16.mxu0 %v9475_v14  ;;  %v7399_v16 = vld [vmem:[#allocation27 + $0x28] sm:$0xff]   ;;  %v7416_v56 = vld [vmem:[#allocation28 + $0xd0] sm:$0xff]  }
 0x4d6   :  { %v7409_v33 = vld [vmem:[%s9472_s19 + $0x28] sm:$0xff]  }
 0x4d7   :  { %v7415_v11 = vld [vmem:[#allocation28 + $0x88] sm:$0xff]  }
 0x4d8   :  { %6473 = vmatpush3.bf16.msra.mxu1 %v7379_v6  ;;  %6760 = vmatpush3.bf16.msra.mxu0 %v7407_v59  ;;  %v7413_v6 = vld [vmem:[#allocation28 + $0x80] sm:$0xff]   ;;  %v7423_v40 = vld [vmem:[#allocation28 + $0xa8] sm:$0xff]  }
 0x4d9   :  { %6474 = vmatprep.subr.bf16.mxu1 %v7380_v7  ;;  %6761 = vmatprep.subr.bf16.mxu0 %v9475_v14  ;;  %v7414_v7 = vld [vmem:[#allocation28 + $0xc8] sm:$0xff]  }
 0x4dc   :  { %6475 = vmatpush3.bf16.msra.mxu1 %v7381_v29  ;;  %6762 = vmatpush3.bf16.msra.mxu0 %v7408_v49  ;;  %v7417_v29 = vld [vmem:[#allocation28 + $0x90] sm:$0xff]   ;;  %v7418_v49 = vld [vmem:[#allocation28 + $0xd8] sm:$0xff]  }
 0x4dd   :  { %6476 = vmatprep.subr.bf16.mxu1 %v7382_v58  ;;  %6763 = vmatprep.subr.bf16.mxu0 %v9475_v14  ;;  %v7419_v58 = vld [vmem:[#allocation28 + $0x98] sm:$0xff]  }
 0x4e0   :  { %6477 = vmatpush3.bf16.msra.mxu1 %v7383_v13  ;;  %6764 = vmatpush3.bf16.msra.mxu0 %v7409_v33  ;;  %v7420_v13 = vld [vmem:[#allocation28 + $0xe0] sm:$0xff]   ;;  %v7440_v33 = vld [vmem:[#allocation27 + $0xf0] sm:$0xff]  }
 0x4e1   :  { %6478 = vmatprep.subr.bf16.mxu1 %v7384_v4  ;;  %6765 = vmatprep.subr.bf16.mxu0 %v9475_v14  ;;  %v7421_v4 = vld [vmem:[#allocation28 + $0xa0] sm:$0xff]  }
 0x4e4   :  { %6479 = vmatpush3.bf16.msra.mxu1 %v7385_v8  ;;  %6766 = vmatpush3.bf16.msra.mxu0 %v7410_v63  ;;  %v7422_v8 = vld [vmem:[#allocation28 + $0xe8] sm:$0xff]  }
 0x4e5   :  { %6480 = vmatprep.subr.bf16.mxu1 %v7386_v52  ;;  %6767 = vmatprep.subr.bf16.mxu0 %v9475_v14  ;;  %v7424_v52 = vld [vmem:[#allocation28 + $0xf0] sm:$0xff]  }
 0x4e8   :  { %6481 = vmatpush3.bf16.msra.mxu1 %v7387_v1  ;;  %6768 = vmatpush3.bf16.msra.mxu0 %v7411_v0 }
 0x4e9   :  { %6510 = vmatprep.subr.bf16.mxu1 %v7388_v50  ;;  %6488 = vmatprep.subr.bf16.mxu0 %v7412_v54  ;;  %v7441_v54 = vld [vmem:[#allocation27 + $0xb0] sm:$0xff]  }
 0x4eb   :  { %4028 = vmatmul.mubr.bf16.vlgmr.msra.gmra.mrb[48].mxu1 %v3735_v38 }
 0x4ec   :  { %6511 = vmatpush3.bf16.msra.mxu1 %v7389_v60  ;;  %4299 = vmatprep.mubr.bf16.mxu1 %v3668_v12  ;;  %v7425_v60 = vld [vmem:[#allocation28 + $0xb0] sm:$0xff]   ;;  %v7426_v12 = vld [vmem:[#allocation28 + $0xf8] sm:$0xff]  }
 0x4ed   :  { %6512 = vmatprep.subr.bf16.mxu1 %v7390_v2 }
 0x4f0   :  { %6513 = vmatpush3.bf16.msra.mxu1 %v7391_v31 }
 0x4f1   :  { %6514 = vmatprep.subr.bf16.mxu1 %v7392_v45  ;;  %v7427_v45 = vld [vmem:[#allocation28 + $0xb8] sm:$0xff]  }
 0x4f4   :  { %6515 = vmatpush3.bf16.msra.mxu1 %v7393_v32  ;;  %v7428_v32 = vld [vmem:[#allocation27 + $0xc0] sm:$0xff]  }
 0x4f5   :  { %6516 = vmatprep.subr.bf16.mxu1 %v7394_v55  ;;  %v7429_v55 = vld [vmem:[#allocation27 + $0x80] sm:$0xff]  }
 0x4f8   :  { %6517 = vmatpush3.bf16.msra.mxu1 %v7395_v46  ;;  %v3737_v46 = vpack.c.bf16 %v9167_v36, %v9167_v36  ;;  %v7437_v36 = vld [vmem:[#allocation27 + $0xa0] sm:$0xff]  }
 0x4f9   :  { %6518 = vmatprep.subr.bf16.mxu1 %v7396_v47  ;;  %v7430_v47 = vld [vmem:[#allocation27 + $0xc8] sm:$0xff]  }
 0x4fc   :  { %6519 = vmatpush3.bf16.msra.mxu1 %v7397_v5  ;;  %v3670_v5 = vpack.c.bf16 %v9187_v25, %v9187_v25  ;;  %v7439_v25 = vld [vmem:[#allocation27 + $0xa8] sm:$0xff]  }
 0x4fd   :  { %6520 = vmatprep.subr.bf16.mxu1 %v7398_v37  ;;  %v7431_v37 = vld [vmem:[#allocation27 + $0x88] sm:$0xff]  }
 0x500   :  { %6521 = vmatpush3.bf16.msra.mxu1 %v7399_v16  ;;  %v7432_v16 = vld [vmem:[#allocation27 + $0xd0] sm:$0xff]  }
 0x501   :  { %6522 = vmatprep.subr.bf16.mxu1 %v7400_v20  ;;  %v7433_v20 = vld [vmem:[#allocation27 + $0x90] sm:$0xff]  }
 0x504   :  { %6523 = vmatpush3.bf16.msra.mxu1 %v7401_v41  ;;  %v7434_v41 = vld [vmem:[#allocation27 + $0xd8] sm:$0xff]  }
 0x505   :  { %6524 = vmatprep.subr.bf16.mxu1 %v7402_v24  ;;  %v7435_v24 = vld [vmem:[#allocation27 + $0x98] sm:$0xff]  }
 0x508   :  { %6525 = vmatpush3.bf16.msra.mxu1 %v7403_v3  ;;  %v7436_v3 = vld [vmem:[#allocation27 + $0xe0] sm:$0xff]  }
 0x509   :  { %6773 = vmatprep.subr.bf16.mxu1 %v9475_v14 }
 0x50b   :  { %4300 = vmatmul.mubr.bf16.vlgmr.msra.gmra.mrb[52].mxu1 %v3667_v27  ;;  %v7438_v27 = vld [vmem:[#allocation27 + $0xe8] sm:$0xff]  }
 0x50c   :  { %6789 = vmatprep.mubr.msk.bf16.mxu1 %vm8335_vm0, %v9475_v14 }
 0x59e   :  { %v6429_v34 = vpop.f32.mrb[40].mxu0  ;;  %v6451_v18 = vpop.f32.mrb[44].mxu1 }
 0x59f   :  { %v6430_v42 = vpop.f32.mrb[41].mxu0  ;;  %v6452_v43 = vpop.f32.mrb[45].mxu1 }
 0x5a0   :  { %v6431_v44 = vadd.f32 %v6430_v42, %v6429_v34  ;;  %v6453_v26 = vadd.f32 %v6452_v43, %v6451_v18  ;;  %v6432_v39 = vpop.f32.mrb[42].mxu0  ;;  %v6454_v57 = vpop.f32.mrb[46].mxu1  ;;  %v7443_v43 = vld [vmem:[#allocation27 + $0xb8] sm:$0xff]  }
 0x5a1   :  { %v6433_v62 = vpop.f32.mrb[43].mxu0  ;;  %v6455_v19 = vpop.f32.mrb[47].mxu1  ;;  %v3669_v39 = vpack.c.bf16 %v9203_v22, %v9203_v22  ;;  %v7446_v57 = vld [vmem:[#allocation36 + $0x48] sm:$0xff]   ;;  %v7453_v22 = vld [vmem:[#allocation36 + $0x20] sm:$0xff]  }
 0x5a2   :  { %v3508_v23 = vadd.f32 %v6431_v44, %v6159_v35  ;;  %v7442_v35 = vld [vmem:[#allocation27 + $0xf8] sm:$0xff]   ;;  %v7444_v44 = vld [vmem:[#allocation36 + $0x40] sm:$0xff]   ;;  %v4538_v62 = vpack.c.bf16 %v9207_v21, %v9207_v21  ;;  %v7447_v19 = vld [vmem:[#allocation36 + $0x8] sm:$0xff]  }
 0x5a3   :  { %v7455_v21 = vld [vmem:[#allocation36 + $0x28] sm:$0xff]  }
 0x5a4   :  { %v3548_v9 = vadd.f32 %v6453_v26, %v3508_v23  ;;  %v7445_v26 = vld [vmem:[#allocation36] sm:$0xff]   ;;  %v7448_v23 = vld [vmem:[#allocation36 + $0x50] sm:$0xff]  }
 0x5a6   :  { %v3553_v61 = vmax.f32 %v3548_v9, 0.0  ;;  %v7449_v9 = vld [vmem:[#allocation36 + $0x10] sm:$0xff]  }
 0x5a8   :  { %v3554_v59 = vpack.c.bf16 %v3553_v61, %v3553_v61  ;;  %v7450_v61 = vld [vmem:[#allocation36 + $0x58] sm:$0xff]  }
 0x5aa   :  { %6770 = vmatmul.mubr.bf16.vlgmr.msra.gmra.mrb[44].mxu0 %v3554_v59  ;;  %v7452_v59 = vld [vmem:[#allocation36 + $0x60] sm:$0xff]  }
 0x5ab   :  { %6489 = vmatpush3.bf16.msra.mxu0 %v7413_v6  ;;  %4067 = vmatprep.mubr.bf16.mxu0 %v3738_v17  ;;  %v7451_v6 = vld [vmem:[#allocation36 + $0x18] sm:$0xff]   ;;  %v7456_v17 = vld [vmem:[#allocation36 + $0x70] sm:$0xff]  }
 0x5ac   :  { %6490 = vmatprep.subr.bf16.mxu0 %v7414_v7  ;;  %v7454_v7 = vld [vmem:[#allocation36 + $0x68] sm:$0xff]  }
 0x5af   :  { %6491 = vmatpush3.bf16.msra.mxu0 %v7415_v11  ;;  %v7457_v11 = vld [vmem:[#allocation36 + $0x30] sm:$0xff]  }
 0x5b0   :  { %6492 = vmatprep.subr.bf16.mxu0 %v7416_v56  ;;  %v7458_v56 = vld [vmem:[#allocation36 + $0x78] sm:$0xff]  }
 0x5b3   :  { %6493 = vmatpush3.bf16.msra.mxu0 %v7417_v29  ;;  %v7459_v29 = vld [vmem:[#allocation36 + $0x38] sm:$0xff]  }
 0x5b4   :  { %6494 = vmatprep.subr.bf16.mxu0 %v7418_v49  ;;  %v7460_v49 = vld [vmem:[#allocation34 + $0x40] sm:$0xff]  }
 0x5b7   :  { %6495 = vmatpush3.bf16.msra.mxu0 %v7419_v58  ;;  %v7461_v58 = vld [vmem:[#allocation34] sm:$0xff]  }
 0x5b8   :  { %6496 = vmatprep.subr.bf16.mxu0 %v7420_v13  ;;  %v4537_v13 = vpack.c.bf16 %v9212_v15, %v9212_v15  ;;  %v7469_v15 = vld [vmem:[#allocation34 + $0x20] sm:$0xff]  }
 0x5bb   :  { %6497 = vmatpush3.bf16.msra.mxu0 %v7421_v4  ;;  %v7462_v4 = vld [vmem:[#allocation34 + $0x48] sm:$0xff]  }
 0x5bc   :  { %6498 = vmatprep.subr.bf16.mxu0 %v7422_v8  ;;  %v4470_v8 = vpack.c.bf16 %v9226_v48, %v9226_v48  ;;  %v7471_v48 = vld [vmem:[#allocation34 + $0x28] sm:$0xff]  }
 0x5be   :  { %v6482_v1 = vpop.f32.mrb[48].mxu1 }
 0x5bf   :  { %v6483_v50 = vpop.f32.mrb[49].mxu1  ;;  %6499 = vmatpush3.bf16.msra.mxu0 %v7423_v40  ;;  %v7463_v40 = vld [vmem:[#allocation34 + $0x8] sm:$0xff]  }
 0x5c0   :  { %v9287_v38 = vadd.f32 %v6483_v50, %v6482_v1  ;;  %v6485_v2 = vpop.f32.mrb[50].mxu1  ;;  %6500 = vmatprep.subr.bf16.mxu0 %v7424_v52  ;;  %v7464_v52 = vld [vmem:[#allocation34 + $0x50] sm:$0xff]   ;;  %v7466_v50 = vld [vmem:[#allocation34 + $0x58] sm:$0xff]  }
 0x5c1   :  { %v6486_v31 = vpop.f32.mrb[51].mxu1  ;;  %v7465_v1 = vld [vmem:[#allocation34 + $0x10] sm:$0xff]   ;;  %v7468_v2 = vld [vmem:[#allocation34 + $0x60] sm:$0xff]  }
 0x5c2   :  { %v7472_v31 = vld [vmem:[#allocation34 + $0x70] sm:$0xff]  }
 0x5c3   :  { %6501 = vmatpush3.bf16.msra.mxu0 %v7425_v60  ;;  %v7467_v60 = vld [vmem:[#allocation34 + $0x18] sm:$0xff]  }
 0x5c4   :  { %6502 = vmatprep.subr.bf16.mxu0 %v7426_v12  ;;  %v7470_v12 = vld [vmem:[#allocation34 + $0x68] sm:$0xff]  }
 0x5c7   :  { %6503 = vmatpush3.bf16.msra.mxu0 %v7427_v45  ;;  %v7473_v45 = vld [vmem:[#allocation34 + $0x30] sm:$0xff]  }
 0x5c8   :  { %6532 = vmatprep.subr.bf16.mxu0 %v7428_v32  ;;  %v7474_v32 = vld [vmem:[#allocation34 + $0x78] sm:$0xff]  }
 0x5ca   :  { %4068 = vmatmul.mubr.bf16.vlgmr.msra.gmra.mrb[48].mxu0 %v3737_v46  ;;  %v7475_v46 = vld [vmem:[#allocation34 + $0x38] sm:$0xff]  }
 0x5cb   :  { %6533 = vmatpush3.bf16.msra.mxu0 %v7429_v55  ;;  %4339 = vmatprep.mubr.bf16.mxu0 %v3670_v5  ;;  %v7476_v55 = vld [vmem:[#allocation31] sm:$0xff]   ;;  %v7478_v5 = vld [vmem:[#allocation31 + $0x10] sm:$0xff]  }
 0x5cc   :  { %6534 = vmatprep.subr.bf16.mxu0 %v7430_v47  ;;  %6774 = vmatpush3.bf16.msra.mxu1 %v7476_v55  ;;  %v7477_v47 = vld [vmem:[#allocation31 + $0x8] sm:$0xff]   ;;  %v7505_v55 = vld [vmem:[#allocation34 + $0x90] sm:$0xff]  }
 0x5cd   :  { %6775 = vmatprep.subr.bf16.mxu1 %v9475_v14 }
 0x5cf   :  { %6535 = vmatpush3.bf16.msra.mxu0 %v7431_v37  ;;  %v4469_v37 = vpack.c.bf16 %v9231_v53, %v9231_v53  ;;  %v7481_v53 = vld [vmem:[#allocation31 + $0x28] sm:$0xff]  }
 0x5d0   :  { %6536 = vmatprep.subr.bf16.mxu0 %v7432_v16  ;;  %6776 = vmatpush3.bf16.msra.mxu1 %v7477_v47  ;;  %v7479_v16 = vld [vmem:[#allocation31 + $0x18] sm:$0xff]  }
 0x5d1   :  { %6777 = vmatprep.subr.bf16.mxu1 %v9475_v14  ;;  %v7507_v47 = vld [vmem:[#allocation34 + $0x98] sm:$0xff]  }
 0x5d3   :  { %6537 = vmatpush3.bf16.msra.mxu0 %v7433_v20  ;;  %v7480_v20 = vld [vmem:[#allocation31 + $0x20] sm:$0xff]  }
 0x5d4   :  { %6538 = vmatprep.subr.bf16.mxu0 %v7434_v41  ;;  %6778 = vmatpush3.bf16.msra.mxu1 %v7478_v5  ;;  %v7482_v41 = vld [vmem:[#allocation31 + $0x30] sm:$0xff]   ;;  %v7508_v5 = vld [vmem:[#allocation34 + $0xe0] sm:$0xff]  }
 0x5d5   :  { %6779 = vmatprep.subr.bf16.mxu1 %v9475_v14 }
 0x5d7   :  { %6539 = vmatpush3.bf16.msra.mxu0 %v7435_v24  ;;  %v7483_v24 = vld [vmem:[#allocation31 + $0x38] sm:$0xff]  }
 0x5d8   :  { %6540 = vmatprep.subr.bf16.mxu0 %v7436_v3  ;;  %6780 = vmatpush3.bf16.msra.mxu1 %v7479_v16  ;;  %v7484_v3 = vld [vmem:[#allocation36 + $0xc0] sm:$0xff]   ;;  %v7512_v16 = vld [vmem:[#allocation34 + $0xf0] sm:$0xff]  }
 0x5d9   :  { %6781 = vmatprep.subr.bf16.mxu1 %v9475_v14 }
 0x5db   :  { %6541 = vmatpush3.bf16.msra.mxu0 %v7437_v36 }
 0x5dc   :  { %6542 = vmatprep.subr.bf16.mxu0 %v7438_v27  ;;  %6782 = vmatpush3.bf16.msra.mxu1 %v7480_v20 }
 0x5dd   :  { %6783 = vmatprep.subr.bf16.mxu1 %v9475_v14 }
 0x5de   :  { %v6526_v63 = vpop.f32.mrb[52].mxu1 }
 0x5df   :  { %v6527_v0 = vpop.f32.mrb[53].mxu1  ;;  %6543 = vmatpush3.bf16.msra.mxu0 %v7439_v25 }
 0x5e0   :  { %v9293_v34 = vadd.f32 %v6527_v0, %v6526_v63  ;;  %v6529_v18 = vpop.f32.mrb[54].mxu1  ;;  %6544 = vmatprep.subr.bf16.mxu0 %v7440_v33  ;;  %6784 = vmatpush3.bf16.msra.mxu1 %v7481_v53 }
 0x5e1   :  { %v6530_v42 = vpop.f32.mrb[55].mxu1  ;;  %6785 = vmatprep.subr.bf16.mxu1 %v9475_v14 }
 0x5e3   :  { %6545 = vmatpush3.bf16.msra.mxu0 %v7441_v54 }
 0x5e4   :  { %6546 = vmatprep.subr.bf16.mxu0 %v7442_v35  ;;  %6786 = vmatpush3.bf16.msra.mxu1 %v7482_v41  ;;  %v7513_v41 = vld [vmem:[#allocation34 + $0xb0] sm:$0xff]  }
 0x5e5   :  { %6787 = vmatprep.subr.bf16.mxu1 %v9475_v14 }
 0x5e7   :  { %6547 = vmatpush3.bf16.msra.mxu0 %v7443_v43 }
 0x5e8   :  { %6563 = vmatprep.subr.bf16.mxu0 %v7444_v44  ;;  %6788 = vmatpush3.bf16.msra.mxu1 %v7483_v24 }
 0x5e9   :  { %6585 = vmatprep.subr.bf16.mxu1 %v7484_v3 }
 0x5ea   :  { %4340 = vmatmul.mubr.bf16.vlgmr.msra.gmra.mrb[52].mxu0 %v3669_v39 }
 0x5eb   :  { %6564 = vmatpush3.bf16.msra.mxu0 %v7445_v26  ;;  %4829 = vmatprep.mubr.bf16.mxu0 %v4538_v62  ;;  %v6265_v62 = vld [vmem:[#allocation30] ss:$0 sm:$0xff] }
 0x5ec   :  { %6565 = vmatprep.subr.bf16.mxu0 %v7446_v57 }
 0x5ef   :  { %6566 = vmatpush3.bf16.msra.mxu0 %v7447_v19 }
 0x5f0   :  { %6567 = vmatprep.subr.bf16.mxu0 %v7448_v23 }
 0x5f3   :  { %6568 = vmatpush3.bf16.msra.mxu0 %v7449_v9 }
 0x5f4   :  { %6569 = vmatprep.subr.bf16.mxu0 %v7450_v61 }
 0x5f7   :  { %6570 = vmatpush3.bf16.msra.mxu0 %v7451_v6  ;;  %v7485_v6 = vld [vmem:[#allocation36 + $0x80] sm:$0xff]  }
 0x5f8   :  { %6571 = vmatprep.subr.bf16.mxu0 %v7452_v59 }
 0x5fb   :  { %6572 = vmatpush3.bf16.msra.mxu0 %v7453_v22  ;;  %v7486_v22 = vld [vmem:[#allocation36 + $0xc8] sm:$0xff]  }
 0x5fc   :  { %6573 = vmatprep.subr.bf16.mxu0 %v7454_v7  ;;  %v4540_v7 = vpack.c.bf16 %v9236_v10, %v9236_v10  ;;  %v7495_v10 = vld [vmem:[#allocation36 + $0xa8] sm:$0xff]  }
 0x5ff   :  { %6574 = vmatpush3.bf16.msra.mxu0 %v7455_v21  ;;  %v7489_v21 = vld [vmem:[#allocation36 + $0x90] sm:$0xff]  }
 0x600   :  { %6575 = vmatprep.subr.bf16.mxu0 %v7456_v17  ;;  %v7490_v17 = vld [vmem:[#allocation36 + $0xd8] sm:$0xff]  }
 0x603   :  { %6576 = vmatpush3.bf16.msra.mxu0 %v7457_v11  ;;  %v7491_v11 = vld [vmem:[#allocation36 + $0x98] sm:$0xff]  }
 0x604   :  { %6577 = vmatprep.subr.bf16.mxu0 %v7458_v56  ;;  %v7492_v56 = vld [vmem:[#allocation36 + $0xe0] sm:$0xff]  }
 0x607   :  { %6578 = vmatpush3.bf16.msra.mxu0 %v7459_v29  ;;  %v7493_v29 = vld [vmem:[#allocation36 + $0xa0] sm:$0xff]  }
 0x608   :  { %6607 = vmatprep.subr.bf16.mxu0 %v7460_v49  ;;  %v7494_v49 = vld [vmem:[#allocation36 + $0xe8] sm:$0xff]  }
 0x60a   :  { %4830 = vmatmul.mubr.bf16.vlgmr.msra.gmra.mrb[56].mxu0 %v4537_v13 }
 0x60b   :  { %6608 = vmatpush3.bf16.msra.mxu0 %v7461_v58  ;;  %5101 = vmatprep.mubr.bf16.mxu0 %v4470_v8  ;;  %v7496_v58 = vld [vmem:[#allocation36 + $0xf0] sm:$0xff]  }
 0x60c   :  { %6609 = vmatprep.subr.bf16.mxu0 %v7462_v4  ;;  %v7497_v8 = vld [vmem:[#allocation36 + $0xb0] sm:$0xff]  }
 0x60f   :  { %6610 = vmatpush3.bf16.msra.mxu0 %v7463_v40 }
 0x610   :  { %6611 = vmatprep.subr.bf16.mxu0 %v7464_v52 }
 0x613   :  { %6612 = vmatpush3.bf16.msra.mxu0 %v7465_v1  ;;  %v7498_v1 = vld [vmem:[#allocation36 + $0xf8] sm:$0xff]  }
 0x614   :  { %6613 = vmatprep.subr.bf16.mxu0 %v7466_v50 }
 0x617   :  { %6614 = vmatpush3.bf16.msra.mxu0 %v7467_v60  ;;  %v7499_v60 = vld [vmem:[#allocation36 + $0xb8] sm:$0xff]  }
 0x618   :  { %6615 = vmatprep.subr.bf16.mxu0 %v7468_v2  ;;  %v7500_v2 = vld [vmem:[#allocation34 + $0xc0] sm:$0xff]  }
 0x61b   :  { %6616 = vmatpush3.bf16.msra.mxu0 %v7469_v15  ;;  %v7501_v15 = vld [vmem:[#allocation34 + $0x80] sm:$0xff]  }
 0x61c   :  { %6617 = vmatprep.subr.bf16.mxu0 %v7470_v12  ;;  %v4539_v12 = vpack.c.bf16 %v9247_v30, %v9247_v30  ;;  %v7509_v30 = vld [vmem:[#allocation34 + $0xa0] sm:$0xff]  }
 0x61f   :  { %6618 = vmatpush3.bf16.msra.mxu0 %v7471_v48  ;;  %v7502_v48 = vld [vmem:[#allocation34 + $0xc8] sm:$0xff]  }
 0x620   :  { %6619 = vmatprep.subr.bf16.mxu0 %v7472_v31  ;;  %v4472_v31 = vpack.c.bf16 %v9260_v51, %v9260_v51  ;;  %v7511_v51 = vld [vmem:[#allocation34 + $0xa8] sm:$0xff]  }
 0x623   :  { %6620 = vmatpush3.bf16.msra.mxu0 %v7473_v45  ;;  %v7503_v45 = vld [vmem:[#allocation34 + $0x88] sm:$0xff]  }
 0x624   :  { %6621 = vmatprep.subr.bf16.mxu0 %v7474_v32  ;;  %v7504_v32 = vld [vmem:[#allocation34 + $0xd0] sm:$0xff]  }
 0x627   :  { %6622 = vmatpush3.bf16.msra.mxu0 %v7475_v46  ;;  %v7506_v46 = vld [vmem:[#allocation34 + $0xd8] sm:$0xff]  }
 0x628   :  { %6793 = vmatprep.subr.bf16.mxu0 %v9475_v14 }
 0x62a   :  { %5102 = vmatmul.mubr.bf16.vlgmr.msra.gmra.mrb[60].mxu0 %v4469_v37  ;;  %v7510_v37 = vld [vmem:[#allocation34 + $0xe8] sm:$0xff]  }
 0x62b   :  { %6809 = vmatprep.mubr.msk.bf16.mxu0 %vm8335_vm0, %v9475_v14 }
 0x67d   :  { %v9315_v36 = vpop.f32.mrb[44].mxu0 }
 0x67e   :  { %v6771_v27 = vpop.f32.mrb[45].mxu0 }
 0x67f   :  { %v3663_v25 = vpop.f32.mrb[46].mxu0  ;;  %v7514_v27 = vld [vmem:[#allocation34 + $0xf8] sm:$0xff]  }
 0x680   :  { %v6772_v33 = vpop.f32.mrb[47].mxu0 }
 0x681   :  { %v7515_v33 = vld [vmem:[#allocation34 + $0xb8] sm:$0xff]  }
 0x69d   :  { %v6504_v63 = vpop.f32.mrb[48].mxu0 }
 0x69e   :  { %v6505_v0 = vpop.f32.mrb[49].mxu0 }
 0x69f   :  { %v6506_v54 = vadd.f32 %v6505_v0, %v6504_v63  ;;  %v6507_v18 = vpop.f32.mrb[50].mxu0  ;;  %v7516_v63 = vld [vmem:[#allocation40] sm:$0xff]   ;;  %v4471_v0 = vpack.c.bf16 %v9265_v28, %v9265_v28 }
 0x6a0   :  { %v6508_v35 = vpop.f32.mrb[51].mxu0  ;;  %v7518_v18 = vld [vmem:[#allocation40 + $0x10] sm:$0xff]   ;;  %v7520_v28 = vld [vmem:[#allocation40 + $0x20] sm:$0xff]  }
 0x6a1   :  { %v4070_v42 = vadd.f32 %v6506_v54, %v9287_v38  ;;  %v7487_v38 = vld [vmem:[#allocation36 + $0x88] sm:$0xff]   ;;  %v7519_v35 = vld [vmem:[#allocation40 + $0x18] sm:$0xff]  }
 0x6a2   :  { %v7517_v54 = vld [vmem:[#allocation40 + $0x8] sm:$0xff]  }
 0x6a3   :  { %v4302_v43 = vadd.f32 %v9293_v34, %v4070_v42  ;;  %v7488_v34 = vld [vmem:[#allocation36 + $0xd0] sm:$0xff]   ;;  %v7521_v42 = vld [vmem:[#allocation40 + $0x28] sm:$0xff]  }
 0x6bd   :  { %v6548_v44 = vpop.f32.mrb[52].mxu0 }
 0x6be   :  { %v6549_v26 = vpop.f32.mrb[53].mxu0 }
 0x6bf   :  { %v6550_v39 = vadd.f32 %v6549_v26, %v6548_v44  ;;  %v6551_v57 = vpop.f32.mrb[54].mxu0  ;;  %v7523_v44 = vld [vmem:[#allocation40 + $0x38] sm:$0xff]   ;;  %v7524_v26 = vld [vmem:[#allocation37] sm:$0xff]  }
 0x6c0   :  { %v6552_v19 = vpop.f32.mrb[55].mxu0  ;;  %6794 = vmatpush3.bf16.msra.mxu0 %v7524_v26  ;;  %v7526_v57 = vld [vmem:[#allocation37 + $0x10] sm:$0xff]   ;;  %v6340_v26 = vld [vmem:[%s9481_s18] ss:$0 sm:$0xff] }
 0x6c1   :  { %v4342_v23 = vadd.f32 %v6550_v39, %v4302_v43  ;;  %v7522_v43 = vld [vmem:[#allocation40 + $0x30] sm:$0xff]   ;;  %v7525_v39 = vld [vmem:[#allocation37 + $0x8] sm:$0xff]   ;;  %6795 = vmatprep.subr.bf16.mxu0 %v9475_v14  ;;  %v7528_v19 = vld [vmem:[#allocation37 + $0x20] sm:$0xff]  }
 0x6c3   :  { %v4354_v9 = vadd.f32 %v6265_v62, %v4342_v23  ;;  %v7527_v62 = vld [vmem:[#allocation37 + $0x18] sm:$0xff]   ;;  %v7529_v23 = vld [vmem:[#allocation37 + $0x28] sm:$0xff]  }
 0x6c4   :  { %6796 = vmatpush3.bf16.msra.mxu0 %v7525_v39 }
 0x6c5   :  { %v4355_v61 = vmax.f32 %v4354_v9, 0.0  ;;  %6797 = vmatprep.subr.bf16.mxu0 %v9475_v14  ;;  %v7530_v9 = vld [vmem:[#allocation37 + $0x30] sm:$0xff]  }
 0x6c7   :  { %v4356_v59 = vpack.c.bf16 %v4355_v61, %v4355_v61  ;;  %v7531_v61 = vld [vmem:[#allocation37 + $0x38] sm:$0xff]  }
 0x6c8   :  { %6798 = vmatpush3.bf16.msra.mxu0 %v7526_v57 }
 0x6c9   :  { %6790 = vmatmul.mubr.bf16.vlgmr.msra.gmra.mrb[56].mxu1 %v4356_v59  ;;  %6799 = vmatprep.subr.bf16.mxu0 %v9475_v14 }
 0x6ca   :  { %6586 = vmatpush3.bf16.msra.mxu1 %v7485_v6  ;;  %4869 = vmatprep.mubr.bf16.mxu1 %v4540_v7  ;;  %v6266_v6 = vld [vmem:[#allocation33] ss:$0 sm:$0xff] }
 0x6cb   :  { %6587 = vmatprep.subr.bf16.mxu1 %v7486_v22 }
 0x6cc   :  { %6800 = vmatpush3.bf16.msra.mxu0 %v7527_v62 }
 0x6cd   :  { %6801 = vmatprep.subr.bf16.mxu0 %v9475_v14 }
 0x6ce   :  { %6588 = vmatpush3.bf16.msra.mxu1 %v7487_v38 }
 0x6cf   :  { %6589 = vmatprep.subr.bf16.mxu1 %v7488_v34 }
 0x6d0   :  { %6802 = vmatpush3.bf16.msra.mxu0 %v7528_v19 }
 0x6d1   :  { %6803 = vmatprep.subr.bf16.mxu0 %v9475_v14 }
 0x6d2   :  { %6590 = vmatpush3.bf16.msra.mxu1 %v7489_v21 }
 0x6d3   :  { %6591 = vmatprep.subr.bf16.mxu1 %v7490_v17 }
 0x6d4   :  { %6804 = vmatpush3.bf16.msra.mxu0 %v7529_v23 }
 0x6d5   :  { %6805 = vmatprep.subr.bf16.mxu0 %v9475_v14 }
 0x6d6   :  { %6592 = vmatpush3.bf16.msra.mxu1 %v7491_v11 }
 0x6d7   :  { %6593 = vmatprep.subr.bf16.mxu1 %v7492_v56 }
 0x6d8   :  { %6806 = vmatpush3.bf16.msra.mxu0 %v7530_v9 }
 0x6d9   :  { %6807 = vmatprep.subr.bf16.mxu0 %v9475_v14 }
 0x6da   :  { %6594 = vmatpush3.bf16.msra.mxu1 %v7493_v29 }
 0x6db   :  { %6595 = vmatprep.subr.bf16.mxu1 %v7494_v49 }
 0x6dc   :  { %6808 = vmatpush3.bf16.msra.mxu0 %v7531_v61 }
 0x6dd   :  { %v6579_v13 = vpop.f32.mrb[56].mxu0  ;;  %6833 = vmatprep.subr.bf16.mxu0 %v9475_v14 }
 0x6de   :  { %6596 = vmatpush3.bf16.msra.mxu1 %v7495_v10  ;;  %v6580_v4 = vpop.f32.mrb[57].mxu0 }
 0x6df   :  { %v9321_v40 = vadd.f32 %v6580_v4, %v6579_v13  ;;  %v6582_v52 = vpop.f32.mrb[58].mxu0  ;;  %6597 = vmatprep.subr.bf16.mxu1 %v7496_v58 }
 0x6e0   :  { %v6583_v50 = vpop.f32.mrb[59].mxu0 }
 0x6e1   :  { %v6339_v50 = vld [vmem:[%s9479_s15] ss:$0 sm:$0xff] }
 0x6e2   :  { %6598 = vmatpush3.bf16.msra.mxu1 %v7497_v8 }
 0x6e3   :  { %6599 = vmatprep.subr.bf16.mxu1 %v7498_v1 }
 0x6e6   :  { %6600 = vmatpush3.bf16.msra.mxu1 %v7499_v60 }
 0x6e7   :  { %6629 = vmatprep.subr.bf16.mxu1 %v7500_v2 }
 0x6e9   :  { %4870 = vmatmul.mubr.bf16.vlgmr.msra.gmra.mrb[60].mxu1 %v4539_v12 }
 0x6ea   :  { %6630 = vmatpush3.bf16.msra.mxu1 %v7501_v15  ;;  %5141 = vmatprep.mubr.bf16.mxu1 %v4472_v31 }
 0x6eb   :  { %6631 = vmatprep.subr.bf16.mxu1 %v7502_v48  ;;  %v7532_v48 = vld [vmem:[#allocation39] sm:$0xff]  }
 0x6ee   :  { %6632 = vmatpush3.bf16.msra.mxu1 %v7503_v45  ;;  %v7533_v45 = vld [vmem:[#allocation39 + $0x8] sm:$0xff]  }
 0x6ef   :  { %6633 = vmatprep.subr.bf16.mxu1 %v7504_v32  ;;  %v7535_v32 = vld [vmem:[#allocation39 + $0x18] sm:$0xff]  }
 0x6f2   :  { %6634 = vmatpush3.bf16.msra.mxu1 %v7505_v55  ;;  %v7536_v55 = vld [vmem:[#allocation39 + $0x20] sm:$0xff]  }
 0x6f3   :  { %6635 = vmatprep.subr.bf16.mxu1 %v7506_v46  ;;  %v7537_v46 = vld [vmem:[#allocation39 + $0x28] sm:$0xff]  }
 0x6f6   :  { %6636 = vmatpush3.bf16.msra.mxu1 %v7507_v47  ;;  %v7540_v47 = vld [vmem:[#allocation42] sm:$0xff]  }
 0x6f7   :  { %6637 = vmatprep.subr.bf16.mxu1 %v7508_v5  ;;  %v6192_v5 = vld [vmem:[%s9480_s16] ss:$0 sm:$0xff] }
 0x6fa   :  { %6638 = vmatpush3.bf16.msra.mxu1 %v7509_v30  ;;  %v7541_v30 = vld [vmem:[#allocation42 + $0x8] sm:$0xff]  }
 0x6fb   :  { %6639 = vmatprep.subr.bf16.mxu1 %v7510_v37  ;;  %v7538_v37 = vld [vmem:[#allocation39 + $0x30] sm:$0xff]  }
 0x6fd   :  { %v6623_v20 = vpop.f32.mrb[60].mxu0 }
 0x6fe   :  { %6640 = vmatpush3.bf16.msra.mxu1 %v7511_v51  ;;  %v6624_v53 = vpop.f32.mrb[61].mxu0  ;;  %v3661_v51 = vadd.f32 %v6192_v5, %v9315_v36  ;;  %v7544_v36 = vld [vmem:[#allocation42 + $0x20] sm:$0xff]   ;;  %v9482_v5 = vlaneseq }
 0x6ff   :  { %v9327_v24 = vadd.f32 %v6624_v53, %v6623_v20  ;;  %v6626_v3 = vpop.f32.mrb[62].mxu0  ;;  %6641 = vmatprep.subr.bf16.mxu1 %v7512_v16  ;;  %v7542_v16 = vld [vmem:[#allocation42 + $0x10] sm:$0xff]   ;;  %v7539_v20 = vld [vmem:[#allocation39 + $0x38] sm:$0xff]  }
 0x700   :  { %v6627_v25 = vpop.f32.mrb[63].mxu0  ;;  %v3666_v53 = vmax.f32 %v3661_v51, 0.0  ;;  %v7545_v3 = vld [vmem:[#allocation42 + $0x28] sm:$0xff]  }
 0x701   :  { %v7547_v25 = vld [vmem:[#allocation42 + $0x38] sm:$0xff]  }
 0x702   :  { %6642 = vmatpush3.bf16.msra.mxu1 %v7513_v41  ;;  %v7543_v41 = vld [vmem:[#allocation42 + $0x18] sm:$0xff]  }
 0x703   :  { %6643 = vmatprep.subr.bf16.mxu1 %v7514_v27  ;;  %v7546_v27 = vld [vmem:[#allocation42 + $0x30] sm:$0xff]  }
 0x706   :  { %6644 = vmatpush3.bf16.msra.mxu1 %v7515_v33  ;;  %v7548_v33 = vld [vmem:[#allocation45] sm:$0xff]  }
 0x707   :  { %6813 = vmatprep.subr.bf16.mxu1 %v9475_v14 }
 0x709   :  { %5142 = vmatmul.mubr.bf16.vlgmr.msra.gmra.mrb[64].mxu1 %v4471_v0  ;;  %v7550_v0 = vld [vmem:[#allocation45 + $0x10] sm:$0xff]  }
 0x70a   :  { %6814 = vmatpush3.bf16.msra.mxu1 %v7516_v63  ;;  %6829 = vmatprep.mubr.msk.bf16.mxu1 %vm8335_vm0, %v9475_v14  ;;  %v7549_v63 = vld [vmem:[#allocation45 + $0x8] sm:$0xff]  }
 0x70b   :  { %6815 = vmatprep.subr.bf16.mxu1 %v9475_v14 }
 0x70e   :  { %6816 = vmatpush3.bf16.msra.mxu1 %v7517_v54  ;;  %v7551_v54 = vld [vmem:[#allocation45 + $0x18] sm:$0xff]  }
 0x70f   :  { %6817 = vmatprep.subr.bf16.mxu1 %v9475_v14 }
 0x712   :  { %6818 = vmatpush3.bf16.msra.mxu1 %v7518_v18  ;;  %v7552_v18 = vld [vmem:[#allocation45 + $0x20] sm:$0xff]  }
 0x713   :  { %6819 = vmatprep.subr.bf16.mxu1 %v9475_v14 }
 0x716   :  { %6820 = vmatpush3.bf16.msra.mxu1 %v7519_v35  ;;  %v7553_v35 = vld [vmem:[#allocation45 + $0x28] sm:$0xff]  }
 0x717   :  { %6821 = vmatprep.subr.bf16.mxu1 %v9475_v14 }
 0x71a   :  { %6822 = vmatpush3.bf16.msra.mxu1 %v7520_v28 }
 0x71b   :  { %6823 = vmatprep.subr.bf16.mxu1 %v9475_v14 }
 0x71e   :  { %6824 = vmatpush3.bf16.msra.mxu1 %v7521_v42 }
 0x71f   :  { %6825 = vmatprep.subr.bf16.mxu1 %v9475_v14 }
 0x722   :  { %6826 = vmatpush3.bf16.msra.mxu1 %v7522_v43 }
 0x723   :  { %6827 = vmatprep.subr.bf16.mxu1 %v9475_v14 }
 0x726   :  { %6828 = vmatpush3.bf16.msra.mxu1 %v7523_v44 }
 0x727   :  { %6853 = vmatprep.subr.bf16.mxu1 %v9475_v14 }
 0x79c   :  { %v4462_v59 = vpop.f32.mrb[56].mxu1 }
 0x79d   :  { %v4463_v22 = vadd.f32 %v6266_v6, %v4462_v59  ;;  %v6791_v7 = vpop.f32.mrb[57].mxu1 }
 0x79e   :  { %v4465_v38 = vpop.f32.mrb[58].mxu1 }
 0x79f   :  { %v4468_v34 = vmax.f32 %v4463_v22, 0.0  ;;  %v6792_v21 = vpop.f32.mrb[59].mxu1 }
 0x7a0   :  { %v7555_v21 = vld [vmem:[#allocation45 + $0x38] sm:$0xff]  }
 0x7a1   :  { %v5288_v17 = vpack.c.bf16 %v4468_v34, %v4468_v34  ;;  %v7554_v34 = vld [vmem:[#allocation45 + $0x30] sm:$0xff]  }
 0x7a3   :  { %6830 = vmatmul.mubr.bf16.vlgmr.msra.gmra.mrb[68].mxu1 %v5288_v17  ;;  %v7556_v17 = vld [vmem:[#allocation48] sm:$0xff]  }
 0x7a4   :  { %6869 = vmatprep.mubr.msk.bf16.mxu1 %vm8335_vm0, %v9475_v14  ;;  %6854 = vmatpush3.bf16.msra.mxu1 %v7540_v47 }
 0x7a5   :  { %6855 = vmatprep.subr.bf16.mxu1 %v9475_v14 }
 0x7a8   :  { %6856 = vmatpush3.bf16.msra.mxu1 %v7541_v30  ;;  %v5825_v30 = vand.u32 127, %v9482_v5 }
 0x7a9   :  { %6857 = vmatprep.subr.bf16.mxu1 %v9475_v14 }
 0x7aa   :  { %vm5826_vm12 = vcmp.eq.s32.totalorder %v5825_v30, 7 }
 0x7ac   :  { %6858 = vmatpush3.bf16.msra.mxu1 %v7542_v16 }
 0x7ad   :  { %6859 = vmatprep.subr.bf16.mxu1 %v9475_v14 }
 0x7b0   :  { %6860 = vmatpush3.bf16.msra.mxu1 %v7543_v41 }
 0x7b1   :  { %6861 = vmatprep.subr.bf16.mxu1 %v9475_v14 }
 0x7b4   :  { %6862 = vmatpush3.bf16.msra.mxu1 %v7544_v36 }
 0x7b5   :  { %6863 = vmatprep.subr.bf16.mxu1 %v9475_v14 }
 0x7b8   :  { %6864 = vmatpush3.bf16.msra.mxu1 %v7545_v3 }
 0x7b9   :  { %6865 = vmatprep.subr.bf16.mxu1 %v9475_v14 }
 0x7bc   :  { %v6601_v11 = vpop.f32.mrb[60].mxu1  ;;  %6866 = vmatpush3.bf16.msra.mxu1 %v7546_v27 }
 0x7bd   :  { %v6602_v56 = vpop.f32.mrb[61].mxu1  ;;  %6867 = vmatprep.subr.bf16.mxu1 %v9475_v14 }
 0x7be   :  { %v6603_v29 = vadd.f32 %v6602_v56, %v6601_v11  ;;  %v6604_v49 = vpop.f32.mrb[62].mxu1  ;;  %v7557_v11 = vld [vmem:[#allocation48 + $0x8] sm:$0xff]   ;;  %v7558_v56 = vld [vmem:[#allocation48 + $0x10] sm:$0xff]  }
 0x7bf   :  { %v6605_v10 = vpop.f32.mrb[63].mxu1  ;;  %v7560_v49 = vld [vmem:[#allocation48 + $0x20] sm:$0xff]  }
 0x7c0   :  { %v4872_v58 = vadd.f32 %v6603_v29, %v9321_v40  ;;  %v7534_v40 = vld [vmem:[#allocation39 + $0x10] sm:$0xff]   ;;  %6868 = vmatpush3.bf16.msra.mxu1 %v7547_v25  ;;  %v7559_v29 = vld [vmem:[#allocation48 + $0x18] sm:$0xff]  }
 0x7c1   :  { %6893 = vmatprep.subr.bf16.mxu1 %v9475_v14  ;;  %v7561_v10 = vld [vmem:[#allocation48 + $0x28] sm:$0xff]  }
 0x7c2   :  { %v5104_v13 = vadd.f32 %v9327_v24, %v4872_v58  ;;  %v5271_v24 = vpack.c.bf16 %v3666_v53, %v3666_v53 }
 0x7dc   :  { %v6645_v4 = vpop.f32.mrb[64].mxu1 }
 0x7dd   :  { %v6646_v8 = vpop.f32.mrb[65].mxu1 }
 0x7de   :  { %v6647_v52 = vadd.f32 %v6646_v8, %v6645_v4  ;;  %v6648_v1 = vpop.f32.mrb[66].mxu1 }
 0x7df   :  { %v6649_v60 = vpop.f32.mrb[67].mxu1 }
 0x7e0   :  { %v5144_v2 = vadd.f32 %v6647_v52, %v5104_v13  ;;  %v6373_v13 = vld [vmem:[#allocation43] ss:$0 sm:$0xff] }
 0x7e2   :  { %v5156_v15 = vadd.f32 %v6339_v50, %v5144_v2 }
 0x7e4   :  { %v5157_v12 = vmax.f32 %v5156_v15, 0.0  ;;  %v7562_v15 = vld [vmem:[#allocation48 + $0x30] sm:$0xff]  }
 0x7e6   :  { %v5158_v31 = vpack.c.bf16 %v5157_v12, %v5157_v12  ;;  %v7563_v12 = vld [vmem:[#allocation48 + $0x38] sm:$0xff]  }
 0x7e8   :  { %6810 = vmatmul.mubr.bf16.vlgmr.msra.gmra.mrb[64].mxu0 %v5158_v31 }
 0x7e9   :  { %6834 = vmatpush3.bf16.msra.mxu0 %v7532_v48  ;;  %6849 = vmatprep.mubr.msk.bf16.mxu0 %vm8335_vm0, %v9475_v14  ;;  %v6374_v48 = vld [vmem:[#allocation46] ss:$0 sm:$0xff] }
 0x7ea   :  { %6835 = vmatprep.subr.bf16.mxu0 %v9475_v14 }
 0x7ed   :  { %6836 = vmatpush3.bf16.msra.mxu0 %v7533_v45 }
 0x7ee   :  { %6837 = vmatprep.subr.bf16.mxu0 %v9475_v14 }
 0x7f1   :  { %6838 = vmatpush3.bf16.msra.mxu0 %v7534_v40 }
 0x7f2   :  { %6839 = vmatprep.subr.bf16.mxu0 %v9475_v14 }
 0x7f5   :  { %6840 = vmatpush3.bf16.msra.mxu0 %v7535_v32 }
 0x7f6   :  { %6841 = vmatprep.subr.bf16.mxu0 %v9475_v14 }
 0x7f9   :  { %6842 = vmatpush3.bf16.msra.mxu0 %v7536_v55 }
 0x7fa   :  { %6843 = vmatprep.subr.bf16.mxu0 %v9475_v14 }
 0x7fd   :  { %6844 = vmatpush3.bf16.msra.mxu0 %v7537_v46 }
 0x7fe   :  { %6845 = vmatprep.subr.bf16.mxu0 %v9475_v14 }
 0x801   :  { %6846 = vmatpush3.bf16.msra.mxu0 %v7538_v37  ;;  %v6383_v37 = vld [vmem:[#allocation49] ss:$0 sm:$0xff] }
 0x802   :  { %6847 = vmatprep.subr.bf16.mxu0 %v9475_v14 }
 0x805   :  { %6848 = vmatpush3.bf16.msra.mxu0 %v7539_v20 }
 0x806   :  { %6873 = vmatprep.subr.bf16.mxu0 %v9475_v14 }
 0x808   :  { %6850 = vmatmul.mubr.bf16.vlgmr.msra.gmra.mrb[68].mxu0 %v5271_v24 }
 0x809   :  { %6889 = vmatprep.mubr.msk.bf16.mxu0 %vm8335_vm0, %v9475_v14  ;;  %6874 = vmatpush3.bf16.msra.mxu0 %v7548_v33 }
 0x80a   :  { %6875 = vmatprep.subr.bf16.mxu0 %v9475_v14 }
 0x80d   :  { %6876 = vmatpush3.bf16.msra.mxu0 %v7549_v63 }
 0x80e   :  { %6877 = vmatprep.subr.bf16.mxu0 %v9475_v14 }
 0x811   :  { %6878 = vmatpush3.bf16.msra.mxu0 %v7550_v0 }
 0x812   :  { %6879 = vmatprep.subr.bf16.mxu0 %v9475_v14 }
 0x815   :  { %6880 = vmatpush3.bf16.msra.mxu0 %v7551_v54 }
 0x816   :  { %6881 = vmatprep.subr.bf16.mxu0 %v9475_v14 }
 0x819   :  { %6882 = vmatpush3.bf16.msra.mxu0 %v7552_v18 }
 0x81a   :  { %6883 = vmatprep.subr.bf16.mxu0 %v9475_v14 }
 0x81d   :  { %6884 = vmatpush3.bf16.msra.mxu0 %v7553_v35 }
 0x81e   :  { %6885 = vmatprep.subr.bf16.mxu0 %v9475_v14 }
 0x821   :  { %6886 = vmatpush3.bf16.msra.mxu0 %v7554_v34 }
 0x822   :  { %6887 = vmatprep.subr.bf16.mxu0 %v9475_v14 }
 0x825   :  { %6888 = vmatpush3.bf16.msra.mxu0 %v7555_v21 }
 0x876   :  { %v5387_v28 = vpop.f32.mrb[68].mxu1 }
 0x877   :  { %v6831_v42 = vpop.f32.mrb[69].mxu1 }
 0x878   :  { %v5390_v43 = vpop.f32.mrb[70].mxu1 }
 0x879   :  { %v6832_v44 = vpop.f32.mrb[71].mxu1 }
 0x8bb   :  { %v5264_v39 = vpop.f32.mrb[64].mxu0 }
 0x8bc   :  { %v5265_v57 = vadd.f32 %v6340_v26, %v5264_v39  ;;  %v6811_v62 = vpop.f32.mrb[65].mxu0 }
 0x8bd   :  { %v5267_v19 = vpop.f32.mrb[66].mxu0 }
 0x8be   :  { %v5270_v23 = vmax.f32 %v5265_v57, 0.0  ;;  %v6812_v9 = vpop.f32.mrb[67].mxu0 }
 0x8c0   :  { %v5481_v61 = vpack.c.bf16 %v5270_v23, %v5270_v23 }
 0x8c2   :  { %6870 = vmatmul.mubr.bf16.vlgmr.msra.gmra.mrb[72].mxu1 %v5481_v61 }
 0x8c3   :  { %6909 = vmatprep.mubr.msk.bf16.mxu1 %vm8335_vm0, %v9475_v14  ;;  %6894 = vmatpush3.bf16.msra.mxu1 %v7556_v17 }
 0x8c4   :  { %6895 = vmatprep.subr.bf16.mxu1 %v9475_v14 }
 0x8c7   :  { %6896 = vmatpush3.bf16.msra.mxu1 %v7557_v11 }
 0x8c8   :  { %6897 = vmatprep.subr.bf16.mxu1 %v9475_v14 }
 0x8cb   :  { %6898 = vmatpush3.bf16.msra.mxu1 %v7558_v56 }
 0x8cc   :  { %6899 = vmatprep.subr.bf16.mxu1 %v9475_v14 }
 0x8cf   :  { %6900 = vmatpush3.bf16.msra.mxu1 %v7559_v29 }
 0x8d0   :  { %6901 = vmatprep.subr.bf16.mxu1 %v9475_v14 }
 0x8d3   :  { %6902 = vmatpush3.bf16.msra.mxu1 %v7560_v49 }
 0x8d4   :  { %6903 = vmatprep.subr.bf16.mxu1 %v9475_v14 }
 0x8d7   :  { %6904 = vmatpush3.bf16.msra.mxu1 %v7561_v10 }
 0x8d8   :  { %6905 = vmatprep.subr.bf16.mxu1 %v9475_v14 }
 0x8db   :  { %v5475_v6 = vpop.f32.mrb[68].mxu0  ;;  %6906 = vmatpush3.bf16.msra.mxu1 %v7562_v15 }
 0x8dc   :  { %v5476_v59 = vadd.f32 %v5475_v6, %v5387_v28  ;;  %v6851_v22 = vpop.f32.mrb[69].mxu0  ;;  %6907 = vmatprep.subr.bf16.mxu1 %v9475_v14  ;;  %v5830_v14 = vpop.permute.xlu1 %5829 }
 0x8dd   :  { %v5478_v7 = vpop.f32.mrb[70].mxu0 }
 0x8de   :  { %v6852_v38 = vpop.f32.mrb[71].mxu0 }
 0x8df   :  { %6908 = vmatpush3.bf16.msra.mxu1 %v7563_v12 }
 0x995   :  { %v5580_v58 = vpop.f32.mrb[72].mxu1 }
 0x996   :  { %v5586_v4 = vadd.f32 %v5580_v58, %v5476_v59  ;;  %v6871_v8 = vpop.f32.mrb[73].mxu1 }
 0x997   :  { %v5583_v52 = vpop.f32.mrb[74].mxu1 }
 0x998   :  { %v5594_v1 = vadd.f32 %v6373_v13, %v5586_v4  ;;  %v6872_v50 = vpop.f32.mrb[75].mxu1 }
 0x99a   :  { %v5595_v60 = vmax.f32 %v5594_v1, 0.0 }
 0x99c   :  { %v5596_v2 = vpack.c.bf16 %v5595_v60, %v5595_v60 }
 0x99e   :  { %6890 = vmatmul.mubr.bf16.vlgmr.msra.gmra.mrb[72].mxu0 %v5596_v2 }
 0xa71   :  { %v5702_v31 = vpop.f32.mrb[72].mxu0 }
 0xa72   :  { %v5703_v45 = vadd.f32 %v6374_v48, %v5702_v31  ;;  %v6891_v40 = vpop.f32.mrb[73].mxu0 }
 0xa73   :  { %v5705_v32 = vpop.f32.mrb[74].mxu0 }
 0xa74   :  { %v5708_v55 = vmax.f32 %v5703_v45, 0.0  ;;  %v6892_v46 = vpop.f32.mrb[75].mxu0 }
 0xa76   :  { %5709 = vst [vmem:[%s8550_s5] sm:$0xff] %v5708_v55  ;;  %v5710_v47 = vpack.c.bf16 %v5708_v55, %v5708_v55 }
 0xa78   :  { %6910 = vmatmul.mubr.bf16.vlgmr.msra.gmra.mrb[76].mxu1 %v5710_v47 }
 0xb4b   :  { %v5816_v51 = vpop.f32.mrb[76].mxu1 }
 0xb4c   :  { %v5817_v16 = vadd.f32 %v6383_v37, %v5816_v51  ;;  %v6911_v20 = vpop.f32.mrb[77].mxu1 }
 0xb4d   :  { %v5819_v53 = vpop.f32.mrb[78].mxu1 }
 0xb4e   :  { %v5832_v41 = vsel %vm5826_vm12, %v5830_v14, %v5817_v16  ;;  %v6912_v24 = vpop.f32.mrb[79].mxu1 }
 0xb4f   :  { %5833 = vst [vmem:[%s8555_s25] sm:$0xff] %v5832_v41 }
 0xb50   :  { %5842 = vsyncpa [#allocation6], 1 }
 0xb51   :  { %5843 = vsyncpa [#allocation8], 1 }
 0xb52   :  { %5844 = vsyncpa [#allocation11], 1 }
 0xb53   :  { %5845 = vsyncpa [#allocation14], 1 }
 0xb54   :  { %5846 = vsyncpa [#allocation17], 1 }
 0xb55   :  { %5847 = vsyncpa [#allocation20], 1 }
 0xb56   :  { %5848 = vsyncpa [#allocation23], 1 }
 0xb57   :  { %5849 = vsyncpa [#allocation26], 1 }
 0xb58   :  { %5850 = vsyncpa [#allocation29], 1 }
 0xb59   :  { %5851 = vsyncpa [#allocation32], 1 }
 0xb5a   :  { %5852 = vsyncpa [#allocation35], 1 }
 0xb5b   :  { %5853 = vsyncpa [#allocation38], 1 }
 0xb5c   :  { %5854 = vsyncpa [#allocation41], 1 }
 0xb5d   :  { %5855 = vsyncpa [#allocation44], 1 }
 0xb5e   :  { %5856 = vsyncpa [#allocation47], 1 }
 0xb5f   :  { %5857 = vsyncpa [#allocation50], 1 }

</bundles_post_ra>
